<compile_context>
chip_gen: v6e
topology: v6e:2x2x1
jax: 0.10.0
libtpu: 0.0.40
codegen_flags: <defaults>
</compile_context>

<pallas_src>
import jax
import jax.numpy as jnp
from jax.experimental import pallas as pl
from jax.experimental.pallas import tpu as pltpu

N_EMIT = 6  # output layer is applied to the last 6 time points (hvx[-6:])


def _ndcn_fused_kernel(dt_ref, x_ref, a_ref, w1_ref, b1_ref, w2_ref, b2_ref,
                       wt_ref, bt_ref, wo_ref, out_ref):
    n_emit, n, _ = out_ref.shape
    hid = wt_ref.shape[0]
    t = dt_ref.shape[0] + 1          # number of time points (static)
    emit_start = t - n_emit          # first time index that is emitted

    # ---- input embedding -> initial ODE state (kept as a carried value) ----
    h = jnp.tanh(
        jnp.dot(x_ref[...], w1_ref[...], preferred_element_type=jnp.float32)
        + b1_ref[...])
    st = (jnp.dot(h, w2_ref[...], preferred_element_type=jnp.float32)
          + b2_ref[...])

    # ---- hoisted loads / broadcasts (reused by all 4*(T-1) f() calls) -------
    a = a_ref[...]                                        # bf16 (N, N)
    wt = wt_ref[...]                                      # f32 (hid, hid)
    bt = jnp.broadcast_to(bt_ref[...], (n, hid))          # hoisted broadcast
    wo = wo_ref[...]                                      # f32 (hid, out)

    def f(x_f32):
        # Dominant A@X matmul on the MXU in bf16; accumulate in f32.
        ax = jnp.dot(a, x_f32.astype(jnp.bfloat16),
                     preferred_element_type=jnp.float32)
        hh = jnp.dot(ax, wt, preferred_element_type=jnp.float32) + bt
        return jnp.maximum(hh, 0.0)

    # ---- fully unrolled time loop (T static, all out_ref indices static) ----
    for i in range(t - 1):
        if i >= emit_start:
            out_ref[i - emit_start] = jnp.dot(
                st, wo, preferred_element_type=jnp.float32)

        dt = dt_ref[i]
        dt_half = dt * 0.5
        dt_6 = dt * (1.0 / 6.0)
        dt_3 = dt * (1.0 / 3.0)

        # Incremental RK4 accumulation (fewer live full-size temporaries).
        k = f(st)                                  # k1
        acc = st + dt_6 * k
        k = f(st + dt_half * k)                    # k2
        acc = acc + dt_3 * k
        k = f(st + dt_half * k)                    # k3
        acc = acc + dt_3 * k
        k = f(st + dt * k)                         # k4
        st = acc + dt_6 * k

    # Final time point is always emitted (hvx[-1]).
    out_ref[n_emit - 1] = jnp.dot(st, wo, preferred_element_type=jnp.float32)


def _ndcn_forward_impl(vt, x, params):
    t = vt.shape[0]
    n, in_size = x.shape
    hid = params["w1"].shape[1]
    out = params["wo"].shape[1]
    n_emit = min(N_EMIT, t)

    # dt[i] = vt[i+1] - vt[i]  (length T-1; pad to 1 if T == 1, never read).
    if t >= 2:
        dt = vt[1:] - vt[:-1]
    else:
        dt = jnp.zeros((1,), vt.dtype)
    a_bf16 = params["A"].astype(jnp.bfloat16)

    vmem_spec = pl.BlockSpec(memory_space=pltpu.MemorySpace.VMEM)
    smem_spec = pl.BlockSpec(memory_space=pltpu.MemorySpace.SMEM)

    out_bytes = 4 * n_emit * n * out
    resident_bytes = (a_bf16.size * 2 + x.size * 4 + out_bytes
                      + sum(params[k].size * 4
                            for k in ("w1", "b1", "w2", "b2", "wt", "bt", "wo")))
    # Explicit VMEM budget (v5e scoped default is 16 MiB; stay well under the
    # v7x 64 MiB physical ceiling). Headroom for compiler temporaries.
    vmem_limit = int(min(48 << 20, max(8 << 20, 4 * resident_bytes)))

    flops = (2 * n * in_size * hid + 2 * n * hid * hid                  # embed
             + (t - 1) * 4 * (2 * n * n * hid + 2 * n * hid * hid)      # RK4
             + n_emit * 2 * n * hid * out)                              # proj
    cost = pl.CostEstimate(
        flops=flops,
        transcendentals=n * hid,                                        # tanh
        bytes_accessed=resident_bytes + dt.size * 4)

    return pl.pallas_call(
        _ndcn_fused_kernel,
        out_shape=jax.ShapeDtypeStruct((n_emit, n, out), jnp.float32),
        grid=(),
        in_specs=[
            smem_spec,                                   # dt (scalars)
            vmem_spec,                                   # x
            vmem_spec,                                   # A (bf16)
            vmem_spec, vmem_spec,                        # w1, b1
            vmem_spec, vmem_spec,                        # w2, b2
            vmem_spec, vmem_spec,                        # wt, bt
            vmem_spec,                                   # wo
        ],
        out_specs=vmem_spec,
        compiler_params=pltpu.CompilerParams(vmem_limit_bytes=vmem_limit),
        cost_estimate=cost,
    )(dt, x, a_bf16, params["w1"], params["b1"], params["w2"], params["b2"],
      params["wt"], params["bt"], params["wo"])


ndcn_forward = jax.jit(_ndcn_forward_impl)


# Pure-JAX reference (same fixed-step RK4, same bf16 A@X precision pattern).
def ndcn_forward_ref(vt, x, params):
    h = jnp.tanh(x @ params["w1"] + params["b1"]) @ params["w2"] + params["b2"]
    a_bf16 = params["A"].astype(jnp.bfloat16)

    def f(xx):
        ax = jnp.dot(a_bf16, xx.astype(jnp.bfloat16),
                     preferred_element_type=jnp.float32)
        return jnp.maximum(ax @ params["wt"] + params["bt"], 0.0)

    traj = [h]
    for i in range(vt.shape[0] - 1):
        dt = vt[i + 1] - vt[i]
        xx = traj[-1]
        k1 = f(xx); k2 = f(xx + dt * 0.5 * k1)
        k3 = f(xx + dt * 0.5 * k2); k4 = f(xx + dt * k3)
        traj.append(xx + (dt / 6.0) * (k1 + 2 * k2 + 2 * k3 + k4))
    hvx = jnp.stack(traj)
    return jnp.stack([hh @ params["wo"] for hh in hvx[-N_EMIT:]])


if __name__ == "__main__":
    # Small shapes consistent with the module: N_node nodes, input feat -> hidden -> out.
    N_NODE, INPUT_SIZE, HIDDEN, OUT_SIZE, T = 64, 8, 32, 8, 8

    key = jax.random.PRNGKey(0)
    keys = jax.random.split(key, 8)

    # Deterministic synthetic parameters (PyTorch-Linear-like small uniforms).
    def uinit(k, shape, fan_in):
        bound = 1.0 / jnp.sqrt(jnp.float32(fan_in))
        return jax.random.uniform(k, shape, jnp.float32, -bound, bound)

    # Row-normalized random graph operator A (dense).
    a_raw = jax.random.uniform(keys[0], (N_NODE, N_NODE), jnp.float32)
    a = a_raw / jnp.sum(a_raw, axis=1, keepdims=True)

    params = {
        "A": a,
        "w1": uinit(keys[1], (INPUT_SIZE, HIDDEN), INPUT_SIZE),
        "b1": uinit(keys[2], (1, HIDDEN), INPUT_SIZE),
        "w2": uinit(keys[3], (HIDDEN, HIDDEN), HIDDEN),
        "b2": uinit(keys[4], (1, HIDDEN), HIDDEN),
        "wt": uinit(keys[5], (HIDDEN, HIDDEN), HIDDEN),
        "bt": uinit(keys[6], (1, HIDDEN), HIDDEN),
        "wo": uinit(keys[7], (HIDDEN, OUT_SIZE), HIDDEN),
    }

    x = jax.random.normal(jax.random.PRNGKey(1), (N_NODE, INPUT_SIZE), jnp.float32)
    vt = jnp.linspace(0.0, 1.0, T, dtype=jnp.float32)

    emb = ndcn_forward(vt, x, params)
    emb = jax.block_until_ready(emb)

    ref = ndcn_forward_ref(vt, x, params)
    assert emb.shape == (N_EMIT, N_NODE, OUT_SIZE)
    assert jnp.allclose(emb, ref, rtol=1e-3, atol=1e-3), "mismatch vs JAX reference"

    print("KERNEL_OK")
</pallas_src>

<mosaic_0001>
module attributes {stable_mosaic.version = 11 : i64} {
  func.func @_ndcn_fused_kernel(%arg0: memref<7xf32, #tpu.memory_space<smem>>, %arg1: memref<64x8xf32, #tpu.memory_space<vmem>>, %arg2: memref<64x64xbf16, #tpu.memory_space<vmem>>, %arg3: memref<8x32xf32, #tpu.memory_space<vmem>>, %arg4: memref<1x32xf32, #tpu.memory_space<vmem>>, %arg5: memref<32x32xf32, #tpu.memory_space<vmem>>, %arg6: memref<1x32xf32, #tpu.memory_space<vmem>>, %arg7: memref<32x32xf32, #tpu.memory_space<vmem>>, %arg8: memref<1x32xf32, #tpu.memory_space<vmem>>, %arg9: memref<32x8xf32, #tpu.memory_space<vmem>>, %arg10: memref<6x64x8xf32, #tpu.memory_space<vmem>>) attributes {dimension_semantics = [], scalar_prefetch = 0 : i64, scratch_operands = 0 : i64, tpu.core_type = #tpu.core_type<tc>} {
    %c0 = arith.constant 0 : index
    %c0_0 = arith.constant 0 : index
    %0 = vector.load %arg1[%c0, %c0_0] : memref<64x8xf32, #tpu.memory_space<vmem>>, vector<64x8xf32>
    %c0_1 = arith.constant 0 : index
    %c0_2 = arith.constant 0 : index
    %1 = vector.load %arg3[%c0_1, %c0_2] : memref<8x32xf32, #tpu.memory_space<vmem>>, vector<8x32xf32>
    %cst = arith.constant dense<0.000000e+00> : vector<64x32xf32>
    %2 = tpu.matmul %0, %1, %cst {dimension_numbers = #tpu.dot_dimension_numbers<[1], [0], [0], [1], [0, 0, 1, 1], [], []>} : vector<64x8xf32>, vector<8x32xf32>, vector<64x32xf32> -> vector<64x32xf32>
    %c0_3 = arith.constant 0 : index
    %c0_4 = arith.constant 0 : index
    %3 = vector.load %arg4[%c0_3, %c0_4] : memref<1x32xf32, #tpu.memory_space<vmem>>, vector<1x32xf32>
    %4 = vector.broadcast %3 : vector<1x32xf32> to vector<64x32xf32>
    %5 = arith.addf %2, %4 : vector<64x32xf32>
    %6 = math.tanh %5 : vector<64x32xf32>
    %c0_5 = arith.constant 0 : index
    %c0_6 = arith.constant 0 : index
    %7 = vector.load %arg5[%c0_5, %c0_6] : memref<32x32xf32, #tpu.memory_space<vmem>>, vector<32x32xf32>
    %cst_7 = arith.constant dense<0.000000e+00> : vector<64x32xf32>
    %8 = tpu.matmul %6, %7, %cst_7 {dimension_numbers = #tpu.dot_dimension_numbers<[1], [0], [0], [1], [0, 0, 1, 1], [], []>} : vector<64x32xf32>, vector<32x32xf32>, vector<64x32xf32> -> vector<64x32xf32>
    %c0_8 = arith.constant 0 : index
    %c0_9 = arith.constant 0 : index
    %9 = vector.load %arg6[%c0_8, %c0_9] : memref<1x32xf32, #tpu.memory_space<vmem>>, vector<1x32xf32>
    %10 = vector.broadcast %9 : vector<1x32xf32> to vector<64x32xf32>
    %11 = arith.addf %8, %10 : vector<64x32xf32>
    %c0_10 = arith.constant 0 : index
    %c0_11 = arith.constant 0 : index
    %12 = vector.load %arg2[%c0_10, %c0_11] : memref<64x64xbf16, #tpu.memory_space<vmem>>, vector<64x64xbf16>
    %c0_12 = arith.constant 0 : index
    %c0_13 = arith.constant 0 : index
    %13 = vector.load %arg7[%c0_12, %c0_13] : memref<32x32xf32, #tpu.memory_space<vmem>>, vector<32x32xf32>
    %c0_14 = arith.constant 0 : index
    %c0_15 = arith.constant 0 : index
    %14 = vector.load %arg8[%c0_14, %c0_15] : memref<1x32xf32, #tpu.memory_space<vmem>>, vector<1x32xf32>
    %15 = vector.shape_cast %14 : vector<1x32xf32> to vector<1x32xf32>
    %16 = vector.broadcast %15 : vector<1x32xf32> to vector<64x32xf32>
    %c0_16 = arith.constant 0 : index
    %c0_17 = arith.constant 0 : index
    %17 = vector.load %arg9[%c0_16, %c0_17] : memref<32x8xf32, #tpu.memory_space<vmem>>, vector<32x8xf32>
    %c0_18 = arith.constant 0 : index
    %18 = memref.load %arg0[%c0_18] : memref<7xf32, #tpu.memory_space<smem>>
    %cst_19 = arith.constant 5.000000e-01 : f32
    %19 = arith.mulf %18, %cst_19 : f32
    %cst_20 = arith.constant 0.166666672 : f32
    %20 = arith.mulf %18, %cst_20 : f32
    %cst_21 = arith.constant 0.333333343 : f32
    %21 = arith.mulf %18, %cst_21 : f32
    %22 = arith.truncf %11 : vector<64x32xf32> to vector<64x32xbf16>
    %cst_22 = arith.constant dense<0.000000e+00> : vector<64x32xf32>
    %23 = tpu.matmul %12, %22, %cst_22 {dimension_numbers = #tpu.dot_dimension_numbers<[1], [0], [0], [1], [0, 0, 1, 1], [], []>} : vector<64x64xbf16>, vector<64x32xbf16>, vector<64x32xf32> -> vector<64x32xf32>
    %cst_23 = arith.constant dense<0.000000e+00> : vector<64x32xf32>
    %24 = tpu.matmul %23, %13, %cst_23 {dimension_numbers = #tpu.dot_dimension_numbers<[1], [0], [0], [1], [0, 0, 1, 1], [], []>} : vector<64x32xf32>, vector<32x32xf32>, vector<64x32xf32> -> vector<64x32xf32>
    %25 = arith.addf %24, %16 : vector<64x32xf32>
    %cst_24 = arith.constant 0.000000e+00 : f32
    %26 = vector.broadcast %cst_24 : f32 to vector<64x32xf32>
    %27 = arith.maximumf %25, %26 : vector<64x32xf32>
    %28 = vector.broadcast %20 : f32 to vector<64x32xf32>
    %29 = arith.mulf %28, %27 : vector<64x32xf32>
    %30 = arith.addf %11, %29 : vector<64x32xf32>
    %31 = vector.broadcast %19 : f32 to vector<64x32xf32>
    %32 = arith.mulf %31, %27 : vector<64x32xf32>
    %33 = arith.addf %11, %32 : vector<64x32xf32>
    %34 = arith.truncf %33 : vector<64x32xf32> to vector<64x32xbf16>
    %cst_25 = arith.constant dense<0.000000e+00> : vector<64x32xf32>
    %35 = tpu.matmul %12, %34, %cst_25 {dimension_numbers = #tpu.dot_dimension_numbers<[1], [0], [0], [1], [0, 0, 1, 1], [], []>} : vector<64x64xbf16>, vector<64x32xbf16>, vector<64x32xf32> -> vector<64x32xf32>
    %cst_26 = arith.constant dense<0.000000e+00> : vector<64x32xf32>
    %36 = tpu.matmul %35, %13, %cst_26 {dimension_numbers = #tpu.dot_dimension_numbers<[1], [0], [0], [1], [0, 0, 1, 1], [], []>} : vector<64x32xf32>, vector<32x32xf32>, vector<64x32xf32> -> vector<64x32xf32>
    %37 = arith.addf %36, %16 : vector<64x32xf32>
    %cst_27 = arith.constant 0.000000e+00 : f32
    %38 = vector.broadcast %cst_27 : f32 to vector<64x32xf32>
    %39 = arith.maximumf %37, %38 : vector<64x32xf32>
    %40 = vector.broadcast %21 : f32 to vector<64x32xf32>
    %41 = arith.mulf %40, %39 : vector<64x32xf32>
    %42 = arith.addf %30, %41 : vector<64x32xf32>
    %43 = vector.broadcast %19 : f32 to vector<64x32xf32>
    %44 = arith.mulf %43, %39 : vector<64x32xf32>
    %45 = arith.addf %11, %44 : vector<64x32xf32>
    %46 = arith.truncf %45 : vector<64x32xf32> to vector<64x32xbf16>
    %cst_28 = arith.constant dense<0.000000e+00> : vector<64x32xf32>
    %47 = tpu.matmul %12, %46, %cst_28 {dimension_numbers = #tpu.dot_dimension_numbers<[1], [0], [0], [1], [0, 0, 1, 1], [], []>} : vector<64x64xbf16>, vector<64x32xbf16>, vector<64x32xf32> -> vector<64x32xf32>
    %cst_29 = arith.constant dense<0.000000e+00> : vector<64x32xf32>
    %48 = tpu.matmul %47, %13, %cst_29 {dimension_numbers = #tpu.dot_dimension_numbers<[1], [0], [0], [1], [0, 0, 1, 1], [], []>} : vector<64x32xf32>, vector<32x32xf32>, vector<64x32xf32> -> vector<64x32xf32>
    %49 = arith.addf %48, %16 : vector<64x32xf32>
    %cst_30 = arith.constant 0.000000e+00 : f32
    %50 = vector.broadcast %cst_30 : f32 to vector<64x32xf32>
    %51 = arith.maximumf %49, %50 : vector<64x32xf32>
    %52 = vector.broadcast %21 : f32 to vector<64x32xf32>
    %53 = arith.mulf %52, %51 : vector<64x32xf32>
    %54 = arith.addf %42, %53 : vector<64x32xf32>
    %55 = vector.broadcast %18 : f32 to vector<64x32xf32>
    %56 = arith.mulf %55, %51 : vector<64x32xf32>
    %57 = arith.addf %11, %56 : vector<64x32xf32>
    %58 = arith.truncf %57 : vector<64x32xf32> to vector<64x32xbf16>
    %cst_31 = arith.constant dense<0.000000e+00> : vector<64x32xf32>
    %59 = tpu.matmul %12, %58, %cst_31 {dimension_numbers = #tpu.dot_dimension_numbers<[1], [0], [0], [1], [0, 0, 1, 1], [], []>} : vector<64x64xbf16>, vector<64x32xbf16>, vector<64x32xf32> -> vector<64x32xf32>
    %cst_32 = arith.constant dense<0.000000e+00> : vector<64x32xf32>
    %60 = tpu.matmul %59, %13, %cst_32 {dimension_numbers = #tpu.dot_dimension_numbers<[1], [0], [0], [1], [0, 0, 1, 1], [], []>} : vector<64x32xf32>, vector<32x32xf32>, vector<64x32xf32> -> vector<64x32xf32>
    %61 = arith.addf %60, %16 : vector<64x32xf32>
    %cst_33 = arith.constant 0.000000e+00 : f32
    %62 = vector.broadcast %cst_33 : f32 to vector<64x32xf32>
    %63 = arith.maximumf %61, %62 : vector<64x32xf32>
    %64 = vector.broadcast %20 : f32 to vector<64x32xf32>
    %65 = arith.mulf %64, %63 : vector<64x32xf32>
    %66 = arith.addf %54, %65 : vector<64x32xf32>
    %c1 = arith.constant 1 : index
    %67 = memref.load %arg0[%c1] : memref<7xf32, #tpu.memory_space<smem>>
    %cst_34 = arith.constant 5.000000e-01 : f32
    %68 = arith.mulf %67, %cst_34 : f32
    %cst_35 = arith.constant 0.166666672 : f32
    %69 = arith.mulf %67, %cst_35 : f32
    %cst_36 = arith.constant 0.333333343 : f32
    %70 = arith.mulf %67, %cst_36 : f32
    %71 = arith.truncf %66 : vector<64x32xf32> to vector<64x32xbf16>
    %cst_37 = arith.constant dense<0.000000e+00> : vector<64x32xf32>
    %72 = tpu.matmul %12, %71, %cst_37 {dimension_numbers = #tpu.dot_dimension_numbers<[1], [0], [0], [1], [0, 0, 1, 1], [], []>} : vector<64x64xbf16>, vector<64x32xbf16>, vector<64x32xf32> -> vector<64x32xf32>
    %cst_38 = arith.constant dense<0.000000e+00> : vector<64x32xf32>
    %73 = tpu.matmul %72, %13, %cst_38 {dimension_numbers = #tpu.dot_dimension_numbers<[1], [0], [0], [1], [0, 0, 1, 1], [], []>} : vector<64x32xf32>, vector<32x32xf32>, vector<64x32xf32> -> vector<64x32xf32>
    %74 = arith.addf %73, %16 : vector<64x32xf32>
    %cst_39 = arith.constant 0.000000e+00 : f32
    %75 = vector.broadcast %cst_39 : f32 to vector<64x32xf32>
    %76 = arith.maximumf %74, %75 : vector<64x32xf32>
    %77 = vector.broadcast %69 : f32 to vector<64x32xf32>
    %78 = arith.mulf %77, %76 : vector<64x32xf32>
    %79 = arith.addf %66, %78 : vector<64x32xf32>
    %80 = vector.broadcast %68 : f32 to vector<64x32xf32>
    %81 = arith.mulf %80, %76 : vector<64x32xf32>
    %82 = arith.addf %66, %81 : vector<64x32xf32>
    %83 = arith.truncf %82 : vector<64x32xf32> to vector<64x32xbf16>
    %cst_40 = arith.constant dense<0.000000e+00> : vector<64x32xf32>
    %84 = tpu.matmul %12, %83, %cst_40 {dimension_numbers = #tpu.dot_dimension_numbers<[1], [0], [0], [1], [0, 0, 1, 1], [], []>} : vector<64x64xbf16>, vector<64x32xbf16>, vector<64x32xf32> -> vector<64x32xf32>
    %cst_41 = arith.constant dense<0.000000e+00> : vector<64x32xf32>
    %85 = tpu.matmul %84, %13, %cst_41 {dimension_numbers = #tpu.dot_dimension_numbers<[1], [0], [0], [1], [0, 0, 1, 1], [], []>} : vector<64x32xf32>, vector<32x32xf32>, vector<64x32xf32> -> vector<64x32xf32>
    %86 = arith.addf %85, %16 : vector<64x32xf32>
    %cst_42 = arith.constant 0.000000e+00 : f32
    %87 = vector.broadcast %cst_42 : f32 to vector<64x32xf32>
    %88 = arith.maximumf %86, %87 : vector<64x32xf32>
    %89 = vector.broadcast %70 : f32 to vector<64x32xf32>
    %90 = arith.mulf %89, %88 : vector<64x32xf32>
    %91 = arith.addf %79, %90 : vector<64x32xf32>
    %92 = vector.broadcast %68 : f32 to vector<64x32xf32>
    %93 = arith.mulf %92, %88 : vector<64x32xf32>
    %94 = arith.addf %66, %93 : vector<64x32xf32>
    %95 = arith.truncf %94 : vector<64x32xf32> to vector<64x32xbf16>
    %cst_43 = arith.constant dense<0.000000e+00> : vector<64x32xf32>
    %96 = tpu.matmul %12, %95, %cst_43 {dimension_numbers = #tpu.dot_dimension_numbers<[1], [0], [0], [1], [0, 0, 1, 1], [], []>} : vector<64x64xbf16>, vector<64x32xbf16>, vector<64x32xf32> -> vector<64x32xf32>
    %cst_44 = arith.constant dense<0.000000e+00> : vector<64x32xf32>
    %97 = tpu.matmul %96, %13, %cst_44 {dimension_numbers = #tpu.dot_dimension_numbers<[1], [0], [0], [1], [0, 0, 1, 1], [], []>} : vector<64x32xf32>, vector<32x32xf32>, vector<64x32xf32> -> vector<64x32xf32>
    %98 = arith.addf %97, %16 : vector<64x32xf32>
    %cst_45 = arith.constant 0.000000e+00 : f32
    %99 = vector.broadcast %cst_45 : f32 to vector<64x32xf32>
    %100 = arith.maximumf %98, %99 : vector<64x32xf32>
    %101 = vector.broadcast %70 : f32 to vector<64x32xf32>
    %102 = arith.mulf %101, %100 : vector<64x32xf32>
    %103 = arith.addf %91, %102 : vector<64x32xf32>
    %104 = vector.broadcast %67 : f32 to vector<64x32xf32>
    %105 = arith.mulf %104, %100 : vector<64x32xf32>
    %106 = arith.addf %66, %105 : vector<64x32xf32>
    %107 = arith.truncf %106 : vector<64x32xf32> to vector<64x32xbf16>
    %cst_46 = arith.constant dense<0.000000e+00> : vector<64x32xf32>
    %108 = tpu.matmul %12, %107, %cst_46 {dimension_numbers = #tpu.dot_dimension_numbers<[1], [0], [0], [1], [0, 0, 1, 1], [], []>} : vector<64x64xbf16>, vector<64x32xbf16>, vector<64x32xf32> -> vector<64x32xf32>
    %cst_47 = arith.constant dense<0.000000e+00> : vector<64x32xf32>
    %109 = tpu.matmul %108, %13, %cst_47 {dimension_numbers = #tpu.dot_dimension_numbers<[1], [0], [0], [1], [0, 0, 1, 1], [], []>} : vector<64x32xf32>, vector<32x32xf32>, vector<64x32xf32> -> vector<64x32xf32>
    %110 = arith.addf %109, %16 : vector<64x32xf32>
    %cst_48 = arith.constant 0.000000e+00 : f32
    %111 = vector.broadcast %cst_48 : f32 to vector<64x32xf32>
    %112 = arith.maximumf %110, %111 : vector<64x32xf32>
    %113 = vector.broadcast %69 : f32 to vector<64x32xf32>
    %114 = arith.mulf %113, %112 : vector<64x32xf32>
    %115 = arith.addf %103, %114 : vector<64x32xf32>
    %cst_49 = arith.constant dense<0.000000e+00> : vector<64x8xf32>
    %116 = tpu.matmul %115, %17, %cst_49 {dimension_numbers = #tpu.dot_dimension_numbers<[1], [0], [0], [1], [0, 0, 1, 1], [], []>} : vector<64x32xf32>, vector<32x8xf32>, vector<64x8xf32> -> vector<64x8xf32>
    %c0_50 = arith.constant 0 : index
    %c0_51 = arith.constant 0 : index
    %c0_52 = arith.constant 0 : index
    %117 = vector.load %arg10[%c0_50, %c0_51, %c0_52] : memref<6x64x8xf32, #tpu.memory_space<vmem>>, vector<1x64x8xf32>
    %118 = vector.shape_cast %117 : vector<1x64x8xf32> to vector<64x8xf32>
    %119 = vector.shape_cast %116 : vector<64x8xf32> to vector<1x64x8xf32>
    tpu.vector_store %arg10[%c0_50, %c0_51, %c0_52], %119 {strides = array<i32>} : memref<6x64x8xf32, #tpu.memory_space<vmem>>, vector<1x64x8xf32>,
    %c2 = arith.constant 2 : index
    %120 = memref.load %arg0[%c2] : memref<7xf32, #tpu.memory_space<smem>>
    %cst_53 = arith.constant 5.000000e-01 : f32
    %121 = arith.mulf %120, %cst_53 : f32
    %cst_54 = arith.constant 0.166666672 : f32
    %122 = arith.mulf %120, %cst_54 : f32
    %cst_55 = arith.constant 0.333333343 : f32
    %123 = arith.mulf %120, %cst_55 : f32
    %124 = arith.truncf %115 : vector<64x32xf32> to vector<64x32xbf16>
    %cst_56 = arith.constant dense<0.000000e+00> : vector<64x32xf32>
    %125 = tpu.matmul %12, %124, %cst_56 {dimension_numbers = #tpu.dot_dimension_numbers<[1], [0], [0], [1], [0, 0, 1, 1], [], []>} : vector<64x64xbf16>, vector<64x32xbf16>, vector<64x32xf32> -> vector<64x32xf32>
    %cst_57 = arith.constant dense<0.000000e+00> : vector<64x32xf32>
    %126 = tpu.matmul %125, %13, %cst_57 {dimension_numbers = #tpu.dot_dimension_numbers<[1], [0], [0], [1], [0, 0, 1, 1], [], []>} : vector<64x32xf32>, vector<32x32xf32>, vector<64x32xf32> -> vector<64x32xf32>
    %127 = arith.addf %126, %16 : vector<64x32xf32>
    %cst_58 = arith.constant 0.000000e+00 : f32
    %128 = vector.broadcast %cst_58 : f32 to vector<64x32xf32>
    %129 = arith.maximumf %127, %128 : vector<64x32xf32>
    %130 = vector.broadcast %122 : f32 to vector<64x32xf32>
    %131 = arith.mulf %130, %129 : vector<64x32xf32>
    %132 = arith.addf %115, %131 : vector<64x32xf32>
    %133 = vector.broadcast %121 : f32 to vector<64x32xf32>
    %134 = arith.mulf %133, %129 : vector<64x32xf32>
    %135 = arith.addf %115, %134 : vector<64x32xf32>
    %136 = arith.truncf %135 : vector<64x32xf32> to vector<64x32xbf16>
    %cst_59 = arith.constant dense<0.000000e+00> : vector<64x32xf32>
    %137 = tpu.matmul %12, %136, %cst_59 {dimension_numbers = #tpu.dot_dimension_numbers<[1], [0], [0], [1], [0, 0, 1, 1], [], []>} : vector<64x64xbf16>, vector<64x32xbf16>, vector<64x32xf32> -> vector<64x32xf32>
    %cst_60 = arith.constant dense<0.000000e+00> : vector<64x32xf32>
    %138 = tpu.matmul %137, %13, %cst_60 {dimension_numbers = #tpu.dot_dimension_numbers<[1], [0], [0], [1], [0, 0, 1, 1], [], []>} : vector<64x32xf32>, vector<32x32xf32>, vector<64x32xf32> -> vector<64x32xf32>
    %139 = arith.addf %138, %16 : vector<64x32xf32>
    %cst_61 = arith.constant 0.000000e+00 : f32
    %140 = vector.broadcast %cst_61 : f32 to vector<64x32xf32>
    %141 = arith.maximumf %139, %140 : vector<64x32xf32>
    %142 = vector.broadcast %123 : f32 to vector<64x32xf32>
    %143 = arith.mulf %142, %141 : vector<64x32xf32>
    %144 = arith.addf %132, %143 : vector<64x32xf32>
    %145 = vector.broadcast %121 : f32 to vector<64x32xf32>
    %146 = arith.mulf %145, %141 : vector<64x32xf32>
    %147 = arith.addf %115, %146 : vector<64x32xf32>
    %148 = arith.truncf %147 : vector<64x32xf32> to vector<64x32xbf16>
    %cst_62 = arith.constant dense<0.000000e+00> : vector<64x32xf32>
    %149 = tpu.matmul %12, %148, %cst_62 {dimension_numbers = #tpu.dot_dimension_numbers<[1], [0], [0], [1], [0, 0, 1, 1], [], []>} : vector<64x64xbf16>, vector<64x32xbf16>, vector<64x32xf32> -> vector<64x32xf32>
    %cst_63 = arith.constant dense<0.000000e+00> : vector<64x32xf32>
    %150 = tpu.matmul %149, %13, %cst_63 {dimension_numbers = #tpu.dot_dimension_numbers<[1], [0], [0], [1], [0, 0, 1, 1], [], []>} : vector<64x32xf32>, vector<32x32xf32>, vector<64x32xf32> -> vector<64x32xf32>
    %151 = arith.addf %150, %16 : vector<64x32xf32>
    %cst_64 = arith.constant 0.000000e+00 : f32
    %152 = vector.broadcast %cst_64 : f32 to vector<64x32xf32>
    %153 = arith.maximumf %151, %152 : vector<64x32xf32>
    %154 = vector.broadcast %123 : f32 to vector<64x32xf32>
    %155 = arith.mulf %154, %153 : vector<64x32xf32>
    %156 = arith.addf %144, %155 : vector<64x32xf32>
    %157 = vector.broadcast %120 : f32 to vector<64x32xf32>
    %158 = arith.mulf %157, %153 : vector<64x32xf32>
    %159 = arith.addf %115, %158 : vector<64x32xf32>
    %160 = arith.truncf %159 : vector<64x32xf32> to vector<64x32xbf16>
    %cst_65 = arith.constant dense<0.000000e+00> : vector<64x32xf32>
    %161 = tpu.matmul %12, %160, %cst_65 {dimension_numbers = #tpu.dot_dimension_numbers<[1], [0], [0], [1], [0, 0, 1, 1], [], []>} : vector<64x64xbf16>, vector<64x32xbf16>, vector<64x32xf32> -> vector<64x32xf32>
    %cst_66 = arith.constant dense<0.000000e+00> : vector<64x32xf32>
    %162 = tpu.matmul %161, %13, %cst_66 {dimension_numbers = #tpu.dot_dimension_numbers<[1], [0], [0], [1], [0, 0, 1, 1], [], []>} : vector<64x32xf32>, vector<32x32xf32>, vector<64x32xf32> -> vector<64x32xf32>
    %163 = arith.addf %162, %16 : vector<64x32xf32>
    %cst_67 = arith.constant 0.000000e+00 : f32
    %164 = vector.broadcast %cst_67 : f32 to vector<64x32xf32>
    %165 = arith.maximumf %163, %164 : vector<64x32xf32>
    %166 = vector.broadcast %122 : f32 to vector<64x32xf32>
    %167 = arith.mulf %166, %165 : vector<64x32xf32>
    %168 = arith.addf %156, %167 : vector<64x32xf32>
    %cst_68 = arith.constant dense<0.000000e+00> : vector<64x8xf32>
    %169 = tpu.matmul %168, %17, %cst_68 {dimension_numbers = #tpu.dot_dimension_numbers<[1], [0], [0], [1], [0, 0, 1, 1], [], []>} : vector<64x32xf32>, vector<32x8xf32>, vector<64x8xf32> -> vector<64x8xf32>
    %c1_69 = arith.constant 1 : index
    %c0_70 = arith.constant 0 : index
    %c0_71 = arith.constant 0 : index
    %170 = vector.load %arg10[%c1_69, %c0_70, %c0_71] : memref<6x64x8xf32, #tpu.memory_space<vmem>>, vector<1x64x8xf32>
    %171 = vector.shape_cast %170 : vector<1x64x8xf32> to vector<64x8xf32>
    %172 = vector.shape_cast %169 : vector<64x8xf32> to vector<1x64x8xf32>
    tpu.vector_store %arg10[%c1_69, %c0_70, %c0_71], %172 {strides = array<i32>} : memref<6x64x8xf32, #tpu.memory_space<vmem>>, vector<1x64x8xf32>,
    %c3 = arith.constant 3 : index
    %173 = memref.load %arg0[%c3] : memref<7xf32, #tpu.memory_space<smem>>
    %cst_72 = arith.constant 5.000000e-01 : f32
    %174 = arith.mulf %173, %cst_72 : f32
    %cst_73 = arith.constant 0.166666672 : f32
    %175 = arith.mulf %173, %cst_73 : f32
    %cst_74 = arith.constant 0.333333343 : f32
    %176 = arith.mulf %173, %cst_74 : f32
    %177 = arith.truncf %168 : vector<64x32xf32> to vector<64x32xbf16>
    %cst_75 = arith.constant dense<0.000000e+00> : vector<64x32xf32>
    %178 = tpu.matmul %12, %177, %cst_75 {dimension_numbers = #tpu.dot_dimension_numbers<[1], [0], [0], [1], [0, 0, 1, 1], [], []>} : vector<64x64xbf16>, vector<64x32xbf16>, vector<64x32xf32> -> vector<64x32xf32>
    %cst_76 = arith.constant dense<0.000000e+00> : vector<64x32xf32>
    %179 = tpu.matmul %178, %13, %cst_76 {dimension_numbers = #tpu.dot_dimension_numbers<[1], [0], [0], [1], [0, 0, 1, 1], [], []>} : vector<64x32xf32>, vector<32x32xf32>, vector<64x32xf32> -> vector<64x32xf32>
    %180 = arith.addf %179, %16 : vector<64x32xf32>
    %cst_77 = arith.constant 0.000000e+00 : f32
    %181 = vector.broadcast %cst_77 : f32 to vector<64x32xf32>
    %182 = arith.maximumf %180, %181 : vector<64x32xf32>
    %183 = vector.broadcast %175 : f32 to vector<64x32xf32>
    %184 = arith.mulf %183, %182 : vector<64x32xf32>
    %185 = arith.addf %168, %184 : vector<64x32xf32>
    %186 = vector.broadcast %174 : f32 to vector<64x32xf32>
    %187 = arith.mulf %186, %182 : vector<64x32xf32>
    %188 = arith.addf %168, %187 : vector<64x32xf32>
    %189 = arith.truncf %188 : vector<64x32xf32> to vector<64x32xbf16>
    %cst_78 = arith.constant dense<0.000000e+00> : vector<64x32xf32>
    %190 = tpu.matmul %12, %189, %cst_78 {dimension_numbers = #tpu.dot_dimension_numbers<[1], [0], [0], [1], [0, 0, 1, 1], [], []>} : vector<64x64xbf16>, vector<64x32xbf16>, vector<64x32xf32> -> vector<64x32xf32>
    %cst_79 = arith.constant dense<0.000000e+00> : vector<64x32xf32>
    %191 = tpu.matmul %190, %13, %cst_79 {dimension_numbers = #tpu.dot_dimension_numbers<[1], [0], [0], [1], [0, 0, 1, 1], [], []>} : vector<64x32xf32>, vector<32x32xf32>, vector<64x32xf32> -> vector<64x32xf32>
    %192 = arith.addf %191, %16 : vector<64x32xf32>
    %cst_80 = arith.constant 0.000000e+00 : f32
    %193 = vector.broadcast %cst_80 : f32 to vector<64x32xf32>
    %194 = arith.maximumf %192, %193 : vector<64x32xf32>
    %195 = vector.broadcast %176 : f32 to vector<64x32xf32>
    %196 = arith.mulf %195, %194 : vector<64x32xf32>
    %197 = arith.addf %185, %196 : vector<64x32xf32>
    %198 = vector.broadcast %174 : f32 to vector<64x32xf32>
    %199 = arith.mulf %198, %194 : vector<64x32xf32>
    %200 = arith.addf %168, %199 : vector<64x32xf32>
    %201 = arith.truncf %200 : vector<64x32xf32> to vector<64x32xbf16>
    %cst_81 = arith.constant dense<0.000000e+00> : vector<64x32xf32>
    %202 = tpu.matmul %12, %201, %cst_81 {dimension_numbers = #tpu.dot_dimension_numbers<[1], [0], [0], [1], [0, 0, 1, 1], [], []>} : vector<64x64xbf16>, vector<64x32xbf16>, vector<64x32xf32> -> vector<64x32xf32>
    %cst_82 = arith.constant dense<0.000000e+00> : vector<64x32xf32>
    %203 = tpu.matmul %202, %13, %cst_82 {dimension_numbers = #tpu.dot_dimension_numbers<[1], [0], [0], [1], [0, 0, 1, 1], [], []>} : vector<64x32xf32>, vector<32x32xf32>, vector<64x32xf32> -> vector<64x32xf32>
    %204 = arith.addf %203, %16 : vector<64x32xf32>
    %cst_83 = arith.constant 0.000000e+00 : f32
    %205 = vector.broadcast %cst_83 : f32 to vector<64x32xf32>
    %206 = arith.maximumf %204, %205 : vector<64x32xf32>
    %207 = vector.broadcast %176 : f32 to vector<64x32xf32>
    %208 = arith.mulf %207, %206 : vector<64x32xf32>
    %209 = arith.addf %197, %208 : vector<64x32xf32>
    %210 = vector.broadcast %173 : f32 to vector<64x32xf32>
    %211 = arith.mulf %210, %206 : vector<64x32xf32>
    %212 = arith.addf %168, %211 : vector<64x32xf32>
    %213 = arith.truncf %212 : vector<64x32xf32> to vector<64x32xbf16>
    %cst_84 = arith.constant dense<0.000000e+00> : vector<64x32xf32>
    %214 = tpu.matmul %12, %213, %cst_84 {dimension_numbers = #tpu.dot_dimension_numbers<[1], [0], [0], [1], [0, 0, 1, 1], [], []>} : vector<64x64xbf16>, vector<64x32xbf16>, vector<64x32xf32> -> vector<64x32xf32>
    %cst_85 = arith.constant dense<0.000000e+00> : vector<64x32xf32>
    %215 = tpu.matmul %214, %13, %cst_85 {dimension_numbers = #tpu.dot_dimension_numbers<[1], [0], [0], [1], [0, 0, 1, 1], [], []>} : vector<64x32xf32>, vector<32x32xf32>, vector<64x32xf32> -> vector<64x32xf32>
    %216 = arith.addf %215, %16 : vector<64x32xf32>
    %cst_86 = arith.constant 0.000000e+00 : f32
    %217 = vector.broadcast %cst_86 : f32 to vector<64x32xf32>
    %218 = arith.maximumf %216, %217 : vector<64x32xf32>
    %219 = vector.broadcast %175 : f32 to vector<64x32xf32>
    %220 = arith.mulf %219, %218 : vector<64x32xf32>
    %221 = arith.addf %209, %220 : vector<64x32xf32>
    %cst_87 = arith.constant dense<0.000000e+00> : vector<64x8xf32>
    %222 = tpu.matmul %221, %17, %cst_87 {dimension_numbers = #tpu.dot_dimension_numbers<[1], [0], [0], [1], [0, 0, 1, 1], [], []>} : vector<64x32xf32>, vector<32x8xf32>, vector<64x8xf32> -> vector<64x8xf32>
    %c2_88 = arith.constant 2 : index
    %c0_89 = arith.constant 0 : index
    %c0_90 = arith.constant 0 : index
    %223 = vector.load %arg10[%c2_88, %c0_89, %c0_90] : memref<6x64x8xf32, #tpu.memory_space<vmem>>, vector<1x64x8xf32>
    %224 = vector.shape_cast %223 : vector<1x64x8xf32> to vector<64x8xf32>
    %225 = vector.shape_cast %222 : vector<64x8xf32> to vector<1x64x8xf32>
    tpu.vector_store %arg10[%c2_88, %c0_89, %c0_90], %225 {strides = array<i32>} : memref<6x64x8xf32, #tpu.memory_space<vmem>>, vector<1x64x8xf32>,
    %c4 = arith.constant 4 : index
    %226 = memref.load %arg0[%c4] : memref<7xf32, #tpu.memory_space<smem>>
    %cst_91 = arith.constant 5.000000e-01 : f32
    %227 = arith.mulf %226, %cst_91 : f32
    %cst_92 = arith.constant 0.166666672 : f32
    %228 = arith.mulf %226, %cst_92 : f32
    %cst_93 = arith.constant 0.333333343 : f32
    %229 = arith.mulf %226, %cst_93 : f32
    %230 = arith.truncf %221 : vector<64x32xf32> to vector<64x32xbf16>
    %cst_94 = arith.constant dense<0.000000e+00> : vector<64x32xf32>
    %231 = tpu.matmul %12, %230, %cst_94 {dimension_numbers = #tpu.dot_dimension_numbers<[1], [0], [0], [1], [0, 0, 1, 1], [], []>} : vector<64x64xbf16>, vector<64x32xbf16>, vector<64x32xf32> -> vector<64x32xf32>
    %cst_95 = arith.constant dense<0.000000e+00> : vector<64x32xf32>
    %232 = tpu.matmul %231, %13, %cst_95 {dimension_numbers = #tpu.dot_dimension_numbers<[1], [0], [0], [1], [0, 0, 1, 1], [], []>} : vector<64x32xf32>, vector<32x32xf32>, vector<64x32xf32> -> vector<64x32xf32>
    %233 = arith.addf %232, %16 : vector<64x32xf32>
    %cst_96 = arith.constant 0.000000e+00 : f32
    %234 = vector.broadcast %cst_96 : f32 to vector<64x32xf32>
    %235 = arith.maximumf %233, %234 : vector<64x32xf32>
    %236 = vector.broadcast %228 : f32 to vector<64x32xf32>
    %237 = arith.mulf %236, %235 : vector<64x32xf32>
    %238 = arith.addf %221, %237 : vector<64x32xf32>
    %239 = vector.broadcast %227 : f32 to vector<64x32xf32>
    %240 = arith.mulf %239, %235 : vector<64x32xf32>
    %241 = arith.addf %221, %240 : vector<64x32xf32>
    %242 = arith.truncf %241 : vector<64x32xf32> to vector<64x32xbf16>
    %cst_97 = arith.constant dense<0.000000e+00> : vector<64x32xf32>
    %243 = tpu.matmul %12, %242, %cst_97 {dimension_numbers = #tpu.dot_dimension_numbers<[1], [0], [0], [1], [0, 0, 1, 1], [], []>} : vector<64x64xbf16>, vector<64x32xbf16>, vector<64x32xf32> -> vector<64x32xf32>
    %cst_98 = arith.constant dense<0.000000e+00> : vector<64x32xf32>
    %244 = tpu.matmul %243, %13, %cst_98 {dimension_numbers = #tpu.dot_dimension_numbers<[1], [0], [0], [1], [0, 0, 1, 1], [], []>} : vector<64x32xf32>, vector<32x32xf32>, vector<64x32xf32> -> vector<64x32xf32>
    %245 = arith.addf %244, %16 : vector<64x32xf32>
    %cst_99 = arith.constant 0.000000e+00 : f32
    %246 = vector.broadcast %cst_99 : f32 to vector<64x32xf32>
    %247 = arith.maximumf %245, %246 : vector<64x32xf32>
    %248 = vector.broadcast %229 : f32 to vector<64x32xf32>
    %249 = arith.mulf %248, %247 : vector<64x32xf32>
    %250 = arith.addf %238, %249 : vector<64x32xf32>
    %251 = vector.broadcast %227 : f32 to vector<64x32xf32>
    %252 = arith.mulf %251, %247 : vector<64x32xf32>
    %253 = arith.addf %221, %252 : vector<64x32xf32>
    %254 = arith.truncf %253 : vector<64x32xf32> to vector<64x32xbf16>
    %cst_100 = arith.constant dense<0.000000e+00> : vector<64x32xf32>
    %255 = tpu.matmul %12, %254, %cst_100 {dimension_numbers = #tpu.dot_dimension_numbers<[1], [0], [0], [1], [0, 0, 1, 1], [], []>} : vector<64x64xbf16>, vector<64x32xbf16>, vector<64x32xf32> -> vector<64x32xf32>
    %cst_101 = arith.constant dense<0.000000e+00> : vector<64x32xf32>
    %256 = tpu.matmul %255, %13, %cst_101 {dimension_numbers = #tpu.dot_dimension_numbers<[1], [0], [0], [1], [0, 0, 1, 1], [], []>} : vector<64x32xf32>, vector<32x32xf32>, vector<64x32xf32> -> vector<64x32xf32>
    %257 = arith.addf %256, %16 : vector<64x32xf32>
    %cst_102 = arith.constant 0.000000e+00 : f32
    %258 = vector.broadcast %cst_102 : f32 to vector<64x32xf32>
    %259 = arith.maximumf %257, %258 : vector<64x32xf32>
    %260 = vector.broadcast %229 : f32 to vector<64x32xf32>
    %261 = arith.mulf %260, %259 : vector<64x32xf32>
    %262 = arith.addf %250, %261 : vector<64x32xf32>
    %263 = vector.broadcast %226 : f32 to vector<64x32xf32>
    %264 = arith.mulf %263, %259 : vector<64x32xf32>
    %265 = arith.addf %221, %264 : vector<64x32xf32>
    %266 = arith.truncf %265 : vector<64x32xf32> to vector<64x32xbf16>
    %cst_103 = arith.constant dense<0.000000e+00> : vector<64x32xf32>
    %267 = tpu.matmul %12, %266, %cst_103 {dimension_numbers = #tpu.dot_dimension_numbers<[1], [0], [0], [1], [0, 0, 1, 1], [], []>} : vector<64x64xbf16>, vector<64x32xbf16>, vector<64x32xf32> -> vector<64x32xf32>
    %cst_104 = arith.constant dense<0.000000e+00> : vector<64x32xf32>
    %268 = tpu.matmul %267, %13, %cst_104 {dimension_numbers = #tpu.dot_dimension_numbers<[1], [0], [0], [1], [0, 0, 1, 1], [], []>} : vector<64x32xf32>, vector<32x32xf32>, vector<64x32xf32> -> vector<64x32xf32>
    %269 = arith.addf %268, %16 : vector<64x32xf32>
    %cst_105 = arith.constant 0.000000e+00 : f32
    %270 = vector.broadcast %cst_105 : f32 to vector<64x32xf32>
    %271 = arith.maximumf %269, %270 : vector<64x32xf32>
    %272 = vector.broadcast %228 : f32 to vector<64x32xf32>
    %273 = arith.mulf %272, %271 : vector<64x32xf32>
    %274 = arith.addf %262, %273 : vector<64x32xf32>
    %cst_106 = arith.constant dense<0.000000e+00> : vector<64x8xf32>
    %275 = tpu.matmul %274, %17, %cst_106 {dimension_numbers = #tpu.dot_dimension_numbers<[1], [0], [0], [1], [0, 0, 1, 1], [], []>} : vector<64x32xf32>, vector<32x8xf32>, vector<64x8xf32> -> vector<64x8xf32>
    %c3_107 = arith.constant 3 : index
    %c0_108 = arith.constant 0 : index
    %c0_109 = arith.constant 0 : index
    %276 = vector.load %arg10[%c3_107, %c0_108, %c0_109] : memref<6x64x8xf32, #tpu.memory_space<vmem>>, vector<1x64x8xf32>
    %277 = vector.shape_cast %276 : vector<1x64x8xf32> to vector<64x8xf32>
    %278 = vector.shape_cast %275 : vector<64x8xf32> to vector<1x64x8xf32>
    tpu.vector_store %arg10[%c3_107, %c0_108, %c0_109], %278 {strides = array<i32>} : memref<6x64x8xf32, #tpu.memory_space<vmem>>, vector<1x64x8xf32>,
    %c5 = arith.constant 5 : index
    %279 = memref.load %arg0[%c5] : memref<7xf32, #tpu.memory_space<smem>>
    %cst_110 = arith.constant 5.000000e-01 : f32
    %280 = arith.mulf %279, %cst_110 : f32
    %cst_111 = arith.constant 0.166666672 : f32
    %281 = arith.mulf %279, %cst_111 : f32
    %cst_112 = arith.constant 0.333333343 : f32
    %282 = arith.mulf %279, %cst_112 : f32
    %283 = arith.truncf %274 : vector<64x32xf32> to vector<64x32xbf16>
    %cst_113 = arith.constant dense<0.000000e+00> : vector<64x32xf32>
    %284 = tpu.matmul %12, %283, %cst_113 {dimension_numbers = #tpu.dot_dimension_numbers<[1], [0], [0], [1], [0, 0, 1, 1], [], []>} : vector<64x64xbf16>, vector<64x32xbf16>, vector<64x32xf32> -> vector<64x32xf32>
    %cst_114 = arith.constant dense<0.000000e+00> : vector<64x32xf32>
    %285 = tpu.matmul %284, %13, %cst_114 {dimension_numbers = #tpu.dot_dimension_numbers<[1], [0], [0], [1], [0, 0, 1, 1], [], []>} : vector<64x32xf32>, vector<32x32xf32>, vector<64x32xf32> -> vector<64x32xf32>
    %286 = arith.addf %285, %16 : vector<64x32xf32>
    %cst_115 = arith.constant 0.000000e+00 : f32
    %287 = vector.broadcast %cst_115 : f32 to vector<64x32xf32>
    %288 = arith.maximumf %286, %287 : vector<64x32xf32>
    %289 = vector.broadcast %281 : f32 to vector<64x32xf32>
    %290 = arith.mulf %289, %288 : vector<64x32xf32>
    %291 = arith.addf %274, %290 : vector<64x32xf32>
    %292 = vector.broadcast %280 : f32 to vector<64x32xf32>
    %293 = arith.mulf %292, %288 : vector<64x32xf32>
    %294 = arith.addf %274, %293 : vector<64x32xf32>
    %295 = arith.truncf %294 : vector<64x32xf32> to vector<64x32xbf16>
    %cst_116 = arith.constant dense<0.000000e+00> : vector<64x32xf32>
    %296 = tpu.matmul %12, %295, %cst_116 {dimension_numbers = #tpu.dot_dimension_numbers<[1], [0], [0], [1], [0, 0, 1, 1], [], []>} : vector<64x64xbf16>, vector<64x32xbf16>, vector<64x32xf32> -> vector<64x32xf32>
    %cst_117 = arith.constant dense<0.000000e+00> : vector<64x32xf32>
    %297 = tpu.matmul %296, %13, %cst_117 {dimension_numbers = #tpu.dot_dimension_numbers<[1], [0], [0], [1], [0, 0, 1, 1], [], []>} : vector<64x32xf32>, vector<32x32xf32>, vector<64x32xf32> -> vector<64x32xf32>
    %298 = arith.addf %297, %16 : vector<64x32xf32>
    %cst_118 = arith.constant 0.000000e+00 : f32
    %299 = vector.broadcast %cst_118 : f32 to vector<64x32xf32>
    %300 = arith.maximumf %298, %299 : vector<64x32xf32>
    %301 = vector.broadcast %282 : f32 to vector<64x32xf32>
    %302 = arith.mulf %301, %300 : vector<64x32xf32>
    %303 = arith.addf %291, %302 : vector<64x32xf32>
    %304 = vector.broadcast %280 : f32 to vector<64x32xf32>
    %305 = arith.mulf %304, %300 : vector<64x32xf32>
    %306 = arith.addf %274, %305 : vector<64x32xf32>
    %307 = arith.truncf %306 : vector<64x32xf32> to vector<64x32xbf16>
    %cst_119 = arith.constant dense<0.000000e+00> : vector<64x32xf32>
    %308 = tpu.matmul %12, %307, %cst_119 {dimension_numbers = #tpu.dot_dimension_numbers<[1], [0], [0], [1], [0, 0, 1, 1], [], []>} : vector<64x64xbf16>, vector<64x32xbf16>, vector<64x32xf32> -> vector<64x32xf32>
    %cst_120 = arith.constant dense<0.000000e+00> : vector<64x32xf32>
    %309 = tpu.matmul %308, %13, %cst_120 {dimension_numbers = #tpu.dot_dimension_numbers<[1], [0], [0], [1], [0, 0, 1, 1], [], []>} : vector<64x32xf32>, vector<32x32xf32>, vector<64x32xf32> -> vector<64x32xf32>
    %310 = arith.addf %309, %16 : vector<64x32xf32>
    %cst_121 = arith.constant 0.000000e+00 : f32
    %311 = vector.broadcast %cst_121 : f32 to vector<64x32xf32>
    %312 = arith.maximumf %310, %311 : vector<64x32xf32>
    %313 = vector.broadcast %282 : f32 to vector<64x32xf32>
    %314 = arith.mulf %313, %312 : vector<64x32xf32>
    %315 = arith.addf %303, %314 : vector<64x32xf32>
    %316 = vector.broadcast %279 : f32 to vector<64x32xf32>
    %317 = arith.mulf %316, %312 : vector<64x32xf32>
    %318 = arith.addf %274, %317 : vector<64x32xf32>
    %319 = arith.truncf %318 : vector<64x32xf32> to vector<64x32xbf16>
    %cst_122 = arith.constant dense<0.000000e+00> : vector<64x32xf32>
    %320 = tpu.matmul %12, %319, %cst_122 {dimension_numbers = #tpu.dot_dimension_numbers<[1], [0], [0], [1], [0, 0, 1, 1], [], []>} : vector<64x64xbf16>, vector<64x32xbf16>, vector<64x32xf32> -> vector<64x32xf32>
    %cst_123 = arith.constant dense<0.000000e+00> : vector<64x32xf32>
    %321 = tpu.matmul %320, %13, %cst_123 {dimension_numbers = #tpu.dot_dimension_numbers<[1], [0], [0], [1], [0, 0, 1, 1], [], []>} : vector<64x32xf32>, vector<32x32xf32>, vector<64x32xf32> -> vector<64x32xf32>
    %322 = arith.addf %321, %16 : vector<64x32xf32>
    %cst_124 = arith.constant 0.000000e+00 : f32
    %323 = vector.broadcast %cst_124 : f32 to vector<64x32xf32>
    %324 = arith.maximumf %322, %323 : vector<64x32xf32>
    %325 = vector.broadcast %281 : f32 to vector<64x32xf32>
    %326 = arith.mulf %325, %324 : vector<64x32xf32>
    %327 = arith.addf %315, %326 : vector<64x32xf32>
    %cst_125 = arith.constant dense<0.000000e+00> : vector<64x8xf32>
    %328 = tpu.matmul %327, %17, %cst_125 {dimension_numbers = #tpu.dot_dimension_numbers<[1], [0], [0], [1], [0, 0, 1, 1], [], []>} : vector<64x32xf32>, vector<32x8xf32>, vector<64x8xf32> -> vector<64x8xf32>
    %c4_126 = arith.constant 4 : index
    %c0_127 = arith.constant 0 : index
    %c0_128 = arith.constant 0 : index
    %329 = vector.load %arg10[%c4_126, %c0_127, %c0_128] : memref<6x64x8xf32, #tpu.memory_space<vmem>>, vector<1x64x8xf32>
    %330 = vector.shape_cast %329 : vector<1x64x8xf32> to vector<64x8xf32>
    %331 = vector.shape_cast %328 : vector<64x8xf32> to vector<1x64x8xf32>
    tpu.vector_store %arg10[%c4_126, %c0_127, %c0_128], %331 {strides = array<i32>} : memref<6x64x8xf32, #tpu.memory_space<vmem>>, vector<1x64x8xf32>,
    %c6 = arith.constant 6 : index
    %332 = memref.load %arg0[%c6] : memref<7xf32, #tpu.memory_space<smem>>
    %cst_129 = arith.constant 5.000000e-01 : f32
    %333 = arith.mulf %332, %cst_129 : f32
    %cst_130 = arith.constant 0.166666672 : f32
    %334 = arith.mulf %332, %cst_130 : f32
    %cst_131 = arith.constant 0.333333343 : f32
    %335 = arith.mulf %332, %cst_131 : f32
    %336 = arith.truncf %327 : vector<64x32xf32> to vector<64x32xbf16>
    %cst_132 = arith.constant dense<0.000000e+00> : vector<64x32xf32>
    %337 = tpu.matmul %12, %336, %cst_132 {dimension_numbers = #tpu.dot_dimension_numbers<[1], [0], [0], [1], [0, 0, 1, 1], [], []>} : vector<64x64xbf16>, vector<64x32xbf16>, vector<64x32xf32> -> vector<64x32xf32>
    %cst_133 = arith.constant dense<0.000000e+00> : vector<64x32xf32>
    %338 = tpu.matmul %337, %13, %cst_133 {dimension_numbers = #tpu.dot_dimension_numbers<[1], [0], [0], [1], [0, 0, 1, 1], [], []>} : vector<64x32xf32>, vector<32x32xf32>, vector<64x32xf32> -> vector<64x32xf32>
    %339 = arith.addf %338, %16 : vector<64x32xf32>
    %cst_134 = arith.constant 0.000000e+00 : f32
    %340 = vector.broadcast %cst_134 : f32 to vector<64x32xf32>
    %341 = arith.maximumf %339, %340 : vector<64x32xf32>
    %342 = vector.broadcast %334 : f32 to vector<64x32xf32>
    %343 = arith.mulf %342, %341 : vector<64x32xf32>
    %344 = arith.addf %327, %343 : vector<64x32xf32>
    %345 = vector.broadcast %333 : f32 to vector<64x32xf32>
    %346 = arith.mulf %345, %341 : vector<64x32xf32>
    %347 = arith.addf %327, %346 : vector<64x32xf32>
    %348 = arith.truncf %347 : vector<64x32xf32> to vector<64x32xbf16>
    %cst_135 = arith.constant dense<0.000000e+00> : vector<64x32xf32>
    %349 = tpu.matmul %12, %348, %cst_135 {dimension_numbers = #tpu.dot_dimension_numbers<[1], [0], [0], [1], [0, 0, 1, 1], [], []>} : vector<64x64xbf16>, vector<64x32xbf16>, vector<64x32xf32> -> vector<64x32xf32>
    %cst_136 = arith.constant dense<0.000000e+00> : vector<64x32xf32>
    %350 = tpu.matmul %349, %13, %cst_136 {dimension_numbers = #tpu.dot_dimension_numbers<[1], [0], [0], [1], [0, 0, 1, 1], [], []>} : vector<64x32xf32>, vector<32x32xf32>, vector<64x32xf32> -> vector<64x32xf32>
    %351 = arith.addf %350, %16 : vector<64x32xf32>
    %cst_137 = arith.constant 0.000000e+00 : f32
    %352 = vector.broadcast %cst_137 : f32 to vector<64x32xf32>
    %353 = arith.maximumf %351, %352 : vector<64x32xf32>
    %354 = vector.broadcast %335 : f32 to vector<64x32xf32>
    %355 = arith.mulf %354, %353 : vector<64x32xf32>
    %356 = arith.addf %344, %355 : vector<64x32xf32>
    %357 = vector.broadcast %333 : f32 to vector<64x32xf32>
    %358 = arith.mulf %357, %353 : vector<64x32xf32>
    %359 = arith.addf %327, %358 : vector<64x32xf32>
    %360 = arith.truncf %359 : vector<64x32xf32> to vector<64x32xbf16>
    %cst_138 = arith.constant dense<0.000000e+00> : vector<64x32xf32>
    %361 = tpu.matmul %12, %360, %cst_138 {dimension_numbers = #tpu.dot_dimension_numbers<[1], [0], [0], [1], [0, 0, 1, 1], [], []>} : vector<64x64xbf16>, vector<64x32xbf16>, vector<64x32xf32> -> vector<64x32xf32>
    %cst_139 = arith.constant dense<0.000000e+00> : vector<64x32xf32>
    %362 = tpu.matmul %361, %13, %cst_139 {dimension_numbers = #tpu.dot_dimension_numbers<[1], [0], [0], [1], [0, 0, 1, 1], [], []>} : vector<64x32xf32>, vector<32x32xf32>, vector<64x32xf32> -> vector<64x32xf32>
    %363 = arith.addf %362, %16 : vector<64x32xf32>
    %cst_140 = arith.constant 0.000000e+00 : f32
    %364 = vector.broadcast %cst_140 : f32 to vector<64x32xf32>
    %365 = arith.maximumf %363, %364 : vector<64x32xf32>
    %366 = vector.broadcast %335 : f32 to vector<64x32xf32>
    %367 = arith.mulf %366, %365 : vector<64x32xf32>
    %368 = arith.addf %356, %367 : vector<64x32xf32>
    %369 = vector.broadcast %332 : f32 to vector<64x32xf32>
    %370 = arith.mulf %369, %365 : vector<64x32xf32>
    %371 = arith.addf %327, %370 : vector<64x32xf32>
    %372 = arith.truncf %371 : vector<64x32xf32> to vector<64x32xbf16>
    %cst_141 = arith.constant dense<0.000000e+00> : vector<64x32xf32>
    %373 = tpu.matmul %12, %372, %cst_141 {dimension_numbers = #tpu.dot_dimension_numbers<[1], [0], [0], [1], [0, 0, 1, 1], [], []>} : vector<64x64xbf16>, vector<64x32xbf16>, vector<64x32xf32> -> vector<64x32xf32>
    %cst_142 = arith.constant dense<0.000000e+00> : vector<64x32xf32>
    %374 = tpu.matmul %373, %13, %cst_142 {dimension_numbers = #tpu.dot_dimension_numbers<[1], [0], [0], [1], [0, 0, 1, 1], [], []>} : vector<64x32xf32>, vector<32x32xf32>, vector<64x32xf32> -> vector<64x32xf32>
    %375 = arith.addf %374, %16 : vector<64x32xf32>
    %cst_143 = arith.constant 0.000000e+00 : f32
    %376 = vector.broadcast %cst_143 : f32 to vector<64x32xf32>
    %377 = arith.maximumf %375, %376 : vector<64x32xf32>
    %378 = vector.broadcast %334 : f32 to vector<64x32xf32>
    %379 = arith.mulf %378, %377 : vector<64x32xf32>
    %380 = arith.addf %368, %379 : vector<64x32xf32>
    %cst_144 = arith.constant dense<0.000000e+00> : vector<64x8xf32>
    %381 = tpu.matmul %380, %17, %cst_144 {dimension_numbers = #tpu.dot_dimension_numbers<[1], [0], [0], [1], [0, 0, 1, 1], [], []>} : vector<64x32xf32>, vector<32x8xf32>, vector<64x8xf32> -> vector<64x8xf32>
    %c5_145 = arith.constant 5 : index
    %c0_146 = arith.constant 0 : index
    %c0_147 = arith.constant 0 : index
    %382 = vector.load %arg10[%c5_145, %c0_146, %c0_147] : memref<6x64x8xf32, #tpu.memory_space<vmem>>, vector<1x64x8xf32>
    %383 = vector.shape_cast %382 : vector<1x64x8xf32> to vector<64x8xf32>
    %384 = vector.shape_cast %381 : vector<64x8xf32> to vector<1x64x8xf32>
    tpu.vector_store %arg10[%c5_145, %c0_146, %c0_147], %384 {strides = array<i32>} : memref<6x64x8xf32, #tpu.memory_space<vmem>>, vector<1x64x8xf32>,
    return
  }
}

</mosaic_0001>

<bundles_post_ra>
// kernel: _ndcn_forward_impl.1
= control target key start
LH: loop header
LB: loop body
LE: loop exit
PB: predicated region body
PF: predicated region fallthrough
CT: control target
= control target key end

     0   :  { %15 = vsyncpa [#allocation3], 0  ;;  %s13380_s0 = inlined_call_operand.vmem [shape: f32[7], index: 0, kind: input, shape index: {}]   ;;  %s13381_s1 = inlined_call_operand.vmem [shape: f32[64,8], index: 1, kind: input, shape index: {}]   ;;  %s13382_s2 = inlined_call_operand.vmem [shape: bf16[64,64], index: 2, kind: input, shape index: {}]   ;;  %s13383_s3 = inlined_call_operand.vmem [shape: f32[8,32], index: 3, kind: input, shape index: {}]   ;;  %s13384_s4 = inlined_call_operand.vmem [shape: f32[1,32], index: 4, kind: input, shape index: {}]   ;;  %s13385_s5 = inlined_call_operand.vmem [shape: f32[32,32], index: 5, kind: input, shape index: {}]   ;;  %s13386_s6 = inlined_call_operand.vmem [shape: f32[1,32], index: 6, kind: input, shape index: {}]   ;;  %s13387_s7 = inlined_call_operand.vmem [shape: f32[32,32], index: 7, kind: input, shape index: {}]   ;;  %s13388_s8 = inlined_call_operand.vmem [shape: f32[1,32], index: 8, kind: input, shape index: {}]   ;;  %s13389_s9 = inlined_call_operand.vmem [shape: f32[32,8], index: 9, kind: input, shape index: {}]   ;;  %s13390_s10 = inlined_call_operand.vmem [shape: f32[6,64,8], index: 10, kind: output, shape index: {}]  }
   0x1   :  { %s22_s15 = sshll.u32 %s13380_s0, 4  ;;  %s23_s15 = int_to_ptr.vmem [resolvable:$true] %s22_s15 }
   0x2   :  { %s10178_s16 = scalar_lea.vmem %s23_s15, 16  ;;  %p10183_p1 = scmp.lt.s32.totalorder %s23_s15, %s23_s15 }
   0x3   :  { %p10179_p0 = scmp.ne.s32.totalorder %s23_s15, %s10178_s16  ;;  %p10184_p2 = scmp.lt.s32.totalorder %s10178_s16, %s10178_s16 }
   0x5   :  { %p10185_p3 = por %p10184_p2, %p10183_p1 }
   0x7   :  { %p10186_p4 = pnand %p10185_p3, %p10179_p0 }
   0x9   :  { %10189 = shalt.err (!%p10186_p4)
}
   0xa   :  { %s10192_s17 = smov [#allocation2]  }
   0xb   :  { %25 = dma.vmem_to_smem %s23_s15, 16, %s10192_s17, [#allocation3]  }
   0xc   :  { %10190 = dma.done.wait [#allocation3], 16  }
   0xd   :  { %10191 = vsyncadd [#allocation3], 4294967280 }
   0xe   :  { %47 = sfence }
   0xf   :  { %v57_v0 = vld [vmem:[%s13383_s3] sm:$0xff]  ;;  %vm65_vm0 = vcmask 64512   ;;  %v50_v2 = vld [vmem:[%s13381_s1 + $0x8] sm:$0xff]  ;;  %v51_v3 = vld [vmem:[%s13381_s1 + $0x10] sm:$0xff]  ;;  %vm214_vm1 = vcmask 261120   ;;  %vm395_vm2 = vcmask 523264  }
  0x10   :  { %v49_v1 = vld [vmem:[%s13381_s1] sm:$0xff]  ;;  %8946 = vmatprep.subr.mxu0 %v57_v0  ;;  %v52_v4 = vld [vmem:[%s13381_s1 + $0x18] sm:$0xff]  ;;  %v54_v6 = vld [vmem:[%s13381_s1 + $0x28] sm:$0xff]  ;;  %s10411_s16 = sld [smem:[#allocation2]] }
  0x11   :  { %8948 = vmatprep.mubr.msk.f32.mxu0 %vm65_vm0, %v49_v1  ;;  %8947 = vmatpush3.msra.mxu0 %v57_v0  ;;  %v53_v5 = vld [vmem:[%s13381_s1 + $0x20] sm:$0xff]  ;;  %v55_v7 = vld [vmem:[%s13381_s1 + $0x30] sm:$0xff]  ;;  %v56_v8 = vld [vmem:[%s13381_s1 + $0x38] sm:$0xff]  ;;  %s10763_s21 = sld [smem:[#allocation2 + $0x1]] }
  0x12   :  { %8949 = vmatmul.mubr.msk.f32.vlgmr.msra.gmra.mxu0 %vm65_vm0, %v50_v2  ;;  %v206_v9 = vld [vmem:[%s13385_s5 + $0x18] sm:$0xff]  ;;  %v205_v10 = vld [vmem:[%s13385_s5 + $0x10] sm:$0xff]  ;;  %v204_v11 = vld [vmem:[%s13385_s5 + $0x8] sm:$0xff]  ;;  %s11683_s24 = sld [smem:[#allocation2 + $0x3]] }
  0x13   :  { %8951 = vmatprep.mubr.msk.f32.mxu0 %vm65_vm0, %v51_v3  ;;  %8960 = vmatprep.subr.mxu1 %v206_v9  ;;  %v203_v12 = vld [vmem:[%s13385_s5] sm:$0xff]  ;;  %v10319_v39 = vld [vmem:[%s13387_s7 + $0x18] sm:$0xff]  ;;  %v10324_v40 = vld [vmem:[%s13387_s7 + $0x10] sm:$0xff]  ;;  %s12121_s30 = sld [smem:[#allocation2 + $0x4]] }
  0x14   :  { %8961 = vmatpush3.msra.mxu1 %v206_v9  ;;  %v7840_v13 = vld [vmem:[%s13384_s4] ss:$0 sm:$0xff]  ;;  %v10331_v41 = vld [vmem:[%s13387_s7 + $0x8] sm:$0xff]  ;;  %v10372_v0 = vld [vmem:[%s13382_s2 + $0x10] sm:$0xff]   ;;  %s13033_s29 = sld [smem:[#allocation2 + $0x6]] }
  0x15   :  { %8962 = vmatprep.subr.mxu1 %v205_v10  ;;  %v10312_v38 = vld [vmem:[%s13382_s2] sm:$0xff]   ;;  %v10367_v63 = vld [vmem:[%s13382_s2 + $0x8] sm:$0xff]   ;;  %v10381_v1 = vld [vmem:[%s13382_s2 + $0x18] sm:$0xff]  }
  0x16   :  { %8952 = vmatmul.mubr.msk.f32.gmra.mxu0 %vm65_vm0, %v52_v4  ;;  %8963 = vmatpush3.msra.mxu1 %v205_v10  ;;  %v7849_v49 = vld [vmem:[%s13386_s6] ss:$0 sm:$0xff]  ;;  %s368_s19 = smul.f32 0.5, %s10411_s16 }
  0x17   :  { %8954 = vmatprep.mubr.msk.f32.mxu0 %vm65_vm0, %v53_v5  ;;  %8964 = vmatprep.subr.mxu1 %v204_v11  ;;  %v10390_v2 = vld [vmem:[%s13387_s7] sm:$0xff]  ;;  %s369_s1 = smul.f32 0.16666667, %s10411_s16 }
  0x18   :  { %8965 = vmatpush3.msra.mxu1 %v204_v11  ;;  %s370_s20 = smul.f32 0.33333334, %s10411_s16 }
  0x19   :  { %8966 = vmatprep.subr.mxu1 %v203_v12  ;;  %s1345_s0 = smul.f32 0.5, %s10763_s21 }
  0x1a   :  { %8955 = vmatmul.mubr.msk.f32.gmra.mxu0 %vm65_vm0, %v54_v6  ;;  %8967 = vmatpush3.msra.mxu1 %v203_v12  ;;  %s1346_s26 = smul.f32 0.16666667, %s10763_s21 }
  0x1b   :  { %8957 = vmatprep.mubr.msk.f32.mxu0 %vm65_vm0, %v55_v7  ;;  %8996 = vmatprep.subr.mxu1 %v10319_v39  ;;  %s1347_s3 = smul.f32 0.33333334, %s10763_s21 }
  0x1c   :  { %s3508_s25 = smul.f32 0.5, %s11683_s24 }
  0x1d   :  { %s4590_s13 = smul.f32 0.5, %s12121_s30 }
  0x1e   :  { %8958 = vmatmul.mubr.msk.f32.gmra.mxu0 %vm65_vm0, %v56_v8  ;;  %s6755_s11 = smul.f32 0.16666667, %s13033_s29 }
  0x1f   :  { %8988 = vmatprep.mubr.msk.bf16.mxu0 %vm395_vm2, %v10312_v38  ;;  %s6756_s12 = smul.f32 0.33333334, %s13033_s29 }
  0xd2   :  { %v8950_v14 = vpop.f32.mrf.mxu0 }
  0xd3   :  { %v162_v15 = vadd.f32 %v8950_v14, %v7840_v13 }
  0xd4   :  { %v156_v16 = vpop.f32.mrf.mxu0 }
  0xd5   :  { %v157_v17 = vadd.f32 %v7840_v13, %v156_v16  ;;  %v10416_v16 = vld [vmem:[%s13388_s8] ss:$0 sm:$0xff] }
  0xd6   :  { %v8953_v18 = vpop.f32.mrf.mxu0 }
  0xd7   :  { %10113 = vtanh.f32 %v157_v17  ;;  %v172_v19 = vadd.f32 %v8953_v18, %v7840_v13 }
  0xd8   :  { %10115 = vtanh.f32 %v162_v15  ;;  %v166_v20 = vpop.f32.mrf.mxu0 }
  0xd9   :  { %v167_v21 = vadd.f32 %v7840_v13, %v166_v20 }
  0xda   :  { %v8956_v22 = vpop.f32.mrf.mxu0 }
  0xdb   :  { %10117 = vtanh.f32 %v167_v21  ;;  %v182_v23 = vadd.f32 %v8956_v22, %v7840_v13 }
  0xdc   :  { %10119 = vtanh.f32 %v172_v19  ;;  %v176_v24 = vpop.f32.mrf.mxu0 }
  0xdd   :  { %v177_v25 = vadd.f32 %v7840_v13, %v176_v24 }
  0xde   :  { %v8959_v26 = vpop.f32.mrf.mxu0 }
  0xdf   :  { %10121 = vtanh.f32 %v177_v25  ;;  %v192_v27 = vadd.f32 %v8959_v26, %v7840_v13 }
  0xe0   :  { %10123 = vtanh.f32 %v182_v23  ;;  %v186_v28 = vpop.f32.mrf.mxu0 }
  0xe1   :  { %v187_v29 = vadd.f32 %v7840_v13, %v186_v28 }
  0xe3   :  { %10125 = vtanh.f32 %v187_v29  ;;  %v10440_v29 = vstv %s368_s19 }
  0xe4   :  { %v10114_v30 = vpop.eup %10113  ;;  %10127 = vtanh.f32 %v192_v27 }
  0xe5   :  { %v10116_v31 = vpop.eup %10115  ;;  %8968 = vmatprep.mubr.msk.f32.mxu1 %vm214_vm1, %v10114_v30 }
  0xe6   :  { %8969 = vmatmul.mubr.msk.f32.vlgmr.msra.gmra.mxu1 %vm214_vm1, %v10116_v31 }
  0xe7   :  { %8997 = vmatpush3.msra.mxu1 %v10319_v39 }
  0xe8   :  { %v10118_v32 = vpop.eup %10117  ;;  %8998 = vmatprep.subr.mxu1 %v10324_v40 }
  0xe9   :  { %v10120_v33 = vpop.eup %10119  ;;  %8971 = vmatprep.mubr.msk.f32.mxu1 %vm214_vm1, %v10118_v32  ;;  %8999 = vmatpush3.msra.mxu1 %v10324_v40 }
  0xea   :  { %8972 = vmatmul.mubr.msk.f32.gmra.mxu1 %vm214_vm1, %v10120_v33  ;;  %9000 = vmatprep.subr.mxu1 %v10331_v41 }
  0xeb   :  { %9001 = vmatpush3.msra.mxu1 %v10331_v41 }
  0xec   :  { %v10122_v34 = vpop.eup %10121  ;;  %9002 = vmatprep.subr.mxu1 %v10390_v2 }
  0xed   :  { %v10124_v35 = vpop.eup %10123  ;;  %8974 = vmatprep.mubr.msk.f32.mxu1 %vm214_vm1, %v10122_v34  ;;  %9003 = vmatpush3.msra.mxu1 %v10390_v2 }
  0xee   :  { %8975 = vmatmul.mubr.msk.f32.gmra.mxu1 %vm214_vm1, %v10124_v35  ;;  %9032 = vmatprep.subr.mxu1 %v10319_v39 }
  0xf0   :  { %v10126_v36 = vpop.eup %10125 }
  0xf1   :  { %v10128_v37 = vpop.eup %10127  ;;  %8977 = vmatprep.mubr.msk.f32.mxu1 %vm214_vm1, %v10126_v36 }
  0xf2   :  { %8978 = vmatmul.mubr.msk.f32.gmra.mxu1 %vm214_vm1, %v10128_v37 }
 0x1a6   :  { %v8970_v42 = vpop.f32.mrf.mxu1 }
 0x1a7   :  { %v10360_v61 = vadd.f32 %v8970_v42, %v7849_v49 }
 0x1a8   :  { %v305_v43 = vpop.f32.mrf.mxu1 }
 0x1a9   :  { %v10356_v59 = vadd.f32 %v7849_v49, %v305_v43 }
 0x1aa   :  { %v8973_v44 = vpop.f32.mrf.mxu1 }
 0x1ab   :  { %v10354_v58 = vadd.f32 %v8973_v44, %v7849_v49  ;;  %v371_v62 = vpack.c.bf16 %v10360_v61, %v10356_v59 }
 0x1ac   :  { %v315_v45 = vpop.f32.mrf.mxu1 }
 0x1ad   :  { %v10350_v56 = vadd.f32 %v7849_v49, %v315_v45 }
 0x1ae   :  { %v8976_v46 = vpop.f32.mrf.mxu1 }
 0x1af   :  { %v10346_v54 = vadd.f32 %v8976_v46, %v7849_v49  ;;  %v372_v60 = vpack.c.bf16 %v10354_v58, %v10350_v56 }
 0x1b0   :  { %v325_v47 = vpop.f32.mrf.mxu1 }
 0x1b1   :  { %v10340_v51 = vadd.f32 %v7849_v49, %v325_v47 }
 0x1b2   :  { %v8979_v48 = vpop.f32.mrf.mxu1 }
 0x1b3   :  { %v10342_v52 = vadd.f32 %v8979_v48, %v7849_v49  ;;  %v373_v57 = vpack.c.bf16 %v10346_v54, %v10340_v51 }
 0x1b4   :  { %v335_v50 = vpop.f32.mrf.mxu1 }
 0x1b5   :  { %v10344_v53 = vadd.f32 %v7849_v49, %v335_v50 }
 0x1b7   :  { %v374_v55 = vpack.c.bf16 %v10342_v52, %v10344_v53 }
 0x1b9   :  { %8980 = vmatprep.subr.bf16.mxu0 %v374_v55 }
 0x1ba   :  { %8981 = vmatpush3.bf16.msra.mxu0 %v374_v55 }
 0x1bb   :  { %8982 = vmatprep.subr.bf16.mxu0 %v373_v57 }
 0x1be   :  { %8983 = vmatpush3.bf16.msra.mxu0 %v373_v57 }
 0x1bf   :  { %8984 = vmatprep.subr.bf16.mxu0 %v372_v60 }
 0x1c2   :  { %8985 = vmatpush3.bf16.msra.mxu0 %v372_v60 }
 0x1c3   :  { %8986 = vmatprep.subr.bf16.mxu0 %v371_v62 }
 0x1c6   :  { %8987 = vmatpush3.bf16.msra.mxu0 %v371_v62 }
 0x1c9   :  { %8989 = vmatmul.mubr.msk.bf16.vlgmr.msra.gmra.mxu0 %vm395_vm2, %v10367_v63 }
 0x1ca   :  { %8992 = vmatprep.mubr.msk.bf16.mxu0 %vm395_vm2, %v10372_v0 }
 0x1d1   :  { %8993 = vmatmul.mubr.msk.bf16.gmra.mxu0 %vm395_vm2, %v10381_v1 }
 0x1d2   :  { %9024 = vmatprep.mubr.msk.bf16.mxu0 %vm395_vm2, %v10312_v38 }
 0x289   :  { %v8990_v3 = vpop.f32.mrf.mxu0 }
 0x28b   :  { %v442_v4 = vpop.f32.mrf.mxu0 }
 0x28c   :  { %9004 = vmatprep.mubr.msk.f32.mxu1 %vm214_vm1, %v442_v4 }
 0x28d   :  { %v8991_v5 = vpop.f32.mrf.mxu0 }
 0x28f   :  { %v445_v6 = vpop.f32.mrf.mxu0 }
 0x290   :  { %9005 = vmatmul.mubr.msk.f32.vlgmr.msra.gmra.mxu1 %vm214_vm1, %v445_v6 }
 0x291   :  { %v8994_v7 = vpop.f32.mrf.mxu0  ;;  %9007 = vmatprep.mubr.msk.f32.mxu1 %vm214_vm1, %v8990_v3  ;;  %9033 = vmatpush3.msra.mxu1 %v10319_v39 }
 0x292   :  { %9034 = vmatprep.subr.mxu1 %v10324_v40 }
 0x293   :  { %v458_v8 = vpop.f32.mrf.mxu0  ;;  %9035 = vmatpush3.msra.mxu1 %v10324_v40 }
 0x294   :  { %9008 = vmatmul.mubr.msk.f32.gmra.mxu1 %vm214_vm1, %v8991_v5  ;;  %9036 = vmatprep.subr.mxu1 %v10331_v41 }
 0x295   :  { %v8995_v9 = vpop.f32.mrf.mxu0  ;;  %9010 = vmatprep.mubr.msk.f32.mxu1 %vm214_vm1, %v458_v8  ;;  %9037 = vmatpush3.msra.mxu1 %v10331_v41 }
 0x296   :  { %9038 = vmatprep.subr.mxu1 %v10390_v2 }
 0x297   :  { %v461_v10 = vpop.f32.mrf.mxu0  ;;  %9039 = vmatpush3.msra.mxu1 %v10390_v2 }
 0x298   :  { %9011 = vmatmul.mubr.msk.f32.gmra.mxu1 %vm214_vm1, %v461_v10  ;;  %9068 = vmatprep.subr.mxu1 %v10319_v39 }
 0x299   :  { %9013 = vmatprep.mubr.msk.f32.mxu1 %vm214_vm1, %v8994_v7 }
 0x29c   :  { %9014 = vmatmul.mubr.msk.f32.gmra.mxu1 %vm214_vm1, %v8995_v9 }
 0x350   :  { %v9006_v11 = vpop.f32.mrf.mxu1 }
 0x351   :  { %v10454_v35 = vadd.f32 %v9006_v11, %v10416_v16 }
 0x352   :  { %v563_v12 = vpop.f32.mrf.mxu1 }
 0x353   :  { %v10443_v30 = vadd.f32 %v10416_v16, %v563_v12  ;;  %v603_v48 = vmax.f32 %v10454_v35, 0.0 }
 0x354   :  { %v9009_v13 = vpop.f32.mrf.mxu1 }
 0x355   :  { %v10433_v25 = vadd.f32 %v9009_v13, %v10416_v16  ;;  %v602_v43 = vmax.f32 %v10443_v30, 0.0  ;;  %v629_v3 = vmul.f32 %v10440_v29, %v603_v48 }
 0x356   :  { %v573_v14 = vpop.f32.mrf.mxu1 }
 0x357   :  { %v10429_v22 = vadd.f32 %v10416_v16, %v573_v14  ;;  %v605_v36 = vmax.f32 %v10433_v25, 0.0  ;;  %v628_v57 = vmul.f32 %v10440_v29, %v602_v43  ;;  %v637_v7 = vadd.f32 %v629_v3, %v10360_v61 }
 0x358   :  { %v9012_v15 = vpop.f32.mrf.mxu1 }
 0x359   :  { %v10422_v19 = vadd.f32 %v9012_v15, %v10416_v16  ;;  %v604_v31 = vmax.f32 %v10429_v22, 0.0  ;;  %v631_v49 = vmul.f32 %v10440_v29, %v605_v36  ;;  %v636_v6 = vadd.f32 %v628_v57, %v10356_v59 }
 0x35a   :  { %v583_v17 = vpop.f32.mrf.mxu1 }
 0x35b   :  { %v10419_v18 = vadd.f32 %v10416_v16, %v583_v17  ;;  %v607_v26 = vmax.f32 %v10422_v19, 0.0  ;;  %v630_v44 = vmul.f32 %v10440_v29, %v604_v31  ;;  %v639_v4 = vadd.f32 %v631_v49, %v10354_v58 }
 0x35c   :  { %v9015_v20 = vpop.f32.mrf.mxu1  ;;  %v644_v8 = vpack.c.bf16 %v637_v7, %v636_v6 }
 0x35d   :  { %v10426_v21 = vadd.f32 %v9015_v20, %v10416_v16  ;;  %v606_v23 = vmax.f32 %v10419_v18, 0.0  ;;  %v633_v37 = vmul.f32 %v10440_v29, %v607_v26  ;;  %v638_v62 = vadd.f32 %v630_v44, %v10350_v56 }
 0x35e   :  { %v593_v24 = vpop.f32.mrf.mxu1  ;;  %v10506_v20 = vstv %s369_s1  ;;  %s4591_s1 = smul.f32 0.16666667, %s12121_s30 }
 0x35f   :  { %v609_v27 = vmax.f32 %v10426_v21, 0.0  ;;  %v10438_v28 = vadd.f32 %v10416_v16, %v593_v24  ;;  %v632_v32 = vmul.f32 %v10440_v29, %v606_v23  ;;  %v641_v50 = vadd.f32 %v633_v37, %v10346_v54 }
 0x360   :  { %v645_v5 = vpack.c.bf16 %v639_v4, %v638_v62  ;;  %v612_v30 = vmul.f32 %v10506_v20, %v603_v48  ;;  %v611_v37 = vmul.f32 %v10506_v20, %v602_v43  ;;  %v613_v62 = vmul.f32 %v10506_v20, %v604_v31 }
 0x361   :  { %v635_v33 = vmul.f32 %v10440_v29, %v609_v27  ;;  %v608_v34 = vmax.f32 %v10438_v28, 0.0  ;;  %v640_v47 = vadd.f32 %v632_v32, %v10340_v51  ;;  %v616_v3 = vmul.f32 %v10506_v20, %v607_v26 }
 0x362   :  { %v619_v43 = vadd.f32 %v611_v37, %v10356_v59  ;;  %v615_v19 = vmul.f32 %v10506_v20, %v606_v23 }
 0x363   :  { %v634_v42 = vmul.f32 %v10440_v29, %v608_v34  ;;  %v643_v45 = vadd.f32 %v635_v33, %v10342_v52  ;;  %v646_v60 = vpack.c.bf16 %v641_v50, %v640_v47  ;;  %v10513_v33 = vstv %s370_s20  ;;  %s4592_s20 = smul.f32 0.33333334, %s12121_s30 }
 0x364   :  { %v614_v50 = vmul.f32 %v10506_v20, %v605_v36  ;;  %v617_v37 = vmul.f32 %v10506_v20, %v608_v34 }
 0x365   :  { %v642_v46 = vadd.f32 %v634_v42, %v10344_v53 }
 0x366   :  { %v622_v7 = vadd.f32 %v614_v50, %v10354_v58  ;;  %v625_v34 = vadd.f32 %v617_v37, %v10344_v53 }
 0x367   :  { %v647_v55 = vpack.c.bf16 %v643_v45, %v642_v46  ;;  %v620_v46 = vadd.f32 %v612_v30, %v10360_v61 }
 0x369   :  { %9016 = vmatprep.subr.bf16.mxu0 %v647_v55 }
 0x36a   :  { %9017 = vmatpush3.bf16.msra.mxu0 %v647_v55 }
 0x36b   :  { %9018 = vmatprep.subr.bf16.mxu0 %v646_v60 }
 0x36e   :  { %9019 = vmatpush3.bf16.msra.mxu0 %v646_v60 }
 0x36f   :  { %9020 = vmatprep.subr.bf16.mxu0 %v645_v5 }
 0x372   :  { %9021 = vmatpush3.bf16.msra.mxu0 %v645_v5 }
 0x373   :  { %9022 = vmatprep.subr.bf16.mxu0 %v644_v8 }
 0x376   :  { %9023 = vmatpush3.bf16.msra.mxu0 %v644_v8 }
 0x379   :  { %9025 = vmatmul.mubr.msk.bf16.vlgmr.msra.gmra.mxu0 %vm395_vm2, %v10367_v63 }
 0x37a   :  { %9028 = vmatprep.mubr.msk.bf16.mxu0 %vm395_vm2, %v10372_v0 }
 0x381   :  { %9029 = vmatmul.mubr.msk.bf16.gmra.mxu0 %vm395_vm2, %v10381_v1 }
 0x382   :  { %9060 = vmatprep.mubr.msk.bf16.mxu0 %vm395_vm2, %v10312_v38 }
 0x439   :  { %v9026_v9 = vpop.f32.mrf.mxu0 }
 0x43b   :  { %v682_v10 = vpop.f32.mrf.mxu0 }
 0x43c   :  { %9040 = vmatprep.mubr.msk.f32.mxu1 %vm214_vm1, %v682_v10  ;;  %v621_v10 = vadd.f32 %v613_v62, %v10350_v56 }
 0x43d   :  { %v9027_v11 = vpop.f32.mrf.mxu0 }
 0x43f   :  { %v685_v12 = vpop.f32.mrf.mxu0 }
 0x440   :  { %9041 = vmatmul.mubr.msk.f32.vlgmr.msra.gmra.mxu1 %vm214_vm1, %v685_v12 }
 0x441   :  { %v9030_v13 = vpop.f32.mrf.mxu0  ;;  %9043 = vmatprep.mubr.msk.f32.mxu1 %vm214_vm1, %v9026_v9  ;;  %9069 = vmatpush3.msra.mxu1 %v10319_v39 }
 0x442   :  { %9070 = vmatprep.subr.mxu1 %v10324_v40 }
 0x443   :  { %v698_v14 = vpop.f32.mrf.mxu0  ;;  %9071 = vmatpush3.msra.mxu1 %v10324_v40 }
 0x444   :  { %9044 = vmatmul.mubr.msk.f32.gmra.mxu1 %vm214_vm1, %v9027_v11  ;;  %9072 = vmatprep.subr.mxu1 %v10331_v41  ;;  %v624_v11 = vadd.f32 %v616_v3, %v10346_v54 }
 0x445   :  { %v9031_v15 = vpop.f32.mrf.mxu0  ;;  %9046 = vmatprep.mubr.msk.f32.mxu1 %vm214_vm1, %v698_v14  ;;  %9073 = vmatpush3.msra.mxu1 %v10331_v41 }
 0x446   :  { %9074 = vmatprep.subr.mxu1 %v10390_v2 }
 0x447   :  { %v701_v17 = vpop.f32.mrf.mxu0  ;;  %9075 = vmatpush3.msra.mxu1 %v10390_v2 }
 0x448   :  { %9047 = vmatmul.mubr.msk.f32.gmra.mxu1 %vm214_vm1, %v701_v17  ;;  %9104 = vmatprep.subr.mxu1 %v10319_v39 }
 0x449   :  { %9049 = vmatprep.mubr.msk.f32.mxu1 %vm214_vm1, %v9030_v13 }
 0x44c   :  { %9050 = vmatmul.mubr.msk.f32.gmra.mxu1 %vm214_vm1, %v9031_v15  ;;  %v618_v15 = vmul.f32 %v10506_v20, %v609_v27 }
 0x500   :  { %v9042_v24 = vpop.f32.mrf.mxu1 }
 0x501   :  { %v10511_v32 = vadd.f32 %v9042_v24, %v10416_v16 }
 0x502   :  { %v803_v35 = vpop.f32.mrf.mxu1 }
 0x503   :  { %v843_v42 = vmax.f32 %v10511_v32, 0.0  ;;  %v804_v44 = vadd.f32 %v10416_v16, %v803_v35  ;;  %v623_v35 = vadd.f32 %v615_v19, %v10340_v51 }
 0x504   :  { %v9045_v45 = vpop.f32.mrf.mxu1 }
 0x505   :  { %v852_v47 = vmul.f32 %v10513_v33, %v843_v42  ;;  %v842_v48 = vmax.f32 %v804_v44, 0.0  ;;  %v819_v49 = vadd.f32 %v9045_v45, %v10416_v16 }
 0x506   :  { %v813_v55 = vpop.f32.mrf.mxu1 }
 0x507   :  { %v10527_v57 = vadd.f32 %v852_v47, %v620_v46  ;;  %v851_v60 = vmul.f32 %v10513_v33, %v842_v48  ;;  %v845_v4 = vmax.f32 %v819_v49, 0.0  ;;  %v814_v25 = vadd.f32 %v10416_v16, %v813_v55 }
 0x508   :  { %v9048_v5 = vpop.f32.mrf.mxu1  ;;  %v626_v46 = vadd.f32 %v618_v15, %v10342_v52 }
 0x509   :  { %v10537_v36 = vadd.f32 %v851_v60, %v619_v43  ;;  %v829_v6 = vadd.f32 %v9048_v5, %v10416_v16  ;;  %v854_v8 = vmul.f32 %v10513_v33, %v845_v4  ;;  %v844_v9 = vmax.f32 %v814_v25, 0.0 }
 0x50a   :  { %v823_v22 = vpop.f32.mrf.mxu1 }
 0x50b   :  { %v847_v31 = vmax.f32 %v829_v6, 0.0  ;;  %v824_v26 = vadd.f32 %v10416_v16, %v823_v22  ;;  %v10548_v12 = vadd.f32 %v854_v8, %v622_v7  ;;  %v853_v13 = vmul.f32 %v10513_v33, %v844_v9 }
 0x50c   :  { %v9051_v14 = vpop.f32.mrf.mxu1  ;;  %v869_v25 = vmul.f32 %v844_v9, %v10440_v29  ;;  %v870_v22 = vmul.f32 %v845_v4, %v10440_v29  ;;  %v868_v9 = vmul.f32 %v843_v42, %v10440_v29 }
 0x50d   :  { %v856_v18 = vmul.f32 %v10513_v33, %v847_v31  ;;  %v846_v17 = vmax.f32 %v824_v26, 0.0  ;;  %v839_v23 = vadd.f32 %v9051_v14, %v10416_v16  ;;  %v10556_v24 = vadd.f32 %v853_v13, %v621_v10 }
 0x50e   :  { %v833_v30 = vpop.f32.mrf.mxu1  ;;  %v872_v43 = vmul.f32 %v847_v31, %v10440_v29  ;;  %v867_v26 = vmul.f32 %v842_v48, %v10440_v29  ;;  %v878_v13 = vadd.f32 %v870_v22, %v10354_v58  ;;  %v876_v15 = vadd.f32 %v868_v9, %v10360_v61 }
 0x50f   :  { %v10562_v44 = vadd.f32 %v856_v18, %v624_v11  ;;  %v855_v21 = vmul.f32 %v10513_v33, %v846_v17  ;;  %v849_v45 = vmax.f32 %v839_v23, 0.0  ;;  %v834_v27 = vadd.f32 %v10416_v16, %v833_v30 }
 0x510   :  { %v871_v49 = vmul.f32 %v846_v17, %v10440_v29  ;;  %v880_v19 = vadd.f32 %v872_v43, %v10346_v54  ;;  %v877_v11 = vadd.f32 %v869_v25, %v10350_v56  ;;  %v875_v4 = vadd.f32 %v867_v26, %v10356_v59 }
 0x511   :  { %v10567_v47 = vadd.f32 %v855_v21, %v623_v35  ;;  %v858_v50 = vmul.f32 %v10513_v33, %v849_v45  ;;  %v874_v55 = vmul.f32 %v849_v45, %v10440_v29  ;;  %v848_v28 = vmax.f32 %v834_v27, 0.0 }
 0x512   :  { %v879_v8 = vadd.f32 %v871_v49, %v10340_v51  ;;  %v884_v14 = vpack.c.bf16 %v878_v13, %v877_v11  ;;  %v883_v48 = vpack.c.bf16 %v876_v15, %v875_v4 }
 0x513   :  { %v10574_v60 = vadd.f32 %v858_v50, %v626_v46  ;;  %v857_v62 = vmul.f32 %v10513_v33, %v848_v28  ;;  %v873_v3 = vmul.f32 %v848_v28, %v10440_v29  ;;  %v882_v5 = vadd.f32 %v874_v55, %v10342_v52 }
 0x514   :  { %v885_v10 = vpack.c.bf16 %v880_v19, %v879_v8 }
 0x515   :  { %v10580_v6 = vadd.f32 %v857_v62, %v625_v34  ;;  %v881_v7 = vadd.f32 %v873_v3, %v10344_v53 }
 0x517   :  { %v886_v31 = vpack.c.bf16 %v882_v5, %v881_v7 }
 0x519   :  { %9052 = vmatprep.subr.bf16.mxu0 %v886_v31 }
 0x51a   :  { %9053 = vmatpush3.bf16.msra.mxu0 %v886_v31 }
 0x51b   :  { %9054 = vmatprep.subr.bf16.mxu0 %v885_v10 }
 0x51e   :  { %9055 = vmatpush3.bf16.msra.mxu0 %v885_v10 }
 0x51f   :  { %9056 = vmatprep.subr.bf16.mxu0 %v884_v14 }
 0x522   :  { %9057 = vmatpush3.bf16.msra.mxu0 %v884_v14 }
 0x523   :  { %9058 = vmatprep.subr.bf16.mxu0 %v883_v48 }
 0x526   :  { %9059 = vmatpush3.bf16.msra.mxu0 %v883_v48 }
 0x529   :  { %9061 = vmatmul.mubr.msk.bf16.vlgmr.msra.gmra.mxu0 %vm395_vm2, %v10367_v63 }
 0x52a   :  { %9064 = vmatprep.mubr.msk.bf16.mxu0 %vm395_vm2, %v10372_v0 }
 0x531   :  { %9065 = vmatmul.mubr.msk.bf16.gmra.mxu0 %vm395_vm2, %v10381_v1 }
 0x532   :  { %9096 = vmatprep.mubr.msk.bf16.mxu0 %vm395_vm2, %v10312_v38 }
 0x5e9   :  { %v9062_v29 = vpop.f32.mrf.mxu0 }
 0x5eb   :  { %v921_v32 = vpop.f32.mrf.mxu0 }
 0x5ec   :  { %9076 = vmatprep.mubr.msk.f32.mxu1 %vm214_vm1, %v921_v32 }
 0x5ed   :  { %v9063_v42 = vpop.f32.mrf.mxu0 }
 0x5ef   :  { %v924_v18 = vpop.f32.mrf.mxu0 }
 0x5f0   :  { %9077 = vmatmul.mubr.msk.f32.vlgmr.msra.gmra.mxu1 %vm214_vm1, %v924_v18 }
 0x5f1   :  { %v9066_v17 = vpop.f32.mrf.mxu0  ;;  %9079 = vmatprep.mubr.msk.f32.mxu1 %vm214_vm1, %v9062_v29  ;;  %9105 = vmatpush3.msra.mxu1 %v10319_v39 }
 0x5f2   :  { %9106 = vmatprep.subr.mxu1 %v10324_v40 }
 0x5f3   :  { %v937_v23 = vpop.f32.mrf.mxu0  ;;  %9107 = vmatpush3.msra.mxu1 %v10324_v40 }
 0x5f4   :  { %9080 = vmatmul.mubr.msk.f32.gmra.mxu1 %vm214_vm1, %v9063_v42  ;;  %9108 = vmatprep.subr.mxu1 %v10331_v41  ;;  %v1105_v42 = vstv %s10411_s16  ;;  %s11235_s16 = sld [smem:[#allocation2 + $0x2]] }
 0x5f5   :  { %v9067_v30 = vpop.f32.mrf.mxu0  ;;  %9082 = vmatprep.mubr.msk.f32.mxu1 %vm214_vm1, %v937_v23  ;;  %9109 = vmatpush3.msra.mxu1 %v10331_v41 }
 0x5f6   :  { %9110 = vmatprep.subr.mxu1 %v10390_v2 }
 0x5f7   :  { %v940_v35 = vpop.f32.mrf.mxu0  ;;  %9111 = vmatpush3.msra.mxu1 %v10390_v2 }
 0x5f8   :  { %9083 = vmatmul.mubr.msk.f32.gmra.mxu1 %vm214_vm1, %v940_v35  ;;  %9140 = vmatprep.subr.mxu1 %v10319_v39 }
 0x5f9   :  { %9085 = vmatprep.mubr.msk.f32.mxu1 %vm214_vm1, %v9066_v17 }
 0x5fa   :  { %s2426_s17 = smul.f32 0.5, %s11235_s16 }
 0x5fb   :  { %s2427_s18 = smul.f32 0.16666667, %s11235_s16 }
 0x5fc   :  { %9086 = vmatmul.mubr.msk.f32.gmra.mxu1 %vm214_vm1, %v9067_v30  ;;  %s2428_s19 = smul.f32 0.33333334, %s11235_s16 }
 0x6b0   :  { %v9078_v37 = vpop.f32.mrf.mxu1 }
 0x6b1   :  { %v1048_v21 = vadd.f32 %v9078_v37, %v10416_v16 }
 0x6b2   :  { %v1042_v45 = vpop.f32.mrf.mxu1 }
 0x6b3   :  { %v1082_v27 = vmax.f32 %v1048_v21, 0.0  ;;  %v1043_v46 = vadd.f32 %v10416_v16, %v1042_v45 }
 0x6b4   :  { %v9081_v49 = vpop.f32.mrf.mxu1 }
 0x6b5   :  { %v1090_v50 = vmul.f32 %v1082_v27, %v10513_v33  ;;  %v1081_v55 = vmax.f32 %v1043_v46, 0.0  ;;  %v1058_v28 = vadd.f32 %v9081_v49, %v10416_v16 }
 0x6b6   :  { %v1052_v34 = vpop.f32.mrf.mxu1 }
 0x6b7   :  { %v10623_v43 = vadd.f32 %v1090_v50, %v10527_v57  ;;  %v1089_v62 = vmul.f32 %v1081_v55, %v10513_v33  ;;  %v1084_v3 = vmax.f32 %v1058_v28, 0.0  ;;  %v1053_v25 = vadd.f32 %v10416_v16, %v1052_v34 }
 0x6b8   :  { %v9084_v5 = vpop.f32.mrf.mxu1 }
 0x6b9   :  { %v10628_v7 = vadd.f32 %v1089_v62, %v10537_v36  ;;  %v1068_v8 = vadd.f32 %v9084_v5, %v10416_v16  ;;  %v1092_v22 = vmul.f32 %v1084_v3, %v10513_v33  ;;  %v1083_v19 = vmax.f32 %v1053_v25, 0.0 }
 0x6ba   :  { %v1062_v31 = vpop.f32.mrf.mxu1  ;;  %v1109_v28 = vmul.f32 %v1105_v42, %v1084_v3  ;;  %v1106_v25 = vmul.f32 %v1105_v42, %v1081_v55  ;;  %v1107_v5 = vmul.f32 %v1105_v42, %v1082_v27 }
 0x6bb   :  { %v1086_v26 = vmax.f32 %v1068_v8, 0.0  ;;  %v1063_v57 = vadd.f32 %v10416_v16, %v1062_v31  ;;  %v10634_v10 = vadd.f32 %v1092_v22, %v10548_v12  ;;  %v1091_v11 = vmul.f32 %v1083_v19, %v10513_v33 }
 0x6bc   :  { %v9087_v9 = vpop.f32.mrf.mxu1  ;;  %v1108_v45 = vmul.f32 %v1105_v42, %v1083_v19  ;;  %v1114_v8 = vadd.f32 %v1106_v25, %v10356_v59 }
 0x6bd   :  { %v1094_v13 = vmul.f32 %v1086_v26, %v10513_v33  ;;  %v1085_v36 = vmax.f32 %v1063_v57, 0.0  ;;  %v1078_v14 = vadd.f32 %v9087_v9, %v10416_v16  ;;  %v10640_v4 = vadd.f32 %v1091_v11, %v10556_v24 }
 0x6be   :  { %v1072_v15 = vpop.f32.mrf.mxu1  ;;  %v1111_v24 = vmul.f32 %v1105_v42, %v1086_v26 }
 0x6bf   :  { %v10643_v48 = vadd.f32 %v1094_v13, %v10562_v44  ;;  %v1093_v29 = vmul.f32 %v1085_v36, %v10513_v33  ;;  %v1088_v32 = vmax.f32 %v1078_v14, 0.0  ;;  %v1073_v12 = vadd.f32 %v10416_v16, %v1072_v15 }
 0x6c0   :  { %v1110_v17 = vmul.f32 %v1105_v42, %v1085_v36  ;;  %v1119_v34 = vadd.f32 %v1111_v24, %v10346_v54 }
 0x6c1   :  { %v10649_v18 = vadd.f32 %v1093_v29, %v10567_v47  ;;  %v1096_v23 = vmul.f32 %v1088_v32, %v10513_v33  ;;  %v1113_v30 = vmul.f32 %v1105_v42, %v1088_v32  ;;  %v1087_v35 = vmax.f32 %v1073_v12, 0.0 }
 0x6c2   :  { %v1118_v50 = vadd.f32 %v1110_v17, %v10340_v51  ;;  %v1115_v51 = vadd.f32 %v1107_v5, %v10360_v61 }
 0x6c3   :  { %v10653_v37 = vadd.f32 %v1096_v23, %v10574_v60  ;;  %v1095_v44 = vmul.f32 %v1087_v35, %v10513_v33  ;;  %v1112_v21 = vmul.f32 %v1105_v42, %v1087_v35  ;;  %v1121_v46 = vadd.f32 %v1113_v30, %v10342_v52 }
 0x6c4   :  { %v1124_v60 = vpack.c.bf16 %v1119_v34, %v1118_v50  ;;  %v1116_v33 = vadd.f32 %v1108_v45, %v10350_v56  ;;  %v1117_v52 = vadd.f32 %v1109_v28, %v10354_v58 }
 0x6c5   :  { %v10658_v49 = vadd.f32 %v1095_v44, %v10580_v6  ;;  %v1120_v47 = vadd.f32 %v1112_v21, %v10344_v53  ;;  %v1122_v53 = vpack.c.bf16 %v1115_v51, %v1114_v8 }
 0x6c6   :  { %v1123_v6 = vpack.c.bf16 %v1117_v52, %v1116_v33 }
 0x6c7   :  { %v1125_v62 = vpack.c.bf16 %v1121_v46, %v1120_v47 }
 0x6c9   :  { %9088 = vmatprep.subr.bf16.mxu0 %v1125_v62 }
 0x6ca   :  { %9089 = vmatpush3.bf16.msra.mxu0 %v1125_v62 }
 0x6cb   :  { %9090 = vmatprep.subr.bf16.mxu0 %v1124_v60 }
 0x6ce   :  { %9091 = vmatpush3.bf16.msra.mxu0 %v1124_v60 }
 0x6cf   :  { %9092 = vmatprep.subr.bf16.mxu0 %v1123_v6 }
 0x6d2   :  { %9093 = vmatpush3.bf16.msra.mxu0 %v1123_v6 }
 0x6d3   :  { %9094 = vmatprep.subr.bf16.mxu0 %v1122_v53 }
 0x6d6   :  { %9095 = vmatpush3.bf16.msra.mxu0 %v1122_v53 }
 0x6d9   :  { %9097 = vmatmul.mubr.msk.bf16.vlgmr.msra.gmra.mxu0 %vm395_vm2, %v10367_v63 }
 0x6da   :  { %9100 = vmatprep.mubr.msk.bf16.mxu0 %vm395_vm2, %v10372_v0 }
 0x6e1   :  { %9101 = vmatmul.mubr.msk.bf16.gmra.mxu0 %vm395_vm2, %v10381_v1 }
 0x6e2   :  { %9132 = vmatprep.mubr.msk.bf16.mxu0 %vm395_vm2, %v10312_v38 }
 0x799   :  { %v9098_v54 = vpop.f32.mrf.mxu0 }
 0x79b   :  { %v1160_v56 = vpop.f32.mrf.mxu0 }
 0x79c   :  { %9112 = vmatprep.mubr.msk.f32.mxu1 %vm214_vm1, %v1160_v56 }
 0x79d   :  { %v9099_v58 = vpop.f32.mrf.mxu0 }
 0x79f   :  { %v1163_v59 = vpop.f32.mrf.mxu0 }
 0x7a0   :  { %9113 = vmatmul.mubr.msk.f32.vlgmr.msra.gmra.mxu1 %vm214_vm1, %v1163_v59 }
 0x7a1   :  { %v9102_v61 = vpop.f32.mrf.mxu0  ;;  %9115 = vmatprep.mubr.msk.f32.mxu1 %vm214_vm1, %v9098_v54  ;;  %9141 = vmatpush3.msra.mxu1 %v10319_v39 }
 0x7a2   :  { %9142 = vmatprep.subr.mxu1 %v10324_v40 }
 0x7a3   :  { %v1176_v27 = vpop.f32.mrf.mxu0  ;;  %9143 = vmatpush3.msra.mxu1 %v10324_v40 }
 0x7a4   :  { %9116 = vmatmul.mubr.msk.f32.gmra.mxu1 %vm214_vm1, %v9099_v58  ;;  %9144 = vmatprep.subr.mxu1 %v10331_v41 }
 0x7a5   :  { %v9103_v55 = vpop.f32.mrf.mxu0  ;;  %9118 = vmatprep.mubr.msk.f32.mxu1 %vm214_vm1, %v1176_v27  ;;  %9145 = vmatpush3.msra.mxu1 %v10331_v41 }
 0x7a6   :  { %9146 = vmatprep.subr.mxu1 %v10390_v2 }
 0x7a7   :  { %v1179_v3 = vpop.f32.mrf.mxu0  ;;  %9147 = vmatpush3.msra.mxu1 %v10390_v2 }
 0x7a8   :  { %9119 = vmatmul.mubr.msk.f32.gmra.mxu1 %vm214_vm1, %v1179_v3  ;;  %9176 = vmatprep.subr.mxu1 %v10319_v39 }
 0x7a9   :  { %9121 = vmatprep.mubr.msk.f32.mxu1 %vm214_vm1, %v9102_v61 }
 0x7ac   :  { %9122 = vmatmul.mubr.msk.f32.gmra.mxu1 %vm214_vm1, %v9103_v55 }
 0x860   :  { %v9114_v22 = vpop.f32.mrf.mxu1 }
 0x861   :  { %v1287_v45 = vadd.f32 %v9114_v22, %v10416_v16 }
 0x862   :  { %v1281_v19 = vpop.f32.mrf.mxu1 }
 0x863   :  { %v1282_v30 = vadd.f32 %v10416_v16, %v1281_v19  ;;  %v1321_v33 = vmax.f32 %v1287_v45, 0.0 }
 0x864   :  { %v9117_v31 = vpop.f32.mrf.mxu1 }
 0x865   :  { %v1297_v12 = vadd.f32 %v9117_v31, %v10416_v16  ;;  %v1320_v28 = vmax.f32 %v1282_v30, 0.0 }
 0x866   :  { %v1291_v26 = vpop.f32.mrf.mxu1 }
 0x867   :  { %v1292_v14 = vadd.f32 %v10416_v16, %v1291_v26  ;;  %v1323_v46 = vmax.f32 %v1297_v12, 0.0  ;;  %v1328_v8 = vmul.f32 %v1320_v28, %v10506_v20 }
 0x868   :  { %v9120_v57 = vpop.f32.mrf.mxu1 }
 0x869   :  { %v1307_v9 = vadd.f32 %v9120_v57, %v10416_v16  ;;  %v1322_v35 = vmax.f32 %v1292_v14, 0.0  ;;  %v1331_v5 = vmul.f32 %v1323_v46, %v10506_v20 }
 0x86a   :  { %v1301_v11 = vpop.f32.mrf.mxu1 }
 0x86b   :  { %v1302_v13 = vadd.f32 %v10416_v16, %v1301_v11  ;;  %v1325_v42 = vmax.f32 %v1307_v9, 0.0  ;;  %v1330_v34 = vmul.f32 %v1322_v35, %v10506_v20  ;;  %v10727_v51 = vadd.f32 %v1331_v5, %v10634_v10 }
 0x86c   :  { %v9123_v36 = vpop.f32.mrf.mxu1 }
 0x86d   :  { %v1324_v15 = vmax.f32 %v1302_v13, 0.0  ;;  %v1317_v29 = vadd.f32 %v9123_v36, %v10416_v16  ;;  %v1333_v47 = vmul.f32 %v1325_v42, %v10506_v20 }
 0x86e   :  { %v1311_v32 = vpop.f32.mrf.mxu1 }
 0x86f   :  { %v1327_v17 = vmax.f32 %v1317_v29, 0.0  ;;  %v1312_v23 = vadd.f32 %v10416_v16, %v1311_v32  ;;  %v1332_v24 = vmul.f32 %v1324_v15, %v10506_v20  ;;  %v10715_v52 = vadd.f32 %v1333_v47, %v10643_v48 }
 0x870   :  { %v10730_v48 = vadd.f32 %v1328_v8, %v10628_v7  ;;  %v10787_v29 = vstv %s1345_s0 }
 0x871   :  { %v1335_v44 = vmul.f32 %v1327_v17, %v10506_v20  ;;  %v1326_v21 = vmax.f32 %v1312_v23, 0.0  ;;  %v10705_v62 = vadd.f32 %v1332_v24, %v10649_v18  ;;  %v10721_v18 = vadd.f32 %v1330_v34, %v10640_v4 }
 0x873   :  { %v1334_v50 = vmul.f32 %v1326_v21, %v10506_v20  ;;  %v10708_v25 = vadd.f32 %v1335_v44, %v10653_v37  ;;  %v1350_v37 = vpack.c.bf16 %v10715_v52, %v10705_v62  ;;  %v1349_v53 = vpack.c.bf16 %v10727_v51, %v10721_v18 }
 0x875   :  { %v10711_v60 = vadd.f32 %v1334_v50, %v10658_v49  ;;  %v1329_v49 = vmul.f32 %v1321_v33, %v10506_v20 }
 0x877   :  { %v1351_v6 = vpack.c.bf16 %v10708_v25, %v10711_v60  ;;  %v10735_v4 = vadd.f32 %v1329_v49, %v10623_v43 }
 0x879   :  { %9124 = vmatprep.subr.bf16.mxu0 %v1351_v6  ;;  %v1348_v54 = vpack.c.bf16 %v10735_v4, %v10730_v48 }
 0x87a   :  { %9125 = vmatpush3.bf16.msra.mxu0 %v1351_v6 }
 0x87b   :  { %9126 = vmatprep.subr.bf16.mxu0 %v1350_v37 }
 0x87e   :  { %9127 = vmatpush3.bf16.msra.mxu0 %v1350_v37 }
 0x87f   :  { %9128 = vmatprep.subr.bf16.mxu0 %v1349_v53 }
 0x882   :  { %9129 = vmatpush3.bf16.msra.mxu0 %v1349_v53 }
 0x883   :  { %9130 = vmatprep.subr.bf16.mxu0 %v1348_v54 }
 0x886   :  { %9131 = vmatpush3.bf16.msra.mxu0 %v1348_v54 }
 0x889   :  { %9133 = vmatmul.mubr.msk.bf16.vlgmr.msra.gmra.mxu0 %vm395_vm2, %v10367_v63 }
 0x88a   :  { %9136 = vmatprep.mubr.msk.bf16.mxu0 %vm395_vm2, %v10372_v0 }
 0x891   :  { %9137 = vmatmul.mubr.msk.bf16.gmra.mxu0 %vm395_vm2, %v10381_v1 }
 0x892   :  { %9168 = vmatprep.mubr.msk.bf16.mxu0 %vm395_vm2, %v10312_v38 }
 0x949   :  { %v9134_v20 = vpop.f32.mrf.mxu0 }
 0x94b   :  { %v1386_v43 = vpop.f32.mrf.mxu0 }
 0x94c   :  { %9148 = vmatprep.mubr.msk.f32.mxu1 %vm214_vm1, %v1386_v43 }
 0x94d   :  { %v9135_v7 = vpop.f32.mrf.mxu0 }
 0x94f   :  { %v1389_v10 = vpop.f32.mrf.mxu0 }
 0x950   :  { %9149 = vmatmul.mubr.msk.f32.vlgmr.msra.gmra.mxu1 %vm214_vm1, %v1389_v10 }
 0x951   :  { %v9138_v56 = vpop.f32.mrf.mxu0  ;;  %9151 = vmatprep.mubr.msk.f32.mxu1 %vm214_vm1, %v9134_v20  ;;  %9177 = vmatpush3.msra.mxu1 %v10319_v39 }
 0x952   :  { %9178 = vmatprep.subr.mxu1 %v10324_v40 }
 0x953   :  { %v1402_v58 = vpop.f32.mrf.mxu0  ;;  %9179 = vmatpush3.msra.mxu1 %v10324_v40 }
 0x954   :  { %9152 = vmatmul.mubr.msk.f32.gmra.mxu1 %vm214_vm1, %v9135_v7  ;;  %9180 = vmatprep.subr.mxu1 %v10331_v41 }
 0x955   :  { %v9139_v59 = vpop.f32.mrf.mxu0  ;;  %9154 = vmatprep.mubr.msk.f32.mxu1 %vm214_vm1, %v1402_v58  ;;  %9181 = vmatpush3.msra.mxu1 %v10331_v41 }
 0x956   :  { %9182 = vmatprep.subr.mxu1 %v10390_v2 }
 0x957   :  { %v1405_v61 = vpop.f32.mrf.mxu0  ;;  %9183 = vmatpush3.msra.mxu1 %v10390_v2 }
 0x958   :  { %9155 = vmatmul.mubr.msk.f32.gmra.mxu1 %vm214_vm1, %v1405_v61  ;;  %9212 = vmatprep.subr.mxu1 %v10319_v39 }
 0x959   :  { %9157 = vmatprep.mubr.msk.f32.mxu1 %vm214_vm1, %v9138_v56 }
 0x95c   :  { %9158 = vmatmul.mubr.msk.f32.gmra.mxu1 %vm214_vm1, %v9139_v59 }
 0xa10   :  { %v9150_v40 = vpop.f32.mrf.mxu1 }
 0xa11   :  { %v10801_v30 = vadd.f32 %v9150_v40, %v10416_v16 }
 0xa12   :  { %v1507_v27 = vpop.f32.mrf.mxu1 }
 0xa13   :  { %v10790_v32 = vadd.f32 %v10416_v16, %v1507_v27  ;;  %v1547_v28 = vmax.f32 %v10801_v30, 0.0 }
 0xa14   :  { %v9153_v55 = vpop.f32.mrf.mxu1 }
 0xa15   :  { %v10780_v13 = vadd.f32 %v9153_v55, %v10416_v16  ;;  %v1546_v21 = vmax.f32 %v10790_v32, 0.0  ;;  %v1573_v49 = vmul.f32 %v10787_v29, %v1547_v28  ;;  %v10870_v55 = vstv %s1346_s26  ;;  %s3509_s26 = smul.f32 0.16666667, %s11683_s24 }
 0xa16   :  { %v1517_v41 = vpop.f32.mrf.mxu1 }
 0xa17   :  { %v10776_v57 = vadd.f32 %v10416_v16, %v1517_v41  ;;  %v1549_v35 = vmax.f32 %v10780_v13, 0.0  ;;  %v1572_v6 = vmul.f32 %v10787_v29, %v1546_v21  ;;  %v1581_v43 = vadd.f32 %v1573_v49, %v10735_v4 }
 0xa18   :  { %v9156_v3 = vpop.f32.mrf.mxu1 }
 0xa19   :  { %v10769_v31 = vadd.f32 %v9156_v3, %v10416_v16  ;;  %v1548_v12 = vmax.f32 %v10776_v57, 0.0  ;;  %v1575_v34 = vmul.f32 %v10787_v29, %v1549_v35  ;;  %v1580_v54 = vadd.f32 %v1572_v6, %v10730_v48 }
 0xa1a   :  { %v1527_v22 = vpop.f32.mrf.mxu1  ;;  %v1556_v3 = vmul.f32 %v10870_v55, %v1547_v28  ;;  %v1558_v32 = vmul.f32 %v10870_v55, %v1549_v35 }
 0xa1b   :  { %v10766_v19 = vadd.f32 %v10416_v16, %v1527_v22  ;;  %v1551_v36 = vmax.f32 %v10769_v31, 0.0  ;;  %v1574_v45 = vmul.f32 %v10787_v29, %v1548_v12  ;;  %v1583_v53 = vadd.f32 %v1575_v34, %v10727_v51 }
 0xa1c   :  { %v9159_v39 = vpop.f32.mrf.mxu1  ;;  %v1588_v7 = vpack.c.bf16 %v1581_v43, %v1580_v54  ;;  %v1557_v34 = vmul.f32 %v10870_v55, %v1548_v12 }
 0xa1d   :  { %v10773_v26 = vadd.f32 %v9159_v39, %v10416_v16  ;;  %v1550_v11 = vmax.f32 %v10766_v19, 0.0  ;;  %v1577_v24 = vmul.f32 %v10787_v29, %v1551_v36  ;;  %v1582_v37 = vadd.f32 %v1574_v45, %v10721_v18 }
 0xa1e   :  { %v1537_v9 = vpop.f32.mrf.mxu1  ;;  %v10877_v39 = vstv %s1347_s3  ;;  %v1565_v54 = vadd.f32 %v1557_v34, %v10721_v18  ;;  %s3510_s3 = smul.f32 0.33333334, %s11683_s24 }
 0xa1f   :  { %v1553_v14 = vmax.f32 %v10773_v26, 0.0  ;;  %v10785_v15 = vadd.f32 %v10416_v16, %v1537_v9  ;;  %v1576_v42 = vmul.f32 %v10787_v29, %v1550_v11  ;;  %v1585_v33 = vadd.f32 %v1577_v24, %v10715_v52 }
 0xa20   :  { %v1589_v20 = vpack.c.bf16 %v1583_v53, %v1582_v37  ;;  %v1555_v9 = vmul.f32 %v10870_v55, %v1546_v21  ;;  %v1564_v24 = vadd.f32 %v1556_v3, %v10735_v4  ;;  %v1566_v37 = vadd.f32 %v1558_v32, %v10727_v51 }
 0xa21   :  { %v1579_v17 = vmul.f32 %v10787_v29, %v1553_v14  ;;  %v1552_v23 = vmax.f32 %v10785_v15, 0.0  ;;  %v1584_v46 = vadd.f32 %v1576_v42, %v10705_v62  ;;  %v1559_v31 = vmul.f32 %v10870_v55, %v1550_v11 }
 0xa22   :  { %v1563_v21 = vadd.f32 %v1555_v9, %v10730_v48 }
 0xa23   :  { %v1578_v44 = vmul.f32 %v10787_v29, %v1552_v23  ;;  %v1587_v47 = vadd.f32 %v1579_v17, %v10708_v25  ;;  %v1590_v8 = vpack.c.bf16 %v1585_v33, %v1584_v46  ;;  %v1560_v33 = vmul.f32 %v10870_v55, %v1551_v36 }
 0xa25   :  { %v1586_v50 = vadd.f32 %v1578_v44, %v10711_v60 }
 0xa27   :  { %v1591_v5 = vpack.c.bf16 %v1587_v47, %v1586_v50 }
 0xa29   :  { %9160 = vmatprep.subr.bf16.mxu0 %v1591_v5 }
 0xa2a   :  { %9161 = vmatpush3.bf16.msra.mxu0 %v1591_v5 }
 0xa2b   :  { %9162 = vmatprep.subr.bf16.mxu0 %v1590_v8 }
 0xa2e   :  { %9163 = vmatpush3.bf16.msra.mxu0 %v1590_v8 }
 0xa2f   :  { %9164 = vmatprep.subr.bf16.mxu0 %v1589_v20 }
 0xa32   :  { %9165 = vmatpush3.bf16.msra.mxu0 %v1589_v20  ;;  %v1568_v20 = vadd.f32 %v1560_v33, %v10715_v52 }
 0xa33   :  { %9166 = vmatprep.subr.bf16.mxu0 %v1588_v7 }
 0xa36   :  { %9167 = vmatpush3.bf16.msra.mxu0 %v1588_v7 }
 0xa39   :  { %9169 = vmatmul.mubr.msk.bf16.vlgmr.msra.gmra.mxu0 %vm395_vm2, %v10367_v63  ;;  %v10844_v63 = vld [vmem:[%s13387_s7 + $0x18] sm:$0xff] }
 0xa3a   :  { %9172 = vmatprep.mubr.msk.bf16.mxu0 %vm395_vm2, %v10372_v0 }
 0xa41   :  { %9173 = vmatmul.mubr.msk.bf16.gmra.mxu0 %vm395_vm2, %v10381_v1  ;;  %v10858_v1 = vld [vmem:[%s13387_s7 + $0x8] sm:$0xff] }
 0xa42   :  { %9204 = vmatprep.mubr.msk.bf16.mxu0 %vm395_vm2, %v10312_v38  ;;  %v10850_v38 = vld [vmem:[%s13387_s7 + $0x10] sm:$0xff] }
 0xaf9   :  { %v9170_v10 = vpop.f32.mrf.mxu0 }
 0xafb   :  { %v1626_v56 = vpop.f32.mrf.mxu0 }
 0xafc   :  { %9184 = vmatprep.mubr.msk.f32.mxu1 %vm214_vm1, %v1626_v56  ;;  %v1562_v56 = vmul.f32 %v10870_v55, %v1553_v14 }
 0xafd   :  { %v9171_v58 = vpop.f32.mrf.mxu0 }
 0xafe   :  { %v1570_v3 = vadd.f32 %v1562_v56, %v10708_v25 }
 0xaff   :  { %v1629_v59 = vpop.f32.mrf.mxu0 }
 0xb00   :  { %9185 = vmatmul.mubr.msk.f32.vlgmr.msra.gmra.mxu1 %vm214_vm1, %v1629_v59 }
 0xb01   :  { %v9174_v61 = vpop.f32.mrf.mxu0  ;;  %9187 = vmatprep.mubr.msk.f32.mxu1 %vm214_vm1, %v9170_v10  ;;  %9213 = vmatpush3.msra.mxu1 %v10844_v63 }
 0xb02   :  { %9214 = vmatprep.subr.mxu1 %v10850_v38 }
 0xb03   :  { %v1642_v0 = vpop.f32.mrf.mxu0  ;;  %9215 = vmatpush3.msra.mxu1 %v10850_v38 }
 0xb04   :  { %9188 = vmatmul.mubr.msk.f32.gmra.mxu1 %vm214_vm1, %v9171_v58  ;;  %9216 = vmatprep.subr.mxu1 %v10858_v1 }
 0xb05   :  { %v9175_v40 = vpop.f32.mrf.mxu0  ;;  %9190 = vmatprep.mubr.msk.f32.mxu1 %vm214_vm1, %v1642_v0  ;;  %9217 = vmatpush3.msra.mxu1 %v10858_v1  ;;  %v1567_v0 = vadd.f32 %v1559_v31, %v10705_v62 }
 0xb06   :  { %9218 = vmatprep.subr.mxu1 %v10390_v2 }
 0xb07   :  { %v1645_v27 = vpop.f32.mrf.mxu0  ;;  %9219 = vmatpush3.msra.mxu1 %v10390_v2 }
 0xb08   :  { %9191 = vmatmul.mubr.msk.f32.gmra.mxu1 %vm214_vm1, %v1645_v27  ;;  %9248 = vmatprep.subr.mxu1 %v10844_v63 }
 0xb09   :  { %9193 = vmatprep.mubr.msk.f32.mxu1 %vm214_vm1, %v9174_v61 }
 0xb0c   :  { %9194 = vmatmul.mubr.msk.f32.gmra.mxu1 %vm214_vm1, %v9175_v40  ;;  %v1561_v40 = vmul.f32 %v10870_v55, %v1552_v23 }
 0xb0e   :  { %v1569_v23 = vadd.f32 %v1561_v40, %v10711_v60  ;;  %v11011_v40 = vld [vmem:[%s13388_s8] ss:$0 sm:$0xff] }
 0xbc0   :  { %v9186_v41 = vpop.f32.mrf.mxu1 }
 0xbc1   :  { %v10875_v22 = vadd.f32 %v9186_v41, %v10416_v16 }
 0xbc2   :  { %v1747_v2 = vpop.f32.mrf.mxu1 }
 0xbc3   :  { %v1787_v42 = vmax.f32 %v10875_v22, 0.0  ;;  %v1748_v17 = vadd.f32 %v10416_v16, %v1747_v2  ;;  %v10977_v22 = vld [vmem:[%s13382_s2 + $0x18] sm:$0xff]  }
 0xbc4   :  { %v9189_v30 = vpop.f32.mrf.mxu1 }
 0xbc5   :  { %v1796_v44 = vmul.f32 %v10877_v39, %v1787_v42  ;;  %v1786_v45 = vmax.f32 %v1748_v17, 0.0  ;;  %v1763_v46 = vadd.f32 %v9189_v30, %v10416_v16 }
 0xbc6   :  { %v1757_v47 = vpop.f32.mrf.mxu1 }
 0xbc7   :  { %v10893_v50 = vadd.f32 %v1796_v44, %v1564_v24  ;;  %v1795_v28 = vmul.f32 %v10877_v39, %v1786_v45  ;;  %v1789_v5 = vmax.f32 %v1763_v46, 0.0  ;;  %v1758_v13 = vadd.f32 %v10416_v16, %v1757_v47 }
 0xbc8   :  { %v9192_v6 = vpop.f32.mrf.mxu1 }
 0xbc9   :  { %v10903_v35 = vadd.f32 %v1795_v28, %v1563_v21  ;;  %v1773_v8 = vadd.f32 %v9192_v6, %v10416_v16  ;;  %v1798_v49 = vmul.f32 %v10877_v39, %v1789_v5  ;;  %v1788_v53 = vmax.f32 %v1758_v13, 0.0 }
 0xbca   :  { %v1767_v57 = vpop.f32.mrf.mxu1  ;;  %v1814_v33 = vmul.f32 %v1789_v5, %v10787_v29 }
 0xbcb   :  { %v1791_v12 = vmax.f32 %v1773_v8, 0.0  ;;  %v1768_v36 = vadd.f32 %v10416_v16, %v1767_v57  ;;  %v10914_v43 = vadd.f32 %v1798_v49, %v1566_v37  ;;  %v1797_v7 = vmul.f32 %v10877_v39, %v1788_v53 }
 0xbcc   :  { %v9195_v10 = vpop.f32.mrf.mxu1  ;;  %v1813_v32 = vmul.f32 %v1788_v53, %v10787_v29  ;;  %v1811_v8 = vmul.f32 %v1786_v45, %v10787_v29  ;;  %v1812_v53 = vmul.f32 %v1787_v42, %v10787_v29  ;;  %v1822_v57 = vadd.f32 %v1814_v33, %v10727_v51  ;;  %v10984_v42 = vld [vmem:[%s13382_s2] sm:$0xff]  }
 0xbcd   :  { %v1800_v19 = vmul.f32 %v10877_v39, %v1791_v12  ;;  %v1790_v58 = vmax.f32 %v1768_v36, 0.0  ;;  %v1783_v11 = vadd.f32 %v9195_v10, %v10416_v16  ;;  %v10922_v59 = vadd.f32 %v1797_v7, %v1565_v54  ;;  %v10963_v36 = vld [vmem:[%s13382_s2 + $0x8] sm:$0xff]  }
 0xbce   :  { %v1777_v61 = vpop.f32.mrf.mxu1  ;;  %v1816_v24 = vmul.f32 %v1791_v12, %v10787_v29  ;;  %v1821_v49 = vadd.f32 %v1813_v32, %v10721_v18  ;;  %v1819_v31 = vadd.f32 %v1811_v8, %v10730_v48  ;;  %v1820_v12 = vadd.f32 %v1812_v53, %v10735_v4 }
 0xbcf   :  { %v10928_v27 = vadd.f32 %v1800_v19, %v1568_v20  ;;  %v1799_v26 = vmul.f32 %v10877_v39, %v1790_v58  ;;  %v1793_v41 = vmax.f32 %v1783_v11, 0.0  ;;  %v1778_v14 = vadd.f32 %v10416_v16, %v1777_v61  ;;  %v11001_v11 = vld [vmem:[%s13387_s7] sm:$0xff] }
 0xbd0   :  { %v1815_v9 = vmul.f32 %v1790_v58, %v10787_v29  ;;  %v1824_v13 = vadd.f32 %v1816_v24, %v10715_v52  ;;  %v1828_v5 = vpack.c.bf16 %v1822_v57, %v1821_v49  ;;  %v1827_v45 = vpack.c.bf16 %v1820_v12, %v1819_v31 }
 0xbd1   :  { %v10933_v2 = vadd.f32 %v1799_v26, %v1567_v0  ;;  %v1802_v17 = vmul.f32 %v10877_v39, %v1793_v41  ;;  %v1818_v30 = vmul.f32 %v1793_v41, %v10787_v29  ;;  %v1792_v15 = vmax.f32 %v1778_v14, 0.0 }
 0xbd2   :  { %v1823_v47 = vadd.f32 %v1815_v9, %v10705_v62 }
 0xbd3   :  { %v10940_v44 = vadd.f32 %v1802_v17, %v1570_v3  ;;  %v1801_v46 = vmul.f32 %v10877_v39, %v1792_v15  ;;  %v1817_v16 = vmul.f32 %v1792_v15, %v10787_v29  ;;  %v1826_v21 = vadd.f32 %v1818_v30, %v10708_v25  ;;  %v10970_v29 = vld [vmem:[%s13382_s2 + $0x10] sm:$0xff]  }
 0xbd4   :  { %v1829_v37 = vpack.c.bf16 %v1824_v13, %v1823_v47 }
 0xbd5   :  { %v10947_v28 = vadd.f32 %v1801_v46, %v1569_v23  ;;  %v1825_v34 = vadd.f32 %v1817_v16, %v10711_v60 }
 0xbd7   :  { %v1830_v6 = vpack.c.bf16 %v1826_v21, %v1825_v34 }
 0xbd9   :  { %9196 = vmatprep.subr.bf16.mxu0 %v1830_v6 }
 0xbda   :  { %9197 = vmatpush3.bf16.msra.mxu0 %v1830_v6 }
 0xbdb   :  { %9198 = vmatprep.subr.bf16.mxu0 %v1829_v37 }
 0xbde   :  { %9199 = vmatpush3.bf16.msra.mxu0 %v1829_v37 }
 0xbdf   :  { %9200 = vmatprep.subr.bf16.mxu0 %v1828_v5 }
 0xbe2   :  { %9201 = vmatpush3.bf16.msra.mxu0 %v1828_v5 }
 0xbe3   :  { %9202 = vmatprep.subr.bf16.mxu0 %v1827_v45 }
 0xbe6   :  { %9203 = vmatpush3.bf16.msra.mxu0 %v1827_v45 }
 0xbe9   :  { %9205 = vmatmul.mubr.msk.bf16.vlgmr.msra.gmra.mxu0 %vm395_vm2, %v10963_v36 }
 0xbea   :  { %9208 = vmatprep.mubr.msk.bf16.mxu0 %vm395_vm2, %v10970_v29 }
 0xbf1   :  { %9209 = vmatmul.mubr.msk.bf16.gmra.mxu0 %vm395_vm2, %v10977_v22 }
 0xbf2   :  { %9240 = vmatprep.mubr.msk.bf16.mxu0 %vm395_vm2, %v10984_v42 }
 0xca9   :  { %v9206_v54 = vpop.f32.mrf.mxu0 }
 0xcab   :  { %v1865_v20 = vpop.f32.mrf.mxu0 }
 0xcac   :  { %9220 = vmatprep.mubr.msk.f32.mxu1 %vm214_vm1, %v1865_v20 }
 0xcad   :  { %v9207_v7 = vpop.f32.mrf.mxu0 }
 0xcaf   :  { %v1868_v10 = vpop.f32.mrf.mxu0 }
 0xcb0   :  { %9221 = vmatmul.mubr.msk.f32.vlgmr.msra.gmra.mxu1 %vm214_vm1, %v1868_v10 }
 0xcb1   :  { %v9210_v56 = vpop.f32.mrf.mxu0  ;;  %9223 = vmatprep.mubr.msk.f32.mxu1 %vm214_vm1, %v9206_v54  ;;  %9249 = vmatpush3.msra.mxu1 %v10844_v63 }
 0xcb2   :  { %9250 = vmatprep.subr.mxu1 %v10850_v38 }
 0xcb3   :  { %v1881_v19 = vpop.f32.mrf.mxu0  ;;  %9251 = vmatpush3.msra.mxu1 %v10850_v38 }
 0xcb4   :  { %9224 = vmatmul.mubr.msk.f32.gmra.mxu1 %vm214_vm1, %v9207_v7  ;;  %9252 = vmatprep.subr.mxu1 %v10858_v1  ;;  %v2049_v7 = vstv %s10763_s21 }
 0xcb5   :  { %v9211_v58 = vpop.f32.mrf.mxu0  ;;  %9226 = vmatprep.mubr.msk.f32.mxu1 %vm214_vm1, %v1881_v19  ;;  %9253 = vmatpush3.msra.mxu1 %v10858_v1 }
 0xcb6   :  { %9254 = vmatprep.subr.mxu1 %v11001_v11 }
 0xcb7   :  { %v1884_v61 = vpop.f32.mrf.mxu0  ;;  %9255 = vmatpush3.msra.mxu1 %v11001_v11 }
 0xcb8   :  { %9227 = vmatmul.mubr.msk.f32.gmra.mxu1 %vm214_vm1, %v1884_v61 }
 0xcb9   :  { %9229 = vmatprep.mubr.msk.f32.mxu1 %vm214_vm1, %v9210_v56 }
 0xcbc   :  { %9230 = vmatmul.mubr.msk.f32.gmra.mxu1 %vm214_vm1, %v9211_v58 }
 0xd70   :  { %v9222_v0 = vpop.f32.mrf.mxu1 }
 0xd71   :  { %v1992_v26 = vadd.f32 %v11011_v40, %v9222_v0 }
 0xd72   :  { %v1986_v41 = vpop.f32.mrf.mxu1 }
 0xd73   :  { %v2026_v14 = vmax.f32 %v1992_v26, 0.0  ;;  %v1987_v3 = vadd.f32 %v11011_v40, %v1986_v41 }
 0xd74   :  { %v9225_v9 = vpop.f32.mrf.mxu1 }
 0xd75   :  { %v2034_v17 = vmul.f32 %v2026_v14, %v10877_v39  ;;  %v2025_v30 = vmax.f32 %v1987_v3, 0.0  ;;  %v2002_v15 = vadd.f32 %v11011_v40, %v9225_v9 }
 0xd76   :  { %v1996_v23 = vpop.f32.mrf.mxu1 }
 0xd77   :  { %v11018_v24 = vadd.f32 %v2034_v17, %v10893_v50  ;;  %v2033_v46 = vmul.f32 %v2025_v30, %v10877_v39  ;;  %v2028_v16 = vmax.f32 %v2002_v15, 0.0  ;;  %v1997_v32 = vadd.f32 %v11011_v40, %v1996_v23 }
 0xd78   :  { %v9228_v47 = vpop.f32.mrf.mxu1 }
 0xd79   :  { %v11023_v21 = vadd.f32 %v2033_v46, %v10903_v35  ;;  %v2012_v34 = vadd.f32 %v11011_v40, %v9228_v47  ;;  %v2036_v33 = vmul.f32 %v2028_v16, %v10877_v39  ;;  %v2027_v13 = vmax.f32 %v1997_v32, 0.0 }
 0xd7a   :  { %v2006_v6 = vpop.f32.mrf.mxu1  ;;  %v2053_v15 = vmul.f32 %v2049_v7, %v2028_v16  ;;  %v2050_v32 = vmul.f32 %v2049_v7, %v2025_v30  ;;  %v2051_v47 = vmul.f32 %v2049_v7, %v2026_v14 }
 0xd7b   :  { %v2030_v8 = vmax.f32 %v2012_v34, 0.0  ;;  %v2007_v50 = vadd.f32 %v11011_v40, %v2006_v6  ;;  %v11029_v37 = vadd.f32 %v2036_v33, %v10914_v43  ;;  %v2035_v49 = vmul.f32 %v2027_v13, %v10877_v39  ;;  %v11081_v33 = vld [vmem:[%s13389_s9 + $0x18] sm:$0xff]  ;;  %v11095_v6 = vld [vmem:[%s13389_s9 + $0x8] sm:$0xff] }
 0xd7c   :  { %v9231_v53 = vpop.f32.mrf.mxu1  ;;  %v2052_v41 = vmul.f32 %v2049_v7, %v2027_v13  ;;  %v11088_v13 = vld [vmem:[%s13389_s9 + $0x10] sm:$0xff] }
 0xd7d   :  { %v2038_v57 = vmul.f32 %v2030_v8, %v10877_v39  ;;  %v2029_v35 = vmax.f32 %v2007_v50, 0.0  ;;  %v2022_v31 = vadd.f32 %v11011_v40, %v9231_v53  ;;  %v11035_v5 = vadd.f32 %v2035_v49, %v10922_v59 }
 0xd7e   :  { %v2016_v12 = vpop.f32.mrf.mxu1  ;;  %v2055_v59 = vmul.f32 %v2049_v7, %v2030_v8  ;;  %v11102_v8 = vld [vmem:[%s13389_s9] sm:$0xff] }
 0xd7f   :  { %v11038_v45 = vadd.f32 %v2038_v57, %v10928_v27  ;;  %v2037_v54 = vmul.f32 %v2029_v35, %v10877_v39  ;;  %v2032_v20 = vmax.f32 %v2022_v31, 0.0  ;;  %v2017_v43 = vadd.f32 %v11011_v40, %v2016_v12 }
 0xd80   :  { %v2054_v56 = vmul.f32 %v2049_v7, %v2029_v35  ;;  %v2063_v23 = vadd.f32 %v2055_v59, %v10715_v52 }
 0xd81   :  { %v11044_v10 = vadd.f32 %v2037_v54, %v10933_v2  ;;  %v2040_v19 = vmul.f32 %v2032_v20, %v10877_v39  ;;  %v2057_v58 = vmul.f32 %v2049_v7, %v2032_v20  ;;  %v2031_v61 = vmax.f32 %v2017_v43, 0.0 }
 0xd82   :  { %v2062_v3 = vadd.f32 %v2054_v56, %v10705_v62  ;;  %v2061_v62 = vadd.f32 %v2053_v15, %v10727_v51 }
 0xd83   :  { %v11048_v0 = vadd.f32 %v2040_v19, %v10940_v44  ;;  %v2039_v27 = vmul.f32 %v2031_v61, %v10877_v39  ;;  %v2056_v26 = vmul.f32 %v2049_v7, %v2031_v61  ;;  %v2065_v9 = vadd.f32 %v2057_v58, %v10708_v25 }
 0xd84   :  { %v2068_v44 = vpack.c.bf16 %v2063_v23, %v2062_v3  ;;  %v2060_v39 = vadd.f32 %v2052_v41, %v10721_v18  ;;  %v2058_v25 = vadd.f32 %v2050_v32, %v10730_v48 }
 0xd85   :  { %v11054_v2 = vadd.f32 %v2039_v27, %v10947_v28  ;;  %v2064_v17 = vadd.f32 %v2056_v26, %v10711_v60  ;;  %v2059_v60 = vadd.f32 %v2051_v47, %v10735_v4 }
 0xd86   :  { %v2067_v28 = vpack.c.bf16 %v2061_v62, %v2060_v39 }
 0xd87   :  { %v2069_v46 = vpack.c.bf16 %v2065_v9, %v2064_v17  ;;  %v2066_v16 = vpack.c.bf16 %v2059_v60, %v2058_v25 }
 0xd89   :  { %9232 = vmatprep.subr.bf16.mxu0 %v2069_v46 }
 0xd8a   :  { %9233 = vmatpush3.bf16.msra.mxu0 %v2069_v46 }
 0xd8b   :  { %9234 = vmatprep.subr.bf16.mxu0 %v2068_v44 }
 0xd8e   :  { %9235 = vmatpush3.bf16.msra.mxu0 %v2068_v44 }
 0xd8f   :  { %9236 = vmatprep.subr.bf16.mxu0 %v2067_v28 }
 0xd92   :  { %9237 = vmatpush3.bf16.msra.mxu0 %v2067_v28 }
 0xd93   :  { %9238 = vmatprep.subr.bf16.mxu0 %v2066_v16 }
 0xd96   :  { %9239 = vmatpush3.bf16.msra.mxu0 %v2066_v16 }
 0xd97   :  { %9268 = vmatprep.subr.mxu0 %v11081_v33 }
 0xd99   :  { %9241 = vmatmul.mubr.msk.bf16.vlgmr.msra.gmra.mxu0 %vm395_vm2, %v10963_v36 }
 0xd9a   :  { %9244 = vmatprep.mubr.msk.bf16.mxu0 %vm395_vm2, %v10970_v29  ;;  %9269 = vmatpush3.msra.mxu0 %v11081_v33 }
 0xd9b   :  { %9270 = vmatprep.subr.mxu0 %v11088_v13 }
 0xd9c   :  { %9271 = vmatpush3.msra.mxu0 %v11088_v13 }
 0xd9d   :  { %9272 = vmatprep.subr.mxu0 %v11095_v6 }
 0xd9e   :  { %9273 = vmatpush3.msra.mxu0 %v11095_v6 }
 0xd9f   :  { %9274 = vmatprep.subr.mxu0 %v11102_v8 }
 0xda0   :  { %9275 = vmatpush3.msra.mxu0 %v11102_v8 }
 0xda1   :  { %9245 = vmatmul.mubr.msk.bf16.gmra.mxu0 %vm395_vm2, %v10977_v22  ;;  %9304 = vmatprep.subr.mxu0 %v10844_v63 }
 0xe59   :  { %v9242_v52 = vpop.f32.mrf.mxu0 }
 0xe5b   :  { %v2104_v18 = vpop.f32.mrf.mxu0 }
 0xe5c   :  { %9256 = vmatprep.mubr.msk.f32.mxu1 %vm214_vm1, %v2104_v18 }
 0xe5d   :  { %v9243_v51 = vpop.f32.mrf.mxu0 }
 0xe5f   :  { %v2107_v48 = vpop.f32.mrf.mxu0 }
 0xe60   :  { %9257 = vmatmul.mubr.msk.f32.vlgmr.msra.gmra.mxu1 %vm214_vm1, %v2107_v48 }
 0xe61   :  { %v9246_v4 = vpop.f32.mrf.mxu0  ;;  %9259 = vmatprep.mubr.msk.f32.mxu1 %vm214_vm1, %v9242_v52 }
 0xe63   :  { %v2120_v14 = vpop.f32.mrf.mxu0 }
 0xe64   :  { %9260 = vmatmul.mubr.msk.f32.gmra.mxu1 %vm214_vm1, %v9243_v51 }
 0xe65   :  { %v9247_v30 = vpop.f32.mrf.mxu0  ;;  %9262 = vmatprep.mubr.msk.f32.mxu1 %vm214_vm1, %v2120_v14 }
 0xe67   :  { %v2123_v34 = vpop.f32.mrf.mxu0 }
 0xe68   :  { %9263 = vmatmul.mubr.msk.f32.gmra.mxu1 %vm214_vm1, %v2123_v34 }
 0xe69   :  { %9265 = vmatprep.mubr.msk.f32.mxu1 %vm214_vm1, %v9246_v4 }
 0xe6c   :  { %9266 = vmatmul.mubr.msk.f32.gmra.mxu1 %vm214_vm1, %v9247_v30 }
 0xe6d   :  { %9296 = vmatprep.mubr.msk.bf16.mxu1 %vm395_vm2, %v10984_v42 }
 0xf20   :  { %v9258_v50 = vpop.f32.mrf.mxu1 }
 0xf21   :  { %v2231_v49 = vadd.f32 %v11011_v40, %v9258_v50 }
 0xf22   :  { %v2225_v53 = vpop.f32.mrf.mxu1 }
 0xf23   :  { %v2265_v57 = vmax.f32 %v2231_v49, 0.0  ;;  %v2226_v35 = vadd.f32 %v11011_v40, %v2225_v53 }
 0xf24   :  { %v9261_v31 = vpop.f32.mrf.mxu1 }
 0xf25   :  { %v2264_v12 = vmax.f32 %v2226_v35, 0.0  ;;  %v2241_v54 = vadd.f32 %v11011_v40, %v9261_v31  ;;  %v2273_v20 = vmul.f32 %v2265_v57, %v10870_v55 }
 0xf26   :  { %v2235_v43 = vpop.f32.mrf.mxu1 }
 0xf27   :  { %v2272_v7 = vmul.f32 %v2264_v12, %v10870_v55  ;;  %v2267_v56 = vmax.f32 %v2241_v54, 0.0  ;;  %v2236_v19 = vadd.f32 %v11011_v40, %v2235_v43  ;;  %v11118_v26 = vadd.f32 %v2273_v20, %v11018_v24 }
 0xf28   :  { %v9264_v58 = vpop.f32.mrf.mxu1 }
 0xf29   :  { %v11114_v61 = vadd.f32 %v2272_v7, %v11023_v21  ;;  %v2266_v59 = vmax.f32 %v2236_v19, 0.0  ;;  %v2251_v27 = vadd.f32 %v11011_v40, %v9264_v58  ;;  %v2275_v41 = vmul.f32 %v2267_v56, %v10870_v55 }
 0xf2a   :  { %v2245_v3 = vpop.f32.mrf.mxu1 }
 0xf2b   :  { %v2274_v9 = vmul.f32 %v2266_v59, %v10870_v55  ;;  %v2269_v17 = vmax.f32 %v2251_v27, 0.0  ;;  %v2246_v15 = vadd.f32 %v11011_v40, %v2245_v3  ;;  %9276 = vmatprep.mubr.msk.f32.mxu0 %vm214_vm1, %v11114_v61  ;;  %v11133_v32 = vadd.f32 %v2275_v41, %v11029_v37 }
 0xf2c   :  { %v9267_v23 = vpop.f32.mrf.mxu1  ;;  %9277 = vmatmul.mubr.msk.f32.vlgmr.msra.gmra.mxu0 %vm214_vm1, %v11118_v26 }
 0xf2d   :  { %v11128_v21 = vadd.f32 %v2274_v9, %v11035_v5  ;;  %v2268_v24 = vmax.f32 %v2246_v15, 0.0  ;;  %v2261_v46 = vadd.f32 %v11011_v40, %v9267_v23  ;;  %9305 = vmatpush3.msra.mxu0 %v10844_v63  ;;  %v2277_v44 = vmul.f32 %v2269_v17, %v10870_v55 }
 0xf2e   :  { %v2255_v39 = vpop.f32.mrf.mxu1  ;;  %9306 = vmatprep.subr.mxu0 %v10850_v38 }
 0xf2f   :  { %v2276_v47 = vmul.f32 %v2268_v24, %v10870_v55  ;;  %v2271_v62 = vmax.f32 %v2261_v46, 0.0  ;;  %v2256_v25 = vadd.f32 %v11011_v40, %v2255_v39  ;;  %9279 = vmatprep.mubr.msk.f32.mxu0 %vm214_vm1, %v11128_v21  ;;  %9307 = vmatpush3.msra.mxu0 %v10850_v38  ;;  %v11151_v60 = vadd.f32 %v2277_v44, %v11038_v45 }
 0xf30   :  { %9280 = vmatmul.mubr.msk.f32.gmra.mxu0 %vm214_vm1, %v11133_v32  ;;  %9308 = vmatprep.subr.mxu0 %v10858_v1 }
 0xf31   :  { %v11146_v37 = vadd.f32 %v2276_v47, %v11044_v10  ;;  %v2279_v5 = vmul.f32 %v2271_v62, %v10870_v55  ;;  %v2270_v28 = vmax.f32 %v2256_v25, 0.0  ;;  %9309 = vmatpush3.msra.mxu0 %v10858_v1  ;;  %v11259_v47 = vstv %s2426_s17 }
 0xf32   :  { %9310 = vmatprep.subr.mxu0 %v11001_v11 }
 0xf33   :  { %v2278_v16 = vmul.f32 %v2270_v28, %v10870_v55  ;;  %9282 = vmatprep.mubr.msk.f32.mxu0 %vm214_vm1, %v11146_v37  ;;  %9311 = vmatpush3.msra.mxu0 %v11001_v11  ;;  %v11162_v10 = vadd.f32 %v2279_v5, %v11048_v0  ;;  %v2431_v52 = vpack.c.bf16 %v11151_v60, %v11146_v37 }
 0xf34   :  { %9283 = vmatmul.mubr.msk.f32.gmra.mxu0 %vm214_vm1, %v11151_v60  ;;  %9340 = vmatprep.subr.mxu0 %v10844_v63  ;;  %v2430_v0 = vpack.c.bf16 %v11133_v32, %v11128_v21 }
 0xf35   :  { %v11165_v45 = vadd.f32 %v2278_v16, %v11054_v2  ;;  %v2429_v2 = vpack.c.bf16 %v11118_v26, %v11114_v61 }
 0xf37   :  { %9285 = vmatprep.mubr.msk.f32.mxu0 %vm214_vm1, %v11165_v45  ;;  %v2432_v55 = vpack.c.bf16 %v11162_v10, %v11165_v45 }
 0xf38   :  { %9286 = vmatmul.mubr.msk.f32.gmra.mxu0 %vm214_vm1, %v11162_v10 }
 0xf39   :  { %9288 = vmatprep.subr.bf16.mxu1 %v2432_v55 }
 0xf3a   :  { %9289 = vmatpush3.bf16.msra.mxu1 %v2432_v55 }
 0xf3b   :  { %9290 = vmatprep.subr.bf16.mxu1 %v2431_v52 }
 0xf3e   :  { %9291 = vmatpush3.bf16.msra.mxu1 %v2431_v52 }
 0xf3f   :  { %9292 = vmatprep.subr.bf16.mxu1 %v2430_v0 }
 0xf42   :  { %9293 = vmatpush3.bf16.msra.mxu1 %v2430_v0 }
 0xf43   :  { %9294 = vmatprep.subr.bf16.mxu1 %v2429_v2 }
 0xf46   :  { %9295 = vmatpush3.bf16.msra.mxu1 %v2429_v2 }
 0xf49   :  { %9297 = vmatmul.mubr.msk.bf16.vlgmr.msra.gmra.mxu1 %vm395_vm2, %v10963_v36 }
 0xf4a   :  { %9300 = vmatprep.mubr.msk.bf16.mxu1 %vm395_vm2, %v10970_v29 }
 0xf51   :  { %9301 = vmatmul.mubr.msk.bf16.gmra.mxu1 %vm395_vm2, %v10977_v22 }
 0xf52   :  { %9332 = vmatprep.mubr.msk.bf16.mxu1 %vm395_vm2, %v10984_v42 }
 0xfec   :  { %v9278_v18 = vpop.f32.mrf.mxu0 }
 0xfed   :  { %2418 = vst.msk [vmem:[%s13390_s10 + $0x8] sm:$0xff] %vm65_vm0, %v9278_v18 }
 0xfee   :  { %v2378_v51 = vpop.f32.mrf.mxu0 }
 0xfef   :  { %2417 = vst.msk [vmem:[%s13390_s10] sm:$0xff] %vm65_vm0, %v2378_v51 }
 0xff0   :  { %v9281_v48 = vpop.f32.mrf.mxu0 }
 0xff1   :  { %2420 = vst.msk [vmem:[%s13390_s10 + $0x18] sm:$0xff] %vm65_vm0, %v9281_v48 }
 0xff2   :  { %v2388_v4 = vpop.f32.mrf.mxu0 }
 0xff3   :  { %2419 = vst.msk [vmem:[%s13390_s10 + $0x10] sm:$0xff] %vm65_vm0, %v2388_v4 }
 0xff4   :  { %v9284_v14 = vpop.f32.mrf.mxu0 }
 0xff5   :  { %2422 = vst.msk [vmem:[%s13390_s10 + $0x28] sm:$0xff] %vm65_vm0, %v9284_v14 }
 0xff6   :  { %v2398_v30 = vpop.f32.mrf.mxu0 }
 0xff7   :  { %2421 = vst.msk [vmem:[%s13390_s10 + $0x20] sm:$0xff] %vm65_vm0, %v2398_v30 }
 0xff8   :  { %v9287_v34 = vpop.f32.mrf.mxu0 }
 0xff9   :  { %2424 = vst.msk [vmem:[%s13390_s10 + $0x38] sm:$0xff] %vm65_vm0, %v9287_v34 }
 0xffa   :  { %v2408_v50 = vpop.f32.mrf.mxu0 }
 0xffb   :  { %2423 = vst.msk [vmem:[%s13390_s10 + $0x30] sm:$0xff] %vm65_vm0, %v2408_v50 }
0x1009   :  { %v9298_v49 = vpop.f32.mrf.mxu1 }
0x100b   :  { %v2467_v53 = vpop.f32.mrf.mxu1 }
0x100c   :  { %9312 = vmatprep.mubr.msk.f32.mxu0 %vm214_vm1, %v2467_v53 }
0x100d   :  { %v9299_v57 = vpop.f32.mrf.mxu1 }
0x100f   :  { %v2470_v35 = vpop.f32.mrf.mxu1 }
0x1010   :  { %9313 = vmatmul.mubr.msk.f32.vlgmr.msra.gmra.mxu0 %vm214_vm1, %v2470_v35 }
0x1011   :  { %v9302_v31 = vpop.f32.mrf.mxu1  ;;  %9315 = vmatprep.mubr.msk.f32.mxu0 %vm214_vm1, %v9298_v49  ;;  %9341 = vmatpush3.msra.mxu0 %v10844_v63 }
0x1012   :  { %9342 = vmatprep.subr.mxu0 %v10850_v38 }
0x1013   :  { %v2483_v12 = vpop.f32.mrf.mxu1  ;;  %9343 = vmatpush3.msra.mxu0 %v10850_v38 }
0x1014   :  { %9316 = vmatmul.mubr.msk.f32.gmra.mxu0 %vm214_vm1, %v9299_v57  ;;  %9344 = vmatprep.subr.mxu0 %v10858_v1 }
0x1015   :  { %v9303_v54 = vpop.f32.mrf.mxu1  ;;  %9318 = vmatprep.mubr.msk.f32.mxu0 %vm214_vm1, %v2483_v12  ;;  %9345 = vmatpush3.msra.mxu0 %v10858_v1 }
0x1016   :  { %9346 = vmatprep.subr.mxu0 %v11001_v11 }
0x1017   :  { %v2486_v20 = vpop.f32.mrf.mxu1  ;;  %9347 = vmatpush3.msra.mxu0 %v11001_v11 }
0x1018   :  { %9319 = vmatmul.mubr.msk.f32.gmra.mxu0 %vm214_vm1, %v2486_v20  ;;  %9376 = vmatprep.subr.mxu0 %v10844_v63 }
0x1019   :  { %9321 = vmatprep.mubr.msk.f32.mxu0 %vm214_vm1, %v9302_v31 }
0x101c   :  { %9322 = vmatmul.mubr.msk.f32.gmra.mxu0 %vm214_vm1, %v9303_v54 }
0x10d0   :  { %v9314_v43 = vpop.f32.mrf.mxu0 }
0x10d1   :  { %v11273_v55 = vadd.f32 %v11011_v40, %v9314_v43 }
0x10d2   :  { %v2588_v7 = vpop.f32.mrf.mxu0 }
0x10d3   :  { %v11262_v62 = vadd.f32 %v11011_v40, %v2588_v7  ;;  %v2628_v30 = vmax.f32 %v11273_v55, 0.0 }
0x10d4   :  { %v9317_v56 = vpop.f32.mrf.mxu0 }
0x10d5   :  { %v11252_v24 = vadd.f32 %v11011_v40, %v9317_v56  ;;  %v2627_v18 = vmax.f32 %v11262_v62, 0.0  ;;  %v2654_v31 = vmul.f32 %v11259_v47, %v2628_v30 }
0x10d6   :  { %v2598_v19 = vpop.f32.mrf.mxu0 }
0x10d7   :  { %v11248_v17 = vadd.f32 %v11011_v40, %v2598_v19  ;;  %v2630_v52 = vmax.f32 %v11252_v24, 0.0  ;;  %v2653_v53 = vmul.f32 %v11259_v47, %v2627_v18  ;;  %v2662_v43 = vadd.f32 %v2654_v31, %v11118_v26 }
0x10d8   :  { %v9320_v58 = vpop.f32.mrf.mxu0 }
0x10d9   :  { %v11241_v41 = vadd.f32 %v11011_v40, %v9320_v58  ;;  %v2629_v25 = vmax.f32 %v11248_v17, 0.0  ;;  %v2656_v34 = vmul.f32 %v11259_v47, %v2630_v52  ;;  %v2661_v54 = vadd.f32 %v2653_v53, %v11114_v61 }
0x10da   :  { %v2608_v59 = vpop.f32.mrf.mxu0 }
0x10db   :  { %v11238_v27 = vadd.f32 %v11011_v40, %v2608_v59  ;;  %v2632_v46 = vmax.f32 %v11241_v41, 0.0  ;;  %v2655_v51 = vmul.f32 %v11259_v47, %v2629_v25  ;;  %v2664_v12 = vadd.f32 %v2656_v34, %v11133_v32 }
0x10dc   :  { %v9323_v3 = vpop.f32.mrf.mxu0  ;;  %v2669_v7 = vpack.c.bf16 %v2662_v43, %v2661_v54 }
0x10dd   :  { %v11245_v9 = vadd.f32 %v11011_v40, %v9323_v3  ;;  %v2631_v15 = vmax.f32 %v11238_v27, 0.0  ;;  %v2658_v0 = vmul.f32 %v11259_v47, %v2632_v46  ;;  %v2663_v35 = vadd.f32 %v2655_v51, %v11128_v21 }
0x10de   :  { %v2618_v23 = vpop.f32.mrf.mxu0 }
0x10df   :  { %v2634_v44 = vmax.f32 %v11245_v9, 0.0  ;;  %v11257_v39 = vadd.f32 %v11011_v40, %v2618_v23  ;;  %v2657_v5 = vmul.f32 %v11259_v47, %v2631_v15  ;;  %v2666_v50 = vadd.f32 %v2658_v0, %v11151_v60 }
0x10e0   :  { %v2670_v20 = vpack.c.bf16 %v2664_v12, %v2663_v35  ;;  %v11332_v0 = vstv %s2428_s19 }
0x10e1   :  { %v2660_v28 = vmul.f32 %v11259_v47, %v2634_v44  ;;  %v2633_v16 = vmax.f32 %v11257_v39, 0.0  ;;  %v2665_v48 = vadd.f32 %v2657_v5, %v11146_v37 }
0x10e3   :  { %v2659_v2 = vmul.f32 %v11259_v47, %v2633_v16  ;;  %v2668_v4 = vadd.f32 %v2660_v28, %v11162_v10  ;;  %v2671_v57 = vpack.c.bf16 %v2666_v50, %v2665_v48 }
0x10e5   :  { %v2667_v14 = vadd.f32 %v2659_v2, %v11165_v45 }
0x10e7   :  { %v2672_v49 = vpack.c.bf16 %v2668_v4, %v2667_v14 }
0x10e9   :  { %9324 = vmatprep.subr.bf16.mxu1 %v2672_v49 }
0x10ea   :  { %9325 = vmatpush3.bf16.msra.mxu1 %v2672_v49 }
0x10eb   :  { %9326 = vmatprep.subr.bf16.mxu1 %v2671_v57 }
0x10ee   :  { %9327 = vmatpush3.bf16.msra.mxu1 %v2671_v57 }
0x10ef   :  { %9328 = vmatprep.subr.bf16.mxu1 %v2670_v20 }
0x10f2   :  { %9329 = vmatpush3.bf16.msra.mxu1 %v2670_v20 }
0x10f3   :  { %9330 = vmatprep.subr.bf16.mxu1 %v2669_v7 }
0x10f6   :  { %9331 = vmatpush3.bf16.msra.mxu1 %v2669_v7 }
0x10f9   :  { %9333 = vmatmul.mubr.msk.bf16.vlgmr.msra.gmra.mxu1 %vm395_vm2, %v10963_v36 }
0x10fa   :  { %9336 = vmatprep.mubr.msk.bf16.mxu1 %vm395_vm2, %v10970_v29 }
0x1101   :  { %9337 = vmatmul.mubr.msk.bf16.gmra.mxu1 %vm395_vm2, %v10977_v22 }
0x1102   :  { %9368 = vmatprep.mubr.msk.bf16.mxu1 %vm395_vm2, %v10984_v42 }
0x11b9   :  { %v9334_v56 = vpop.f32.mrf.mxu1 }
0x11bb   :  { %v2707_v19 = vpop.f32.mrf.mxu1 }
0x11bc   :  { %9348 = vmatprep.mubr.msk.f32.mxu0 %vm214_vm1, %v2707_v19 }
0x11bd   :  { %v9335_v58 = vpop.f32.mrf.mxu1 }
0x11bf   :  { %v2710_v59 = vpop.f32.mrf.mxu1 }
0x11c0   :  { %9349 = vmatmul.mubr.msk.f32.vlgmr.msra.gmra.mxu0 %vm214_vm1, %v2710_v59 }
0x11c1   :  { %v9338_v3 = vpop.f32.mrf.mxu1  ;;  %9351 = vmatprep.mubr.msk.f32.mxu0 %vm214_vm1, %v9334_v56  ;;  %9377 = vmatpush3.msra.mxu0 %v10844_v63 }
0x11c2   :  { %9378 = vmatprep.subr.mxu0 %v10850_v38 }
0x11c3   :  { %v2723_v23 = vpop.f32.mrf.mxu1  ;;  %9379 = vmatpush3.msra.mxu0 %v10850_v38  ;;  %v11325_v38 = vstv %s2427_s18 }
0x11c4   :  { %9352 = vmatmul.mubr.msk.f32.gmra.mxu0 %vm214_vm1, %v9335_v58  ;;  %9380 = vmatprep.subr.mxu0 %v10858_v1  ;;  %v2636_v51 = vmul.f32 %v11325_v38, %v2627_v18  ;;  %v2639_v49 = vmul.f32 %v11325_v38, %v2630_v52  ;;  %v2638_v31 = vmul.f32 %v11325_v38, %v2629_v25 }
0x11c5   :  { %v9339_v62 = vpop.f32.mrf.mxu1  ;;  %9354 = vmatprep.mubr.msk.f32.mxu0 %vm214_vm1, %v2723_v23  ;;  %9381 = vmatpush3.msra.mxu0 %v10858_v1  ;;  %v2637_v1 = vmul.f32 %v11325_v38, %v2628_v30  ;;  %v2641_v12 = vmul.f32 %v11325_v38, %v2632_v46  ;;  %v2640_v41 = vmul.f32 %v11325_v38, %v2631_v15 }
0x11c6   :  { %9382 = vmatprep.subr.mxu0 %v11001_v11  ;;  %v2644_v18 = vadd.f32 %v2636_v51, %v11114_v61  ;;  %v2647_v7 = vadd.f32 %v2639_v49, %v11133_v32  ;;  %v2646_v58 = vadd.f32 %v2638_v31, %v11128_v21 }
0x11c7   :  { %v2726_v5 = vpop.f32.mrf.mxu1  ;;  %9383 = vmatpush3.msra.mxu0 %v11001_v11  ;;  %v2645_v14 = vadd.f32 %v2637_v1, %v11118_v26  ;;  %v2649_v59 = vadd.f32 %v2641_v12, %v11151_v60  ;;  %v2648_v51 = vadd.f32 %v2640_v41, %v11146_v37 }
0x11c8   :  { %9355 = vmatmul.mubr.msk.f32.gmra.mxu0 %vm214_vm1, %v2726_v5  ;;  %9412 = vmatprep.subr.mxu0 %v10844_v63  ;;  %v2643_v5 = vmul.f32 %v11325_v38, %v2634_v44 }
0x11c9   :  { %9357 = vmatprep.mubr.msk.f32.mxu0 %vm214_vm1, %v9338_v3 }
0x11cc   :  { %9358 = vmatmul.mubr.msk.f32.gmra.mxu0 %vm214_vm1, %v9339_v62 }
0x1280   :  { %v9350_v28 = vpop.f32.mrf.mxu0 }
0x1281   :  { %v11330_v55 = vadd.f32 %v11011_v40, %v9350_v28 }
0x1282   :  { %v2828_v2 = vpop.f32.mrf.mxu0 }
0x1283   :  { %v2868_v63 = vmax.f32 %v11330_v55, 0.0  ;;  %v2829_v48 = vadd.f32 %v11011_v40, %v2828_v2 }
0x1284   :  { %v9353_v4 = vpop.f32.mrf.mxu0 }
0x1285   :  { %v2877_v34 = vmul.f32 %v11332_v0, %v2868_v63  ;;  %v2867_v30 = vmax.f32 %v2829_v48, 0.0  ;;  %v2844_v50 = vadd.f32 %v11011_v40, %v9353_v4  ;;  %v2642_v48 = vmul.f32 %v11325_v38, %v2633_v16 }
0x1286   :  { %v2838_v53 = vpop.f32.mrf.mxu0 }
0x1287   :  { %v11346_v57 = vadd.f32 %v2877_v34, %v2645_v14  ;;  %v2876_v35 = vmul.f32 %v11332_v0, %v2867_v30  ;;  %v2870_v54 = vmax.f32 %v2844_v50, 0.0  ;;  %v2839_v24 = vadd.f32 %v11011_v40, %v2838_v53 }
0x1288   :  { %v9356_v20 = vpop.f32.mrf.mxu0  ;;  %v2651_v34 = vadd.f32 %v2643_v5, %v11162_v10  ;;  %v2650_v16 = vadd.f32 %v2642_v48, %v11165_v45 }
0x1289   :  { %v11356_v52 = vadd.f32 %v2876_v35, %v2644_v18  ;;  %v2854_v43 = vadd.f32 %v11011_v40, %v9356_v20  ;;  %v2879_v56 = vmul.f32 %v11332_v0, %v2870_v54  ;;  %v2869_v19 = vmax.f32 %v2839_v24, 0.0 }
0x128a   :  { %v2848_v17 = vpop.f32.mrf.mxu0  ;;  %v2895_v41 = vmul.f32 %v2870_v54, %v11259_v47 }
0x128b   :  { %v2872_v25 = vmax.f32 %v2854_v43, 0.0  ;;  %v2849_v46 = vadd.f32 %v11011_v40, %v2848_v17  ;;  %v11367_v3 = vadd.f32 %v2879_v56, %v2647_v7  ;;  %v2878_v23 = vmul.f32 %v11332_v0, %v2869_v19 }
0x128c   :  { %v9359_v62 = vpop.f32.mrf.mxu0  ;;  %v2894_v20 = vmul.f32 %v2869_v19, %v11259_v47  ;;  %v2893_v19 = vmul.f32 %v2868_v63, %v11259_v47 }
0x128d   :  { %v2881_v27 = vmul.f32 %v11332_v0, %v2872_v25  ;;  %v2871_v28 = vmax.f32 %v2849_v46, 0.0  ;;  %v2864_v15 = vadd.f32 %v11011_v40, %v9359_v62  ;;  %v11375_v1 = vadd.f32 %v2878_v23, %v2646_v58 }
0x128e   :  { %v2858_v2 = vpop.f32.mrf.mxu0  ;;  %v2897_v35 = vmul.f32 %v2872_v25, %v11259_v47  ;;  %v2892_v58 = vmul.f32 %v2867_v30, %v11259_v47  ;;  %v2902_v23 = vadd.f32 %v2894_v20, %v11128_v21  ;;  %v2903_v62 = vadd.f32 %v2895_v41, %v11133_v32 }
0x128f   :  { %v11381_v4 = vadd.f32 %v2881_v27, %v2649_v59  ;;  %v2880_v9 = vmul.f32 %v11332_v0, %v2871_v28  ;;  %v2874_v14 = vmax.f32 %v2864_v15, 0.0  ;;  %v2859_v44 = vadd.f32 %v11011_v40, %v2858_v2  ;;  %v11427_v2 = vld [vmem:[%s13387_s7 + $0x18] sm:$0xff] }
0x1290   :  { %v2896_v49 = vmul.f32 %v2871_v28, %v11259_v47  ;;  %v2905_v25 = vadd.f32 %v2897_v35, %v11151_v60  ;;  %v2900_v5 = vadd.f32 %v2892_v58, %v11114_v61  ;;  %v2909_v54 = vpack.c.bf16 %v2903_v62, %v2902_v23 }
0x1291   :  { %v11386_v50 = vadd.f32 %v2880_v9, %v2648_v51  ;;  %v2883_v53 = vmul.f32 %v11332_v0, %v2874_v14  ;;  %v2899_v18 = vmul.f32 %v2874_v14, %v11259_v47  ;;  %v2873_v39 = vmax.f32 %v2859_v44, 0.0  ;;  %v11441_v51 = vld [vmem:[%s13387_s7 + $0x8] sm:$0xff] }
0x1292   :  { %v2904_v43 = vadd.f32 %v2896_v49, %v11146_v37  ;;  %v2901_v27 = vadd.f32 %v2893_v19, %v11118_v26 }
0x1293   :  { %v11393_v31 = vadd.f32 %v2883_v53, %v2651_v34  ;;  %v2882_v12 = vmul.f32 %v11332_v0, %v2873_v39  ;;  %v2898_v24 = vmul.f32 %v2873_v39, %v11259_v47  ;;  %v2907_v7 = vadd.f32 %v2899_v18, %v11162_v10 }
0x1294   :  { %v2910_v59 = vpack.c.bf16 %v2905_v25, %v2904_v43  ;;  %v2908_v30 = vpack.c.bf16 %v2901_v27, %v2900_v5 }
0x1295   :  { %v11400_v56 = vadd.f32 %v2882_v12, %v2650_v16  ;;  %v2906_v17 = vadd.f32 %v2898_v24, %v11165_v45 }
0x1297   :  { %v2911_v46 = vpack.c.bf16 %v2907_v7, %v2906_v17 }
0x1299   :  { %9360 = vmatprep.subr.bf16.mxu1 %v2911_v46 }
0x129a   :  { %9361 = vmatpush3.bf16.msra.mxu1 %v2911_v46 }
0x129b   :  { %9362 = vmatprep.subr.bf16.mxu1 %v2910_v59 }
0x129e   :  { %9363 = vmatpush3.bf16.msra.mxu1 %v2910_v59 }
0x129f   :  { %9364 = vmatprep.subr.bf16.mxu1 %v2909_v54 }
0x12a2   :  { %9365 = vmatpush3.bf16.msra.mxu1 %v2909_v54 }
0x12a3   :  { %9366 = vmatprep.subr.bf16.mxu1 %v2908_v30 }
0x12a6   :  { %9367 = vmatpush3.bf16.msra.mxu1 %v2908_v30 }
0x12a9   :  { %9369 = vmatmul.mubr.msk.bf16.vlgmr.msra.gmra.mxu1 %vm395_vm2, %v10963_v36 }
0x12aa   :  { %9372 = vmatprep.mubr.msk.bf16.mxu1 %vm395_vm2, %v10970_v29 }
0x12b1   :  { %9373 = vmatmul.mubr.msk.bf16.gmra.mxu1 %vm395_vm2, %v10977_v22  ;;  %v11433_v22 = vld [vmem:[%s13387_s7 + $0x10] sm:$0xff] }
0x12b2   :  { %9404 = vmatprep.mubr.msk.bf16.mxu1 %vm395_vm2, %v10984_v42 }
0x1369   :  { %v9370_v47 = vpop.f32.mrf.mxu1 }
0x136b   :  { %v2946_v55 = vpop.f32.mrf.mxu1 }
0x136c   :  { %9384 = vmatprep.mubr.msk.f32.mxu0 %vm214_vm1, %v2946_v55 }
0x136d   :  { %v9371_v63 = vpop.f32.mrf.mxu1 }
0x136f   :  { %v2949_v28 = vpop.f32.mrf.mxu1 }
0x1370   :  { %9385 = vmatmul.mubr.msk.f32.vlgmr.msra.gmra.mxu0 %vm214_vm1, %v2949_v28  ;;  %v3130_v28 = vstv %s11235_s16  ;;  %s12558_s16 = sld [smem:[#allocation2 + $0x5]] }
0x1371   :  { %v9374_v15 = vpop.f32.mrf.mxu1  ;;  %9387 = vmatprep.mubr.msk.f32.mxu0 %vm214_vm1, %v9370_v47  ;;  %9413 = vmatpush3.msra.mxu0 %v11427_v2 }
0x1372   :  { %9414 = vmatprep.subr.mxu0 %v11433_v22 }
0x1373   :  { %v2962_v42 = vpop.f32.mrf.mxu1  ;;  %9415 = vmatpush3.msra.mxu0 %v11433_v22 }
0x1374   :  { %9388 = vmatmul.mubr.msk.f32.gmra.mxu0 %vm214_vm1, %v9371_v63  ;;  %9416 = vmatprep.subr.mxu0 %v11441_v51 }
0x1375   :  { %v9375_v48 = vpop.f32.mrf.mxu1  ;;  %9390 = vmatprep.mubr.msk.f32.mxu0 %vm214_vm1, %v2962_v42  ;;  %9417 = vmatpush3.msra.mxu0 %v11441_v51 }
0x1376   :  { %9418 = vmatprep.subr.mxu0 %v11001_v11  ;;  %s5672_s17 = smul.f32 0.5, %s12558_s16 }
0x1377   :  { %v2965_v9 = vpop.f32.mrf.mxu1  ;;  %9419 = vmatpush3.msra.mxu0 %v11001_v11  ;;  %s5673_s4 = smul.f32 0.16666667, %s12558_s16 }
0x1378   :  { %9391 = vmatmul.mubr.msk.f32.gmra.mxu0 %vm214_vm1, %v2965_v9  ;;  %s5674_s5 = smul.f32 0.33333334, %s12558_s16 }
0x1379   :  { %9393 = vmatprep.mubr.msk.f32.mxu0 %vm214_vm1, %v9374_v15 }
0x137c   :  { %9394 = vmatmul.mubr.msk.f32.gmra.mxu0 %vm214_vm1, %v9375_v48 }
0x1430   :  { %v9386_v14 = vpop.f32.mrf.mxu0 }
0x1431   :  { %v3073_v44 = vadd.f32 %v11011_v40, %v9386_v14 }
0x1432   :  { %v3067_v34 = vpop.f32.mrf.mxu0 }
0x1433   :  { %v3107_v49 = vmax.f32 %v3073_v44, 0.0  ;;  %v3068_v53 = vadd.f32 %v11011_v40, %v3067_v34 }
0x1434   :  { %v9389_v18 = vpop.f32.mrf.mxu0 }
0x1435   :  { %v3115_v39 = vmul.f32 %v3107_v49, %v11332_v0  ;;  %v3106_v16 = vmax.f32 %v3068_v53, 0.0  ;;  %v3083_v35 = vadd.f32 %v11011_v40, %v9389_v18 }
0x1436   :  { %v3077_v11 = vpop.f32.mrf.mxu0 }
0x1437   :  { %v11456_v12 = vadd.f32 %v3115_v39, %v11346_v57  ;;  %v3114_v24 = vmul.f32 %v3106_v16, %v11332_v0  ;;  %v3109_v20 = vmax.f32 %v3083_v35, 0.0  ;;  %v3078_v43 = vadd.f32 %v11011_v40, %v3077_v11 }
0x1438   :  { %v9392_v7 = vpop.f32.mrf.mxu0 }
0x1439   :  { %v11461_v17 = vadd.f32 %v3114_v24, %v11356_v52  ;;  %v3093_v41 = vadd.f32 %v11011_v40, %v9392_v7  ;;  %v3117_v25 = vmul.f32 %v3109_v20, %v11332_v0  ;;  %v3108_v46 = vmax.f32 %v3078_v43, 0.0 }
0x143a   :  { %v3087_v58 = vpop.f32.mrf.mxu0  ;;  %v3134_v11 = vmul.f32 %v3130_v28, %v3109_v20  ;;  %v3131_v7 = vmul.f32 %v3130_v28, %v3106_v16 }
0x143b   :  { %v3111_v59 = vmax.f32 %v3093_v41, 0.0  ;;  %v3088_v57 = vadd.f32 %v11011_v40, %v3087_v58  ;;  %v11467_v23 = vadd.f32 %v3117_v25, %v11367_v3  ;;  %v3116_v19 = vmul.f32 %v3108_v46, %v11332_v0 }
0x143c   :  { %v9395_v62 = vpop.f32.mrf.mxu0  ;;  %v3133_v53 = vmul.f32 %v3130_v28, %v3108_v46  ;;  %v3132_v41 = vmul.f32 %v3130_v28, %v3107_v49  ;;  %v11539_v46 = vld [vmem:[%s13388_s8] ss:$0 sm:$0xff] }
0x143d   :  { %v3119_v5 = vmul.f32 %v3111_v59, %v11332_v0  ;;  %v3110_v52 = vmax.f32 %v3088_v57, 0.0  ;;  %v3103_v54 = vadd.f32 %v11011_v40, %v9395_v62  ;;  %v11473_v27 = vadd.f32 %v3116_v19, %v11375_v1 }
0x143e   :  { %v3097_v30 = vpop.f32.mrf.mxu0  ;;  %v3136_v1 = vmul.f32 %v3130_v28, %v3111_v59 }
0x143f   :  { %v11476_v47 = vadd.f32 %v3119_v5, %v11381_v4  ;;  %v3118_v55 = vmul.f32 %v3110_v52, %v11332_v0  ;;  %v3113_v63 = vmax.f32 %v3103_v54, 0.0  ;;  %v3098_v3 = vadd.f32 %v11011_v40, %v3097_v30 }
0x1440   :  { %v3135_v42 = vmul.f32 %v3130_v28, %v3110_v52  ;;  %v3144_v24 = vadd.f32 %v3136_v1, %v11151_v60 }
0x1441   :  { %v11482_v15 = vadd.f32 %v3118_v55, %v11386_v50  ;;  %v3121_v48 = vmul.f32 %v3113_v63, %v11332_v0  ;;  %v3138_v9 = vmul.f32 %v3130_v28, %v3113_v63  ;;  %v3112_v14 = vmax.f32 %v3098_v3, 0.0 }
0x1442   :  { %v3143_v18 = vadd.f32 %v3135_v42, %v11146_v37  ;;  %v3142_v37 = vadd.f32 %v3134_v11, %v11133_v32  ;;  %v11531_v32 = vld [vmem:[%s13382_s2] sm:$0xff]  }
0x1443   :  { %v11486_v44 = vadd.f32 %v3121_v48, %v11393_v31  ;;  %v3120_v4 = vmul.f32 %v3112_v14, %v11332_v0  ;;  %v3137_v34 = vmul.f32 %v3130_v28, %v3112_v14  ;;  %v3146_v39 = vadd.f32 %v3138_v9, %v11162_v10 }
0x1444   :  { %v3149_v31 = vpack.c.bf16 %v3144_v24, %v3143_v18  ;;  %v3141_v0 = vadd.f32 %v3133_v53, %v11128_v21  ;;  %v3139_v10 = vadd.f32 %v3131_v7, %v11114_v61 }
0x1445   :  { %v11492_v50 = vadd.f32 %v3120_v4, %v11400_v56  ;;  %v3145_v35 = vadd.f32 %v3137_v34, %v11165_v45  ;;  %v3140_v45 = vadd.f32 %v3132_v41, %v11118_v26 }
0x1446   :  { %v3148_v56 = vpack.c.bf16 %v3142_v37, %v3141_v0  ;;  %v11620_v37 = vld [vmem:[%s13382_s2 + $0x8] sm:$0xff]  }
0x1447   :  { %v3150_v43 = vpack.c.bf16 %v3146_v39, %v3145_v35  ;;  %v3147_v20 = vpack.c.bf16 %v3140_v45, %v3139_v10  ;;  %v11627_v10 = vld [vmem:[%s13382_s2 + $0x10] sm:$0xff]  }
0x1449   :  { %9396 = vmatprep.subr.bf16.mxu1 %v3150_v43 }
0x144a   :  { %9397 = vmatpush3.bf16.msra.mxu1 %v3150_v43 }
0x144b   :  { %9398 = vmatprep.subr.bf16.mxu1 %v3149_v31 }
0x144e   :  { %9399 = vmatpush3.bf16.msra.mxu1 %v3149_v31  ;;  %v11589_v31 = vld [vmem:[%s13387_s7] sm:$0xff] }
0x144f   :  { %9400 = vmatprep.subr.bf16.mxu1 %v3148_v56 }
0x1452   :  { %9401 = vmatpush3.bf16.msra.mxu1 %v3148_v56 }
0x1453   :  { %9402 = vmatprep.subr.bf16.mxu1 %v3147_v20 }
0x1456   :  { %9403 = vmatpush3.bf16.msra.mxu1 %v3147_v20 }
0x1457   :  { %9432 = vmatprep.subr.mxu1 %v11081_v33 }
0x1459   :  { %9405 = vmatmul.mubr.msk.bf16.vlgmr.msra.gmra.mxu1 %vm395_vm2, %v10963_v36  ;;  %v11515_v36 = vld [vmem:[%s13382_s2 + $0x18] sm:$0xff]  }
0x145a   :  { %9408 = vmatprep.mubr.msk.bf16.mxu1 %vm395_vm2, %v10970_v29  ;;  %9433 = vmatpush3.msra.mxu1 %v11081_v33 }
0x145b   :  { %9434 = vmatprep.subr.mxu1 %v11088_v13 }
0x145c   :  { %9435 = vmatpush3.msra.mxu1 %v11088_v13 }
0x145d   :  { %9436 = vmatprep.subr.mxu1 %v11095_v6 }
0x145e   :  { %9437 = vmatpush3.msra.mxu1 %v11095_v6 }
0x145f   :  { %9438 = vmatprep.subr.mxu1 %v11102_v8 }
0x1460   :  { %9439 = vmatpush3.msra.mxu1 %v11102_v8 }
0x1461   :  { %9409 = vmatmul.mubr.msk.bf16.gmra.mxu1 %vm395_vm2, %v11515_v36  ;;  %9468 = vmatprep.subr.mxu1 %v11427_v2 }
0x1519   :  { %v9406_v29 = vpop.f32.mrf.mxu1 }
0x151b   :  { %v3185_v33 = vpop.f32.mrf.mxu1 }
0x151c   :  { %9420 = vmatprep.mubr.msk.f32.mxu0 %vm214_vm1, %v3185_v33 }
0x151d   :  { %v9407_v13 = vpop.f32.mrf.mxu1 }
0x151f   :  { %v3188_v6 = vpop.f32.mrf.mxu1 }
0x1520   :  { %9421 = vmatmul.mubr.msk.f32.vlgmr.msra.gmra.mxu0 %vm214_vm1, %v3188_v6 }
0x1521   :  { %v9410_v61 = vpop.f32.mrf.mxu1  ;;  %9423 = vmatprep.mubr.msk.f32.mxu0 %vm214_vm1, %v9406_v29 }
0x1523   :  { %v3201_v8 = vpop.f32.mrf.mxu1 }
0x1524   :  { %9424 = vmatmul.mubr.msk.f32.gmra.mxu0 %vm214_vm1, %v9407_v13 }
0x1525   :  { %v9411_v26 = vpop.f32.mrf.mxu1  ;;  %9426 = vmatprep.mubr.msk.f32.mxu0 %vm214_vm1, %v3201_v8 }
0x1527   :  { %v3204_v21 = vpop.f32.mrf.mxu1 }
0x1528   :  { %9427 = vmatmul.mubr.msk.f32.gmra.mxu0 %vm214_vm1, %v3204_v21 }
0x1529   :  { %9429 = vmatprep.mubr.msk.f32.mxu0 %vm214_vm1, %v9410_v61 }
0x152c   :  { %9430 = vmatmul.mubr.msk.f32.gmra.mxu0 %vm214_vm1, %v9411_v26 }
0x152d   :  { %9460 = vmatprep.mubr.msk.bf16.mxu0 %vm395_vm2, %v11531_v32 }
0x15e0   :  { %v9422_v60 = vpop.f32.mrf.mxu0 }
0x15e1   :  { %v3312_v49 = vadd.f32 %v11011_v40, %v9422_v60 }
0x15e2   :  { %v3306_v16 = vpop.f32.mrf.mxu0 }
0x15e3   :  { %v3346_v25 = vmax.f32 %v3312_v49, 0.0  ;;  %v3307_v58 = vadd.f32 %v11539_v46, %v3306_v16 }
0x15e4   :  { %v9425_v59 = vpop.f32.mrf.mxu0 }
0x15e5   :  { %v3345_v57 = vmax.f32 %v3307_v58, 0.0  ;;  %v3322_v19 = vadd.f32 %v11539_v46, %v9425_v59  ;;  %v3354_v62 = vmul.f32 %v3346_v25, %v11325_v38 }
0x15e6   :  { %v3316_v5 = vpop.f32.mrf.mxu0 }
0x15e7   :  { %v3353_v52 = vmul.f32 %v3345_v57, %v11325_v38  ;;  %v3348_v54 = vmax.f32 %v3322_v19, 0.0  ;;  %v3317_v40 = vadd.f32 %v11539_v46, %v3316_v5  ;;  %v11551_v28 = vadd.f32 %v3354_v62, %v11456_v12 }
0x15e8   :  { %v9428_v30 = vpop.f32.mrf.mxu0 }
0x15e9   :  { %v11547_v55 = vadd.f32 %v3353_v52, %v11461_v17  ;;  %v3347_v63 = vmax.f32 %v3317_v40, 0.0  ;;  %v3332_v3 = vadd.f32 %v11539_v46, %v9428_v30  ;;  %v3356_v42 = vmul.f32 %v3348_v54, %v11325_v38 }
0x15ea   :  { %v3326_v48 = vpop.f32.mrf.mxu0 }
0x15eb   :  { %v3355_v9 = vmul.f32 %v3347_v63, %v11325_v38  ;;  %v3350_v14 = vmax.f32 %v3332_v3, 0.0  ;;  %v3327_v1 = vadd.f32 %v11539_v46, %v3326_v48  ;;  %9440 = vmatprep.mubr.msk.f32.mxu1 %vm214_vm1, %v11547_v55  ;;  %v11566_v53 = vadd.f32 %v3356_v42, %v11467_v23 }
0x15ec   :  { %v9431_v4 = vpop.f32.mrf.mxu0  ;;  %9441 = vmatmul.mubr.msk.f32.vlgmr.msra.gmra.mxu1 %vm214_vm1, %v11551_v28 }
0x15ed   :  { %v11561_v17 = vadd.f32 %v3355_v9, %v11473_v27  ;;  %v3349_v12 = vmax.f32 %v3327_v1, 0.0  ;;  %v3342_v34 = vadd.f32 %v11539_v46, %v9431_v4  ;;  %9469 = vmatpush3.msra.mxu1 %v11427_v2  ;;  %v3358_v18 = vmul.f32 %v3350_v14, %v11325_v38 }
0x15ee   :  { %v3336_v39 = vpop.f32.mrf.mxu0  ;;  %9470 = vmatprep.subr.mxu1 %v11433_v22 }
0x15ef   :  { %v3357_v35 = vmul.f32 %v3349_v12, %v11325_v38  ;;  %v3352_v11 = vmax.f32 %v3342_v34, 0.0  ;;  %v3337_v24 = vadd.f32 %v11539_v46, %v3336_v39  ;;  %9443 = vmatprep.mubr.msk.f32.mxu1 %vm214_vm1, %v11561_v17  ;;  %9471 = vmatpush3.msra.mxu1 %v11433_v22  ;;  %v11584_v7 = vadd.f32 %v3358_v18, %v11476_v47 }
0x15f0   :  { %9444 = vmatmul.mubr.msk.f32.gmra.mxu1 %vm214_vm1, %v11566_v53  ;;  %9472 = vmatprep.subr.mxu1 %v11441_v51  ;;  %v11707_v12 = vstv %s3508_s25 }
0x15f1   :  { %v11579_v23 = vadd.f32 %v3357_v35, %v11482_v15  ;;  %v3360_v27 = vmul.f32 %v3352_v11, %v11325_v38  ;;  %v3351_v43 = vmax.f32 %v3337_v24, 0.0  ;;  %9473 = vmatpush3.msra.mxu1 %v11441_v51 }
0x15f2   :  { %9474 = vmatprep.subr.mxu1 %v11589_v31 }
0x15f3   :  { %v3359_v0 = vmul.f32 %v3351_v43, %v11325_v38  ;;  %9446 = vmatprep.mubr.msk.f32.mxu1 %vm214_vm1, %v11579_v23  ;;  %9475 = vmatpush3.msra.mxu1 %v11589_v31  ;;  %v11600_v47 = vadd.f32 %v3360_v27, %v11486_v44  ;;  %v3513_v41 = vpack.c.bf16 %v11584_v7, %v11579_v23 }
0x15f4   :  { %9447 = vmatmul.mubr.msk.f32.gmra.mxu1 %vm214_vm1, %v11584_v7  ;;  %9504 = vmatprep.subr.mxu1 %v11427_v2  ;;  %v3512_v44 = vpack.c.bf16 %v11566_v53, %v11561_v17 }
0x15f5   :  { %v11603_v15 = vadd.f32 %v3359_v0, %v11492_v50  ;;  %v3511_v50 = vpack.c.bf16 %v11551_v28, %v11547_v55 }
0x15f7   :  { %9449 = vmatprep.mubr.msk.f32.mxu1 %vm214_vm1, %v11603_v15  ;;  %v3514_v38 = vpack.c.bf16 %v11600_v47, %v11603_v15 }
0x15f8   :  { %9450 = vmatmul.mubr.msk.f32.gmra.mxu1 %vm214_vm1, %v11600_v47 }
0x15f9   :  { %9452 = vmatprep.subr.bf16.mxu0 %v3514_v38 }
0x15fa   :  { %9453 = vmatpush3.bf16.msra.mxu0 %v3514_v38 }
0x15fb   :  { %9454 = vmatprep.subr.bf16.mxu0 %v3513_v41 }
0x15fe   :  { %9455 = vmatpush3.bf16.msra.mxu0 %v3513_v41 }
0x15ff   :  { %9456 = vmatprep.subr.bf16.mxu0 %v3512_v44 }
0x1602   :  { %9457 = vmatpush3.bf16.msra.mxu0 %v3512_v44 }
0x1603   :  { %9458 = vmatprep.subr.bf16.mxu0 %v3511_v50 }
0x1606   :  { %9459 = vmatpush3.bf16.msra.mxu0 %v3511_v50 }
0x1609   :  { %9461 = vmatmul.mubr.msk.bf16.vlgmr.msra.gmra.mxu0 %vm395_vm2, %v11620_v37 }
0x160a   :  { %9464 = vmatprep.mubr.msk.bf16.mxu0 %vm395_vm2, %v11627_v10 }
0x1611   :  { %9465 = vmatmul.mubr.msk.bf16.gmra.mxu0 %vm395_vm2, %v11515_v36 }
0x1612   :  { %9496 = vmatprep.mubr.msk.bf16.mxu0 %vm395_vm2, %v11531_v32 }
0x16ac   :  { %v9442_v56 = vpop.f32.mrf.mxu1 }
0x16ad   :  { %8026 = vst.msk [vmem:[%s13390_s10 + $0x48] sm:$0xff] %vm65_vm0, %v9442_v56 }
0x16ae   :  { %v3459_v45 = vpop.f32.mrf.mxu1 }
0x16af   :  { %8025 = vst.msk [vmem:[%s13390_s10 + $0x40] sm:$0xff] %vm65_vm0, %v3459_v45 }
0x16b0   :  { %v9445_v20 = vpop.f32.mrf.mxu1 }
0x16b1   :  { %8028 = vst.msk [vmem:[%s13390_s10 + $0x58] sm:$0xff] %vm65_vm0, %v9445_v20 }
0x16b2   :  { %v3469_v29 = vpop.f32.mrf.mxu1 }
0x16b3   :  { %8027 = vst.msk [vmem:[%s13390_s10 + $0x50] sm:$0xff] %vm65_vm0, %v3469_v29 }
0x16b4   :  { %v9448_v33 = vpop.f32.mrf.mxu1 }
0x16b5   :  { %8030 = vst.msk [vmem:[%s13390_s10 + $0x68] sm:$0xff] %vm65_vm0, %v9448_v33 }
0x16b6   :  { %v3479_v13 = vpop.f32.mrf.mxu1 }
0x16b7   :  { %8029 = vst.msk [vmem:[%s13390_s10 + $0x60] sm:$0xff] %vm65_vm0, %v3479_v13 }
0x16b8   :  { %v9451_v6 = vpop.f32.mrf.mxu1 }
0x16b9   :  { %8032 = vst.msk [vmem:[%s13390_s10 + $0x78] sm:$0xff] %vm65_vm0, %v9451_v6 }
0x16ba   :  { %v3489_v61 = vpop.f32.mrf.mxu1 }
0x16bb   :  { %8031 = vst.msk [vmem:[%s13390_s10 + $0x70] sm:$0xff] %vm65_vm0, %v3489_v61 }
0x16c9   :  { %v9462_v8 = vpop.f32.mrf.mxu0 }
0x16cb   :  { %v3549_v26 = vpop.f32.mrf.mxu0 }
0x16cc   :  { %9476 = vmatprep.mubr.msk.f32.mxu1 %vm214_vm1, %v3549_v26 }
0x16cd   :  { %v9463_v21 = vpop.f32.mrf.mxu0 }
0x16cf   :  { %v3552_v60 = vpop.f32.mrf.mxu0 }
0x16d0   :  { %9477 = vmatmul.mubr.msk.f32.vlgmr.msra.gmra.mxu1 %vm214_vm1, %v3552_v60 }
0x16d1   :  { %v9466_v49 = vpop.f32.mrf.mxu0  ;;  %9479 = vmatprep.mubr.msk.f32.mxu1 %vm214_vm1, %v9462_v8  ;;  %9505 = vmatpush3.msra.mxu1 %v11427_v2 }
0x16d2   :  { %9506 = vmatprep.subr.mxu1 %v11433_v22 }
0x16d3   :  { %v3565_v16 = vpop.f32.mrf.mxu0  ;;  %9507 = vmatpush3.msra.mxu1 %v11433_v22 }
0x16d4   :  { %9480 = vmatmul.mubr.msk.f32.gmra.mxu1 %vm214_vm1, %v9463_v21  ;;  %9508 = vmatprep.subr.mxu1 %v11441_v51 }
0x16d5   :  { %v9467_v25 = vpop.f32.mrf.mxu0  ;;  %9482 = vmatprep.mubr.msk.f32.mxu1 %vm214_vm1, %v3565_v16  ;;  %9509 = vmatpush3.msra.mxu1 %v11441_v51 }
0x16d6   :  { %9510 = vmatprep.subr.mxu1 %v11589_v31 }
0x16d7   :  { %v3568_v58 = vpop.f32.mrf.mxu0  ;;  %9511 = vmatpush3.msra.mxu1 %v11589_v31 }
0x16d8   :  { %9483 = vmatmul.mubr.msk.f32.gmra.mxu1 %vm214_vm1, %v3568_v58  ;;  %9540 = vmatprep.subr.mxu1 %v11427_v2 }
0x16d9   :  { %9485 = vmatprep.mubr.msk.f32.mxu1 %vm214_vm1, %v9466_v49 }
0x16dc   :  { %9486 = vmatmul.mubr.msk.f32.gmra.mxu1 %vm214_vm1, %v9467_v25 }
0x1790   :  { %v9478_v59 = vpop.f32.mrf.mxu1 }
0x1791   :  { %v11721_v24 = vadd.f32 %v11539_v46, %v9478_v59 }
0x1792   :  { %v3670_v57 = vpop.f32.mrf.mxu1 }
0x1793   :  { %v11710_v34 = vadd.f32 %v11539_v46, %v3670_v57  ;;  %v3710_v45 = vmax.f32 %v11721_v24, 0.0 }
0x1794   :  { %v9481_v19 = vpop.f32.mrf.mxu1 }
0x1795   :  { %v11700_v9 = vadd.f32 %v11539_v46, %v9481_v19  ;;  %v3709_v38 = vmax.f32 %v11710_v34, 0.0  ;;  %v3736_v8 = vmul.f32 %v11707_v12, %v3710_v45 }
0x1796   :  { %v3680_v62 = vpop.f32.mrf.mxu1 }
0x1797   :  { %v11696_v3 = vadd.f32 %v11539_v46, %v3680_v62  ;;  %v3712_v27 = vmax.f32 %v11700_v9, 0.0  ;;  %v3735_v13 = vmul.f32 %v11707_v12, %v3709_v38  ;;  %v3744_v49 = vadd.f32 %v3736_v8, %v11551_v28 }
0x1798   :  { %v9484_v5 = vpop.f32.mrf.mxu1 }
0x1799   :  { %v11689_v40 = vadd.f32 %v11539_v46, %v9484_v5  ;;  %v3711_v18 = vmax.f32 %v11696_v3, 0.0  ;;  %v3738_v20 = vmul.f32 %v11707_v12, %v3712_v27  ;;  %v3743_v21 = vadd.f32 %v3735_v13, %v11547_v55 }
0x179a   :  { %v3690_v52 = vpop.f32.mrf.mxu1 }
0x179b   :  { %v11686_v54 = vadd.f32 %v11539_v46, %v3690_v52  ;;  %v3714_v14 = vmax.f32 %v11689_v40, 0.0  ;;  %v3737_v41 = vmul.f32 %v11707_v12, %v3711_v18  ;;  %v3746_v26 = vadd.f32 %v3738_v20, %v11566_v53 }
0x179c   :  { %v9487_v30 = vpop.f32.mrf.mxu1  ;;  %v3751_v16 = vpack.c.bf16 %v3744_v49, %v3743_v21 }
0x179d   :  { %v11693_v63 = vadd.f32 %v11539_v46, %v9487_v30  ;;  %v3713_v42 = vmax.f32 %v11686_v54, 0.0  ;;  %v3740_v43 = vmul.f32 %v11707_v12, %v3714_v14  ;;  %v3745_v61 = vadd.f32 %v3737_v41, %v11561_v17 }
0x179e   :  { %v3700_v48 = vpop.f32.mrf.mxu1  ;;  %v11773_v30 = vstv %s3509_s26 }
0x179f   :  { %v3716_v1 = vmax.f32 %v11693_v63, 0.0  ;;  %v11705_v4 = vadd.f32 %v11539_v46, %v3700_v48  ;;  %v3739_v39 = vmul.f32 %v11707_v12, %v3713_v42  ;;  %v3748_v29 = vadd.f32 %v3740_v43, %v11584_v7 }
0x17a0   :  { %v3752_v60 = vpack.c.bf16 %v3746_v26, %v3745_v61  ;;  %v3719_v34 = vmul.f32 %v11773_v30, %v3710_v45  ;;  %v3718_v43 = vmul.f32 %v11773_v30, %v3709_v38  ;;  %v3720_v61 = vmul.f32 %v11773_v30, %v3711_v18 }
0x17a1   :  { %v3742_v35 = vmul.f32 %v11707_v12, %v3716_v1  ;;  %v3715_v11 = vmax.f32 %v11705_v4, 0.0  ;;  %v3747_v44 = vadd.f32 %v3739_v39, %v11579_v23  ;;  %v3723_v8 = vmul.f32 %v11773_v30, %v3714_v14 }
0x17a2   :  { %v3726_v38 = vadd.f32 %v3718_v43, %v11547_v55  ;;  %v3722_v40 = vmul.f32 %v11773_v30, %v3713_v42 }
0x17a3   :  { %v3741_v0 = vmul.f32 %v11707_v12, %v3715_v11  ;;  %v3750_v50 = vadd.f32 %v3742_v35, %v11600_v47  ;;  %v3753_v6 = vpack.c.bf16 %v3748_v29, %v3747_v44  ;;  %v11780_v35 = vstv %s3510_s3 }
0x17a4   :  { %v3721_v29 = vmul.f32 %v11773_v30, %v3712_v27  ;;  %v3724_v43 = vmul.f32 %v11773_v30, %v3715_v11 }
0x17a5   :  { %v3749_v56 = vadd.f32 %v3741_v0, %v11603_v15 }
0x17a6   :  { %v3729_v49 = vadd.f32 %v3721_v29, %v11566_v53  ;;  %v3732_v11 = vadd.f32 %v3724_v43, %v11603_v15 }
0x17a7   :  { %v3754_v33 = vpack.c.bf16 %v3750_v50, %v3749_v56  ;;  %v3727_v50 = vadd.f32 %v3719_v34, %v11551_v28 }
0x17a9   :  { %9488 = vmatprep.subr.bf16.mxu0 %v3754_v33 }
0x17aa   :  { %9489 = vmatpush3.bf16.msra.mxu0 %v3754_v33 }
0x17ab   :  { %9490 = vmatprep.subr.bf16.mxu0 %v3753_v6 }
0x17ae   :  { %9491 = vmatpush3.bf16.msra.mxu0 %v3753_v6 }
0x17af   :  { %9492 = vmatprep.subr.bf16.mxu0 %v3752_v60 }
0x17b2   :  { %9493 = vmatpush3.bf16.msra.mxu0 %v3752_v60 }
0x17b3   :  { %9494 = vmatprep.subr.bf16.mxu0 %v3751_v16 }
0x17b6   :  { %9495 = vmatpush3.bf16.msra.mxu0 %v3751_v16 }
0x17b9   :  { %9497 = vmatmul.mubr.msk.bf16.vlgmr.msra.gmra.mxu0 %vm395_vm2, %v11620_v37 }
0x17ba   :  { %9500 = vmatprep.mubr.msk.bf16.mxu0 %vm395_vm2, %v11627_v10 }
0x17c1   :  { %9501 = vmatmul.mubr.msk.bf16.gmra.mxu0 %vm395_vm2, %v11515_v36 }
0x17c2   :  { %9532 = vmatprep.mubr.msk.bf16.mxu0 %vm395_vm2, %v11531_v32 }
0x1879   :  { %v9498_v25 = vpop.f32.mrf.mxu0 }
0x187b   :  { %v3789_v58 = vpop.f32.mrf.mxu0 }
0x187c   :  { %9512 = vmatprep.mubr.msk.f32.mxu1 %vm214_vm1, %v3789_v58  ;;  %v3728_v58 = vadd.f32 %v3720_v61, %v11561_v17 }
0x187d   :  { %v9499_v59 = vpop.f32.mrf.mxu0 }
0x187f   :  { %v3792_v57 = vpop.f32.mrf.mxu0 }
0x1880   :  { %9513 = vmatmul.mubr.msk.f32.vlgmr.msra.gmra.mxu1 %vm214_vm1, %v3792_v57 }
0x1881   :  { %v9502_v19 = vpop.f32.mrf.mxu0  ;;  %9515 = vmatprep.mubr.msk.f32.mxu1 %vm214_vm1, %v9498_v25  ;;  %9541 = vmatpush3.msra.mxu1 %v11427_v2 }
0x1882   :  { %9542 = vmatprep.subr.mxu1 %v11433_v22 }
0x1883   :  { %v3805_v62 = vpop.f32.mrf.mxu0  ;;  %9543 = vmatpush3.msra.mxu1 %v11433_v22 }
0x1884   :  { %9516 = vmatmul.mubr.msk.f32.gmra.mxu1 %vm214_vm1, %v9499_v59  ;;  %9544 = vmatprep.subr.mxu1 %v11441_v51  ;;  %v3731_v59 = vadd.f32 %v3723_v8, %v11584_v7 }
0x1885   :  { %v9503_v5 = vpop.f32.mrf.mxu0  ;;  %9518 = vmatprep.mubr.msk.f32.mxu1 %vm214_vm1, %v3805_v62  ;;  %9545 = vmatpush3.msra.mxu1 %v11441_v51 }
0x1886   :  { %9546 = vmatprep.subr.mxu1 %v11589_v31 }
0x1887   :  { %v3808_v52 = vpop.f32.mrf.mxu0  ;;  %9547 = vmatpush3.msra.mxu1 %v11589_v31 }
0x1888   :  { %9519 = vmatmul.mubr.msk.f32.gmra.mxu1 %vm214_vm1, %v3808_v52  ;;  %9576 = vmatprep.subr.mxu1 %v11427_v2 }
0x1889   :  { %9521 = vmatprep.mubr.msk.f32.mxu1 %vm214_vm1, %v9502_v19 }
0x188c   :  { %9522 = vmatmul.mubr.msk.f32.gmra.mxu1 %vm214_vm1, %v9503_v5  ;;  %v3725_v5 = vmul.f32 %v11773_v30, %v3716_v1 }
0x1940   :  { %v9514_v48 = vpop.f32.mrf.mxu1 }
0x1941   :  { %v11778_v39 = vadd.f32 %v11539_v46, %v9514_v48 }
0x1942   :  { %v3910_v24 = vpop.f32.mrf.mxu1 }
0x1943   :  { %v3950_v0 = vmax.f32 %v11778_v39, 0.0  ;;  %v3911_v41 = vadd.f32 %v11539_v46, %v3910_v24  ;;  %v3730_v24 = vadd.f32 %v3722_v40, %v11579_v23 }
0x1944   :  { %v9517_v44 = vpop.f32.mrf.mxu1 }
0x1945   :  { %v3959_v56 = vmul.f32 %v11780_v35, %v3950_v0  ;;  %v3949_v45 = vmax.f32 %v3911_v41, 0.0  ;;  %v3926_v20 = vadd.f32 %v11539_v46, %v9517_v44 }
0x1946   :  { %v3920_v33 = vpop.f32.mrf.mxu1 }
0x1947   :  { %v11794_v13 = vadd.f32 %v3959_v56, %v3727_v50  ;;  %v3958_v6 = vmul.f32 %v11780_v35, %v3949_v45  ;;  %v3952_v26 = vmax.f32 %v3926_v20, 0.0  ;;  %v3921_v9 = vadd.f32 %v11539_v46, %v3920_v33 }
0x1948   :  { %v9520_v21 = vpop.f32.mrf.mxu1  ;;  %v3733_v50 = vadd.f32 %v3725_v5, %v11600_v47 }
0x1949   :  { %v11804_v27 = vadd.f32 %v3958_v6, %v3726_v38  ;;  %v3936_v60 = vadd.f32 %v11539_v46, %v9520_v21  ;;  %v3961_v16 = vmul.f32 %v11780_v35, %v3952_v26  ;;  %v3951_v25 = vmax.f32 %v3921_v9, 0.0 }
0x194a   :  { %v3930_v3 = vpop.f32.mrf.mxu1 }
0x194b   :  { %v3954_v18 = vmax.f32 %v3936_v60, 0.0  ;;  %v3931_v14 = vadd.f32 %v11539_v46, %v3930_v3  ;;  %v11815_v57 = vadd.f32 %v3961_v16, %v3729_v49  ;;  %v3960_v19 = vmul.f32 %v11780_v35, %v3951_v25 }
0x194c   :  { %v9523_v62 = vpop.f32.mrf.mxu1  ;;  %v3976_v9 = vmul.f32 %v3951_v25, %v11707_v12  ;;  %v3977_v3 = vmul.f32 %v3952_v26, %v11707_v12  ;;  %v3975_v25 = vmul.f32 %v3950_v0, %v11707_v12 }
0x194d   :  { %v3963_v54 = vmul.f32 %v11780_v35, %v3954_v18  ;;  %v3953_v52 = vmax.f32 %v3931_v14, 0.0  ;;  %v3946_v42 = vadd.f32 %v11539_v46, %v9523_v62  ;;  %v11823_v48 = vadd.f32 %v3960_v19, %v3728_v58 }
0x194e   :  { %v3940_v34 = vpop.f32.mrf.mxu1  ;;  %v3979_v38 = vmul.f32 %v3954_v18, %v11707_v12  ;;  %v3974_v14 = vmul.f32 %v3949_v45, %v11707_v12  ;;  %v3985_v19 = vadd.f32 %v3977_v3, %v11566_v53  ;;  %v3983_v5 = vadd.f32 %v3975_v25, %v11551_v28 }
0x194f   :  { %v11829_v41 = vadd.f32 %v3963_v54, %v3731_v59  ;;  %v3962_v63 = vmul.f32 %v11780_v35, %v3953_v52  ;;  %v3956_v44 = vmax.f32 %v3946_v42, 0.0  ;;  %v3941_v1 = vadd.f32 %v11539_v46, %v3940_v34 }
0x1950   :  { %v3978_v20 = vmul.f32 %v3953_v52, %v11707_v12  ;;  %v3987_v40 = vadd.f32 %v3979_v38, %v11584_v7  ;;  %v3984_v59 = vadd.f32 %v3976_v9, %v11561_v17  ;;  %v3982_v62 = vadd.f32 %v3974_v14, %v11547_v55 }
0x1951   :  { %v11834_v56 = vadd.f32 %v3962_v63, %v3730_v24  ;;  %v3965_v29 = vmul.f32 %v11780_v35, %v3956_v44  ;;  %v3981_v33 = vmul.f32 %v3956_v44, %v11707_v12  ;;  %v3955_v4 = vmax.f32 %v3941_v1, 0.0 }
0x1952   :  { %v3986_v21 = vadd.f32 %v3978_v20, %v11579_v23  ;;  %v3991_v26 = vpack.c.bf16 %v3985_v19, %v3984_v59  ;;  %v3990_v45 = vpack.c.bf16 %v3983_v5, %v3982_v62 }
0x1953   :  { %v11841_v6 = vadd.f32 %v3965_v29, %v3733_v50  ;;  %v3964_v61 = vmul.f32 %v11780_v35, %v3955_v4  ;;  %v3980_v8 = vmul.f32 %v3955_v4, %v11707_v12  ;;  %v3989_v60 = vadd.f32 %v3981_v33, %v11600_v47 }
0x1954   :  { %v3992_v58 = vpack.c.bf16 %v3987_v40, %v3986_v21 }
0x1955   :  { %v11848_v49 = vadd.f32 %v3964_v61, %v3732_v11  ;;  %v3988_v16 = vadd.f32 %v3980_v8, %v11603_v15 }
0x1957   :  { %v3993_v18 = vpack.c.bf16 %v3989_v60, %v3988_v16 }
0x1959   :  { %9524 = vmatprep.subr.bf16.mxu0 %v3993_v18 }
0x195a   :  { %9525 = vmatpush3.bf16.msra.mxu0 %v3993_v18 }
0x195b   :  { %9526 = vmatprep.subr.bf16.mxu0 %v3992_v58 }
0x195e   :  { %9527 = vmatpush3.bf16.msra.mxu0 %v3992_v58 }
0x195f   :  { %9528 = vmatprep.subr.bf16.mxu0 %v3991_v26 }
0x1962   :  { %9529 = vmatpush3.bf16.msra.mxu0 %v3991_v26 }
0x1963   :  { %9530 = vmatprep.subr.bf16.mxu0 %v3990_v45 }
0x1966   :  { %9531 = vmatpush3.bf16.msra.mxu0 %v3990_v45 }
0x1969   :  { %9533 = vmatmul.mubr.msk.bf16.vlgmr.msra.gmra.mxu0 %vm395_vm2, %v11620_v37 }
0x196a   :  { %9536 = vmatprep.mubr.msk.bf16.mxu0 %vm395_vm2, %v11627_v10 }
0x1971   :  { %9537 = vmatmul.mubr.msk.bf16.gmra.mxu0 %vm395_vm2, %v11515_v36 }
0x1972   :  { %9568 = vmatprep.mubr.msk.bf16.mxu0 %vm395_vm2, %v11531_v32 }
0x1a29   :  { %v9534_v12 = vpop.f32.mrf.mxu0 }
0x1a2b   :  { %v4028_v39 = vpop.f32.mrf.mxu0 }
0x1a2c   :  { %9548 = vmatprep.mubr.msk.f32.mxu1 %vm214_vm1, %v4028_v39 }
0x1a2d   :  { %v9535_v0 = vpop.f32.mrf.mxu0 }
0x1a2f   :  { %v4031_v54 = vpop.f32.mrf.mxu0 }
0x1a30   :  { %9549 = vmatmul.mubr.msk.f32.vlgmr.msra.gmra.mxu1 %vm214_vm1, %v4031_v54 }
0x1a31   :  { %v9538_v52 = vpop.f32.mrf.mxu0  ;;  %9551 = vmatprep.mubr.msk.f32.mxu1 %vm214_vm1, %v9534_v12  ;;  %9577 = vmatpush3.msra.mxu1 %v11427_v2  ;;  %v4212_v12 = vstv %s11683_s24 }
0x1a32   :  { %9578 = vmatprep.subr.mxu1 %v11433_v22 }
0x1a33   :  { %v4044_v42 = vpop.f32.mrf.mxu0  ;;  %9579 = vmatpush3.msra.mxu1 %v11433_v22 }
0x1a34   :  { %9552 = vmatmul.mubr.msk.f32.gmra.mxu1 %vm214_vm1, %v9535_v0  ;;  %9580 = vmatprep.subr.mxu1 %v11441_v51 }
0x1a35   :  { %v9539_v34 = vpop.f32.mrf.mxu0  ;;  %9554 = vmatprep.mubr.msk.f32.mxu1 %vm214_vm1, %v4044_v42  ;;  %9581 = vmatpush3.msra.mxu1 %v11441_v51 }
0x1a36   :  { %9582 = vmatprep.subr.mxu1 %v11589_v31 }
0x1a37   :  { %v4047_v24 = vpop.f32.mrf.mxu0  ;;  %9583 = vmatpush3.msra.mxu1 %v11589_v31 }
0x1a38   :  { %9555 = vmatmul.mubr.msk.f32.gmra.mxu1 %vm214_vm1, %v4047_v24 }
0x1a39   :  { %9557 = vmatprep.mubr.msk.f32.mxu1 %vm214_vm1, %v9538_v52 }
0x1a3c   :  { %9558 = vmatmul.mubr.msk.f32.gmra.mxu1 %vm214_vm1, %v9539_v34 }
0x1af0   :  { %v9550_v22 = vpop.f32.mrf.mxu1 }
0x1af1   :  { %v4155_v43 = vadd.f32 %v11539_v46, %v9550_v22 }
0x1af2   :  { %v4149_v63 = vpop.f32.mrf.mxu1 }
0x1af3   :  { %v4189_v44 = vmax.f32 %v4155_v43, 0.0  ;;  %v4150_v1 = vadd.f32 %v11539_v46, %v4149_v63 }
0x1af4   :  { %v9553_v50 = vpop.f32.mrf.mxu1 }
0x1af5   :  { %v4197_v51 = vmul.f32 %v4189_v44, %v11780_v35  ;;  %v4188_v20 = vmax.f32 %v4150_v1, 0.0  ;;  %v4165_v29 = vadd.f32 %v11539_v46, %v9553_v50 }
0x1af6   :  { %v4159_v33 = vpop.f32.mrf.mxu1 }
0x1af7   :  { %v11889_v4 = vadd.f32 %v4197_v51, %v11794_v13  ;;  %v4196_v11 = vmul.f32 %v4188_v20, %v11780_v35  ;;  %v4191_v38 = vmax.f32 %v4165_v29, 0.0  ;;  %v4160_v61 = vadd.f32 %v11539_v46, %v4159_v33 }
0x1af8   :  { %v9556_v8 = vpop.f32.mrf.mxu1  ;;  %v4213_v33 = vmul.f32 %v4212_v12, %v4188_v20 }
0x1af9   :  { %v11894_v9 = vadd.f32 %v4196_v11, %v11804_v27  ;;  %v4175_v21 = vadd.f32 %v11539_v46, %v9556_v8  ;;  %v4199_v60 = vmul.f32 %v4191_v38, %v11780_v35  ;;  %v4190_v16 = vmax.f32 %v4160_v61, 0.0 }
0x1afa   :  { %v4169_v3 = vpop.f32.mrf.mxu1  ;;  %v4216_v50 = vmul.f32 %v4212_v12, %v4191_v38  ;;  %v4214_v11 = vmul.f32 %v4212_v12, %v4189_v44 }
0x1afb   :  { %v4193_v40 = vmax.f32 %v4175_v21, 0.0  ;;  %v4170_v13 = vadd.f32 %v11539_v46, %v4169_v3  ;;  %v11900_v18 = vadd.f32 %v4199_v60, %v11815_v57  ;;  %v4198_v14 = vmul.f32 %v4190_v16, %v11780_v35 }
0x1afc   :  { %v9559_v58 = vpop.f32.mrf.mxu1  ;;  %v4215_v22 = vmul.f32 %v4212_v12, %v4190_v16 }
0x1afd   :  { %v4201_v59 = vmul.f32 %v4193_v40, %v11780_v35  ;;  %v4192_v27 = vmax.f32 %v4170_v13, 0.0  ;;  %v4185_v25 = vadd.f32 %v11539_v46, %v9559_v58  ;;  %v11906_v19 = vadd.f32 %v4198_v14, %v11823_v48 }
0x1afe   :  { %v4179_v62 = vpop.f32.mrf.mxu1  ;;  %v4218_v48 = vmul.f32 %v4212_v12, %v4193_v40 }
0x1aff   :  { %v11909_v26 = vadd.f32 %v4201_v59, %v11829_v41  ;;  %v4200_v5 = vmul.f32 %v4192_v27, %v11780_v35  ;;  %v4195_v45 = vmax.f32 %v4185_v25, 0.0  ;;  %v4180_v57 = vadd.f32 %v11539_v46, %v4179_v62 }
0x1b00   :  { %v4217_v0 = vmul.f32 %v4212_v12, %v4192_v27  ;;  %v4226_v51 = vadd.f32 %v4218_v48, %v11584_v7 }
0x1b01   :  { %v11915_v39 = vadd.f32 %v4200_v5, %v11834_v56  ;;  %v4203_v54 = vmul.f32 %v4195_v45, %v11780_v35  ;;  %v4220_v52 = vmul.f32 %v4212_v12, %v4195_v45  ;;  %v4194_v42 = vmax.f32 %v4180_v57, 0.0 }
0x1b02   :  { %v4225_v43 = vadd.f32 %v4217_v0, %v11579_v23  ;;  %v4224_v23 = vadd.f32 %v4216_v50, %v11566_v53  ;;  %v11961_v53 = vld [vmem:[%s13389_s9] sm:$0xff]  ;;  %v12005_v50 = vld [vmem:[%s13387_s7 + $0x18] sm:$0xff] }
0x1b03   :  { %v11919_v34 = vadd.f32 %v4203_v54, %v11841_v6  ;;  %v4202_v41 = vmul.f32 %v4194_v42, %v11780_v35  ;;  %v4219_v24 = vmul.f32 %v4212_v12, %v4194_v42  ;;  %v4228_v63 = vadd.f32 %v4220_v52, %v11600_v47 }
0x1b04   :  { %v4231_v6 = vpack.c.bf16 %v4226_v51, %v4225_v43  ;;  %v4223_v35 = vadd.f32 %v4215_v22, %v11561_v17  ;;  %v4221_v47 = vadd.f32 %v4213_v33, %v11547_v55  ;;  %v11936_v17 = vld [vmem:[%s13389_s9 + $0x18] sm:$0xff]  ;;  %v11947_v55 = vld [vmem:[%s13389_s9 + $0x10] sm:$0xff] }
0x1b05   :  { %v11925_v56 = vadd.f32 %v4202_v41, %v11848_v49  ;;  %v4227_v1 = vadd.f32 %v4219_v24, %v11603_v15  ;;  %v4222_v15 = vadd.f32 %v4214_v11, %v11551_v28  ;;  %v11954_v28 = vld [vmem:[%s13389_s9 + $0x8] sm:$0xff] }
0x1b06   :  { %v4230_v49 = vpack.c.bf16 %v4224_v23, %v4223_v35 }
0x1b07   :  { %v4232_v29 = vpack.c.bf16 %v4228_v63, %v4227_v1  ;;  %v4229_v38 = vpack.c.bf16 %v4222_v15, %v4221_v47 }
0x1b09   :  { %9560 = vmatprep.subr.bf16.mxu0 %v4232_v29 }
0x1b0a   :  { %9561 = vmatpush3.bf16.msra.mxu0 %v4232_v29 }
0x1b0b   :  { %9562 = vmatprep.subr.bf16.mxu0 %v4231_v6 }
0x1b0e   :  { %9563 = vmatpush3.bf16.msra.mxu0 %v4231_v6 }
0x1b0f   :  { %9564 = vmatprep.subr.bf16.mxu0 %v4230_v49 }
0x1b12   :  { %9565 = vmatpush3.bf16.msra.mxu0 %v4230_v49 }
0x1b13   :  { %9566 = vmatprep.subr.bf16.mxu0 %v4229_v38 }
0x1b16   :  { %9567 = vmatpush3.bf16.msra.mxu0 %v4229_v38 }
0x1b17   :  { %9596 = vmatprep.subr.mxu0 %v11936_v17 }
0x1b19   :  { %9569 = vmatmul.mubr.msk.bf16.vlgmr.msra.gmra.mxu0 %vm395_vm2, %v11620_v37 }
0x1b1a   :  { %9572 = vmatprep.mubr.msk.bf16.mxu0 %vm395_vm2, %v11627_v10  ;;  %9597 = vmatpush3.msra.mxu0 %v11936_v17 }
0x1b1b   :  { %9598 = vmatprep.subr.mxu0 %v11947_v55 }
0x1b1c   :  { %9599 = vmatpush3.msra.mxu0 %v11947_v55 }
0x1b1d   :  { %9600 = vmatprep.subr.mxu0 %v11954_v28 }
0x1b1e   :  { %9601 = vmatpush3.msra.mxu0 %v11954_v28 }
0x1b1f   :  { %9602 = vmatprep.subr.mxu0 %v11961_v53 }
0x1b20   :  { %9603 = vmatpush3.msra.mxu0 %v11961_v53 }
0x1b21   :  { %9573 = vmatmul.mubr.msk.bf16.gmra.mxu0 %vm395_vm2, %v11515_v36  ;;  %9632 = vmatprep.subr.mxu0 %v11427_v2 }
0x1bd9   :  { %v9570_v7 = vpop.f32.mrf.mxu0 }
0x1bdb   :  { %v4267_v44 = vpop.f32.mrf.mxu0 }
0x1bdc   :  { %9584 = vmatprep.mubr.msk.f32.mxu1 %vm214_vm1, %v4267_v44 }
0x1bdd   :  { %v9571_v20 = vpop.f32.mrf.mxu0 }
0x1bdf   :  { %v4270_v61 = vpop.f32.mrf.mxu0 }
0x1be0   :  { %9585 = vmatmul.mubr.msk.f32.vlgmr.msra.gmra.mxu1 %vm214_vm1, %v4270_v61 }
0x1be1   :  { %v9574_v8 = vpop.f32.mrf.mxu0  ;;  %9587 = vmatprep.mubr.msk.f32.mxu1 %vm214_vm1, %v9570_v7 }
0x1be3   :  { %v4283_v21 = vpop.f32.mrf.mxu0 }
0x1be4   :  { %9588 = vmatmul.mubr.msk.f32.gmra.mxu1 %vm214_vm1, %v9571_v20 }
0x1be5   :  { %v9575_v60 = vpop.f32.mrf.mxu0  ;;  %9590 = vmatprep.mubr.msk.f32.mxu1 %vm214_vm1, %v4283_v21 }
0x1be7   :  { %v4286_v16 = vpop.f32.mrf.mxu0 }
0x1be8   :  { %9591 = vmatmul.mubr.msk.f32.gmra.mxu1 %vm214_vm1, %v4286_v16 }
0x1be9   :  { %9593 = vmatprep.mubr.msk.f32.mxu1 %vm214_vm1, %v9574_v8 }
0x1bec   :  { %9594 = vmatmul.mubr.msk.f32.gmra.mxu1 %vm214_vm1, %v9575_v60 }
0x1bed   :  { %9624 = vmatprep.mubr.msk.bf16.mxu1 %vm395_vm2, %v11531_v32 }
0x1ca0   :  { %v9586_v2 = vpop.f32.mrf.mxu1 }
0x1ca1   :  { %v4394_v3 = vadd.f32 %v11539_v46, %v9586_v2 }
0x1ca2   :  { %v4388_v40 = vpop.f32.mrf.mxu1 }
0x1ca3   :  { %v4428_v13 = vmax.f32 %v4394_v3, 0.0  ;;  %v4389_v14 = vadd.f32 %v11539_v46, %v4388_v40 }
0x1ca4   :  { %v9589_v58 = vpop.f32.mrf.mxu1 }
0x1ca5   :  { %v4427_v59 = vmax.f32 %v4389_v14, 0.0  ;;  %v4404_v27 = vadd.f32 %v11539_v46, %v9589_v58  ;;  %v4436_v25 = vmul.f32 %v4428_v13, %v11773_v30 }
0x1ca6   :  { %v4398_v62 = vpop.f32.mrf.mxu1 }
0x1ca7   :  { %v4435_v5 = vmul.f32 %v4427_v59, %v11773_v30  ;;  %v4430_v45 = vmax.f32 %v4404_v27, 0.0  ;;  %v4399_v57 = vadd.f32 %v11539_v46, %v4398_v62  ;;  %v11989_v42 = vadd.f32 %v4436_v25, %v11889_v4 }
0x1ca8   :  { %v9592_v12 = vpop.f32.mrf.mxu1 }
0x1ca9   :  { %v11985_v0 = vadd.f32 %v4435_v5, %v11894_v9  ;;  %v4429_v54 = vmax.f32 %v4399_v57, 0.0  ;;  %v4414_v52 = vadd.f32 %v11539_v46, %v9592_v12  ;;  %v4438_v48 = vmul.f32 %v4430_v45, %v11773_v30 }
0x1caa   :  { %v4408_v41 = vpop.f32.mrf.mxu1 }
0x1cab   :  { %v4437_v24 = vmul.f32 %v4429_v54, %v11773_v30  ;;  %v4432_v22 = vmax.f32 %v4414_v52, 0.0  ;;  %v4409_v43 = vadd.f32 %v11539_v46, %v4408_v41  ;;  %9604 = vmatprep.mubr.msk.f32.mxu0 %vm214_vm1, %v11985_v0  ;;  %v12009_v51 = vadd.f32 %v4438_v48, %v11900_v18  ;;  %v12028_v18 = vld [vmem:[%s13387_s7 + $0x8] sm:$0xff] }
0x1cac   :  { %v9595_v63 = vpop.f32.mrf.mxu1  ;;  %9605 = vmatmul.mubr.msk.f32.vlgmr.msra.gmra.mxu0 %vm214_vm1, %v11989_v42 }
0x1cad   :  { %v11999_v9 = vadd.f32 %v4437_v24, %v11906_v19  ;;  %v4431_v4 = vmax.f32 %v4409_v43, 0.0  ;;  %v4424_v1 = vadd.f32 %v11539_v46, %v9595_v63  ;;  %9633 = vmatpush3.msra.mxu0 %v12005_v50  ;;  %v4440_v29 = vmul.f32 %v4432_v22, %v11773_v30  ;;  %v12015_v19 = vld [vmem:[%s13387_s7 + $0x10] sm:$0xff] }
0x1cae   :  { %v4418_v33 = vpop.f32.mrf.mxu1  ;;  %9634 = vmatprep.subr.mxu0 %v12015_v19 }
0x1caf   :  { %v4439_v6 = vmul.f32 %v4431_v4, %v11773_v30  ;;  %v4434_v35 = vmax.f32 %v4424_v1, 0.0  ;;  %v4419_v11 = vadd.f32 %v11539_v46, %v4418_v33  ;;  %9607 = vmatprep.mubr.msk.f32.mxu0 %vm214_vm1, %v11999_v9  ;;  %9635 = vmatpush3.msra.mxu0 %v12015_v19  ;;  %v12037_v49 = vadd.f32 %v4440_v29, %v11909_v26 }
0x1cb0   :  { %9608 = vmatmul.mubr.msk.f32.gmra.mxu0 %vm214_vm1, %v12009_v51  ;;  %9636 = vmatprep.subr.mxu0 %v12028_v18  ;;  %v12150_v1 = vstv %s4590_s13 }
0x1cb1   :  { %v12032_v23 = vadd.f32 %v4439_v6, %v11915_v39  ;;  %v4442_v46 = vmul.f32 %v4434_v35, %v11773_v30  ;;  %v4433_v47 = vmax.f32 %v4419_v11, 0.0  ;;  %9637 = vmatpush3.msra.mxu0 %v12028_v18 }
0x1cb2   :  { %9638 = vmatprep.subr.mxu0 %v11589_v31 }
0x1cb3   :  { %v4441_v15 = vmul.f32 %v4433_v47, %v11773_v30  ;;  %9610 = vmatprep.mubr.msk.f32.mxu0 %vm214_vm1, %v12032_v23  ;;  %9639 = vmatpush3.msra.mxu0 %v11589_v31  ;;  %v12048_v39 = vadd.f32 %v4442_v46, %v11919_v34  ;;  %v4595_v38 = vpack.c.bf16 %v12037_v49, %v12032_v23 }
0x1cb4   :  { %9611 = vmatmul.mubr.msk.f32.gmra.mxu0 %vm214_vm1, %v12037_v49  ;;  %9668 = vmatprep.subr.mxu0 %v12005_v50  ;;  %v4594_v34 = vpack.c.bf16 %v12009_v51, %v11999_v9 }
0x1cb5   :  { %v12051_v26 = vadd.f32 %v4441_v15, %v11925_v56  ;;  %v4593_v56 = vpack.c.bf16 %v11989_v42, %v11985_v0 }
0x1cb7   :  { %9613 = vmatprep.mubr.msk.f32.mxu0 %vm214_vm1, %v12051_v26  ;;  %v4596_v30 = vpack.c.bf16 %v12048_v39, %v12051_v26 }
0x1cb8   :  { %9614 = vmatmul.mubr.msk.f32.gmra.mxu0 %vm214_vm1, %v12048_v39 }
0x1cb9   :  { %9616 = vmatprep.subr.bf16.mxu1 %v4596_v30 }
0x1cba   :  { %9617 = vmatpush3.bf16.msra.mxu1 %v4596_v30 }
0x1cbb   :  { %9618 = vmatprep.subr.bf16.mxu1 %v4595_v38 }
0x1cbe   :  { %9619 = vmatpush3.bf16.msra.mxu1 %v4595_v38 }
0x1cbf   :  { %9620 = vmatprep.subr.bf16.mxu1 %v4594_v34 }
0x1cc2   :  { %9621 = vmatpush3.bf16.msra.mxu1 %v4594_v34 }
0x1cc3   :  { %9622 = vmatprep.subr.bf16.mxu1 %v4593_v56 }
0x1cc6   :  { %9623 = vmatpush3.bf16.msra.mxu1 %v4593_v56 }
0x1cc9   :  { %9625 = vmatmul.mubr.msk.bf16.vlgmr.msra.gmra.mxu1 %vm395_vm2, %v11620_v37 }
0x1cca   :  { %9628 = vmatprep.mubr.msk.bf16.mxu1 %vm395_vm2, %v11627_v10 }
0x1cd1   :  { %9629 = vmatmul.mubr.msk.bf16.gmra.mxu1 %vm395_vm2, %v11515_v36 }
0x1cd2   :  { %9660 = vmatprep.mubr.msk.bf16.mxu1 %vm395_vm2, %v11531_v32 }
0x1d6c   :  { %v9606_v7 = vpop.f32.mrf.mxu0 }
0x1d6d   :  { %8091 = vst.msk [vmem:[%s13390_s10 + $0x88] sm:$0xff] %vm65_vm0, %v9606_v7 }
0x1d6e   :  { %v4541_v44 = vpop.f32.mrf.mxu0 }
0x1d6f   :  { %8090 = vst.msk [vmem:[%s13390_s10 + $0x80] sm:$0xff] %vm65_vm0, %v4541_v44 }
0x1d70   :  { %v9609_v20 = vpop.f32.mrf.mxu0 }
0x1d71   :  { %8093 = vst.msk [vmem:[%s13390_s10 + $0x98] sm:$0xff] %vm65_vm0, %v9609_v20 }
0x1d72   :  { %v4551_v36 = vpop.f32.mrf.mxu0 }
0x1d73   :  { %8092 = vst.msk [vmem:[%s13390_s10 + $0x90] sm:$0xff] %vm65_vm0, %v4551_v36 }
0x1d74   :  { %v9612_v32 = vpop.f32.mrf.mxu0 }
0x1d75   :  { %8095 = vst.msk [vmem:[%s13390_s10 + $0xa8] sm:$0xff] %vm65_vm0, %v9612_v32 }
0x1d76   :  { %v4561_v61 = vpop.f32.mrf.mxu0 }
0x1d77   :  { %8094 = vst.msk [vmem:[%s13390_s10 + $0xa0] sm:$0xff] %vm65_vm0, %v4561_v61 }
0x1d78   :  { %v9615_v8 = vpop.f32.mrf.mxu0 }
0x1d79   :  { %8097 = vst.msk [vmem:[%s13390_s10 + $0xb8] sm:$0xff] %vm65_vm0, %v9615_v8 }
0x1d7a   :  { %v4571_v21 = vpop.f32.mrf.mxu0 }
0x1d7b   :  { %8096 = vst.msk [vmem:[%s13390_s10 + $0xb0] sm:$0xff] %vm65_vm0, %v4571_v21 }
0x1d89   :  { %v9626_v60 = vpop.f32.mrf.mxu1 }
0x1d8b   :  { %v4631_v16 = vpop.f32.mrf.mxu1 }
0x1d8c   :  { %9640 = vmatprep.mubr.msk.f32.mxu0 %vm214_vm1, %v4631_v16 }
0x1d8d   :  { %v9627_v2 = vpop.f32.mrf.mxu1 }
0x1d8f   :  { %v4634_v3 = vpop.f32.mrf.mxu1 }
0x1d90   :  { %9641 = vmatmul.mubr.msk.f32.vlgmr.msra.gmra.mxu0 %vm214_vm1, %v4634_v3 }
0x1d91   :  { %v9630_v40 = vpop.f32.mrf.mxu1  ;;  %9643 = vmatprep.mubr.msk.f32.mxu0 %vm214_vm1, %v9626_v60  ;;  %9669 = vmatpush3.msra.mxu0 %v12005_v50 }
0x1d92   :  { %9670 = vmatprep.subr.mxu0 %v12015_v19 }
0x1d93   :  { %v4647_v13 = vpop.f32.mrf.mxu1  ;;  %9671 = vmatpush3.msra.mxu0 %v12015_v19 }
0x1d94   :  { %9644 = vmatmul.mubr.msk.f32.gmra.mxu0 %vm214_vm1, %v9627_v2  ;;  %9672 = vmatprep.subr.mxu0 %v12028_v18 }
0x1d95   :  { %v9631_v14 = vpop.f32.mrf.mxu1  ;;  %9646 = vmatprep.mubr.msk.f32.mxu0 %vm214_vm1, %v4647_v13  ;;  %9673 = vmatpush3.msra.mxu0 %v12028_v18 }
0x1d96   :  { %9674 = vmatprep.subr.mxu0 %v11589_v31 }
0x1d97   :  { %v4650_v58 = vpop.f32.mrf.mxu1  ;;  %9675 = vmatpush3.msra.mxu0 %v11589_v31  ;;  %v12126_v31 = vld [vmem:[%s13388_s8] ss:$0 sm:$0xff] }
0x1d98   :  { %9647 = vmatmul.mubr.msk.f32.gmra.mxu0 %vm214_vm1, %v4650_v58  ;;  %9704 = vmatprep.subr.mxu0 %v12005_v50  ;;  %v12200_v58 = vld [vmem:[%s13382_s2 + $0x18] sm:$0xff]  }
0x1d99   :  { %9649 = vmatprep.mubr.msk.f32.mxu0 %vm214_vm1, %v9630_v40 }
0x1d9c   :  { %9650 = vmatmul.mubr.msk.f32.gmra.mxu0 %vm214_vm1, %v9631_v14 }
0x1e50   :  { %v9642_v59 = vpop.f32.mrf.mxu0 }
0x1e51   :  { %v12164_v46 = vadd.f32 %v12126_v31, %v9642_v59  ;;  %v12207_v59 = vld [vmem:[%s13382_s2] sm:$0xff]  }
0x1e52   :  { %v4752_v27 = vpop.f32.mrf.mxu0 }
0x1e53   :  { %v12153_v29 = vadd.f32 %v12126_v31, %v4752_v27  ;;  %v4792_v20 = vmax.f32 %v12164_v46, 0.0 }
0x1e54   :  { %v9645_v25 = vpop.f32.mrf.mxu0 }
0x1e55   :  { %v12143_v22 = vadd.f32 %v12126_v31, %v9645_v25  ;;  %v4791_v38 = vmax.f32 %v12153_v29, 0.0  ;;  %v4818_v16 = vmul.f32 %v12150_v1, %v4792_v20 }
0x1e56   :  { %v4762_v62 = vpop.f32.mrf.mxu0 }
0x1e57   :  { %v12139_v48 = vadd.f32 %v12126_v31, %v4762_v62  ;;  %v4794_v47 = vmax.f32 %v12143_v22, 0.0  ;;  %v4817_v8 = vmul.f32 %v12150_v1, %v4791_v38  ;;  %v4826_v13 = vadd.f32 %v4818_v16, %v11989_v42 }
0x1e58   :  { %v9648_v5 = vpop.f32.mrf.mxu0 }
0x1e59   :  { %v12132_v12 = vadd.f32 %v12126_v31, %v9648_v5  ;;  %v4793_v33 = vmax.f32 %v12139_v48, 0.0  ;;  %v4820_v36 = vmul.f32 %v12150_v1, %v4794_v47  ;;  %v4825_v3 = vadd.f32 %v4817_v8, %v11985_v0 }
0x1e5a   :  { %v4772_v45 = vpop.f32.mrf.mxu0 }
0x1e5b   :  { %v12129_v57 = vadd.f32 %v12126_v31, %v4772_v45  ;;  %v4796_v43 = vmax.f32 %v12132_v12, 0.0  ;;  %v4819_v34 = vmul.f32 %v12150_v1, %v4793_v33  ;;  %v4828_v2 = vadd.f32 %v4820_v36, %v12009_v51 }
0x1e5c   :  { %v9651_v54 = vpop.f32.mrf.mxu0  ;;  %v4833_v14 = vpack.c.bf16 %v4826_v13, %v4825_v3 }
0x1e5d   :  { %v12136_v52 = vadd.f32 %v12126_v31, %v9651_v54  ;;  %v4795_v41 = vmax.f32 %v12129_v57, 0.0  ;;  %v4822_v15 = vmul.f32 %v12150_v1, %v4796_v43  ;;  %v4827_v21 = vadd.f32 %v4819_v34, %v11999_v9  ;;  %v12224_v54 = vld [vmem:[%s13387_s7] sm:$0xff] }
0x1e5e   :  { %v4782_v24 = vpop.f32.mrf.mxu0 }
0x1e5f   :  { %v4798_v63 = vmax.f32 %v12136_v52, 0.0  ;;  %v12148_v4 = vadd.f32 %v12126_v31, %v4782_v24  ;;  %v4821_v6 = vmul.f32 %v12150_v1, %v4795_v41  ;;  %v4830_v32 = vadd.f32 %v4822_v15, %v12037_v49 }
0x1e60   :  { %v4834_v40 = vpack.c.bf16 %v4828_v2, %v4827_v21 }
0x1e61   :  { %v4824_v35 = vmul.f32 %v12150_v1, %v4798_v63  ;;  %v4797_v11 = vmax.f32 %v12148_v4, 0.0  ;;  %v4829_v56 = vadd.f32 %v4821_v6, %v12032_v23  ;;  %v12233_v6 = vstv %s4591_s1 }
0x1e62   :  { %v4801_v46 = vmul.f32 %v12233_v6, %v4792_v20  ;;  %v4803_v29 = vmul.f32 %v12233_v6, %v4794_v47  ;;  %v4802_v2 = vmul.f32 %v12233_v6, %v4793_v33  ;;  %v4805_v3 = vmul.f32 %v12233_v6, %v4796_v43 }
0x1e63   :  { %v4823_v30 = vmul.f32 %v12150_v1, %v4797_v11  ;;  %v4832_v7 = vadd.f32 %v4824_v35, %v12048_v39  ;;  %v4835_v60 = vpack.c.bf16 %v4830_v32, %v4829_v56  ;;  %v4800_v56 = vmul.f32 %v12233_v6, %v4791_v38 }
0x1e64   :  { %v4809_v32 = vadd.f32 %v4801_v46, %v11989_v42  ;;  %v4804_v12 = vmul.f32 %v12233_v6, %v4795_v41 }
0x1e65   :  { %v4831_v44 = vadd.f32 %v4823_v30, %v12051_v26  ;;  %v12240_v30 = vstv %s4592_s20  ;;  %v4808_v38 = vadd.f32 %v4800_v56, %v11985_v0 }
0x1e67   :  { %v4836_v61 = vpack.c.bf16 %v4832_v7, %v4831_v44 }
0x1e69   :  { %9652 = vmatprep.subr.bf16.mxu1 %v4836_v61 }
0x1e6a   :  { %9653 = vmatpush3.bf16.msra.mxu1 %v4836_v61 }
0x1e6b   :  { %9654 = vmatprep.subr.bf16.mxu1 %v4835_v60 }
0x1e6e   :  { %9655 = vmatpush3.bf16.msra.mxu1 %v4835_v60 }
0x1e6f   :  { %9656 = vmatprep.subr.bf16.mxu1 %v4834_v40 }
0x1e72   :  { %9657 = vmatpush3.bf16.msra.mxu1 %v4834_v40 }
0x1e73   :  { %9658 = vmatprep.subr.bf16.mxu1 %v4833_v14 }
0x1e76   :  { %9659 = vmatpush3.bf16.msra.mxu1 %v4833_v14 }
0x1e79   :  { %9661 = vmatmul.mubr.msk.bf16.vlgmr.msra.gmra.mxu1 %vm395_vm2, %v11620_v37 }
0x1e7a   :  { %9664 = vmatprep.mubr.msk.bf16.mxu1 %vm395_vm2, %v11627_v10 }
0x1e81   :  { %9665 = vmatmul.mubr.msk.bf16.gmra.mxu1 %vm395_vm2, %v12200_v58 }
0x1e82   :  { %9696 = vmatprep.mubr.msk.bf16.mxu1 %vm395_vm2, %v12207_v59 }
0x1f39   :  { %v9662_v37 = vpop.f32.mrf.mxu1 }
0x1f3b   :  { %v4871_v27 = vpop.f32.mrf.mxu1 }
0x1f3c   :  { %9676 = vmatprep.mubr.msk.f32.mxu0 %vm214_vm1, %v4871_v27 }
0x1f3d   :  { %v9663_v10 = vpop.f32.mrf.mxu1 }
0x1f3f   :  { %v4874_v25 = vpop.f32.mrf.mxu1 }
0x1f40   :  { %9677 = vmatmul.mubr.msk.f32.vlgmr.msra.gmra.mxu0 %vm214_vm1, %v4874_v25  ;;  %v4810_v25 = vadd.f32 %v4802_v2, %v11999_v9 }
0x1f41   :  { %v9666_v62 = vpop.f32.mrf.mxu1  ;;  %9679 = vmatprep.mubr.msk.f32.mxu0 %vm214_vm1, %v9662_v37  ;;  %9705 = vmatpush3.msra.mxu0 %v12005_v50  ;;  %v4811_v37 = vadd.f32 %v4803_v29, %v12009_v51 }
0x1f42   :  { %9706 = vmatprep.subr.mxu0 %v12015_v19 }
0x1f43   :  { %v4887_v5 = vpop.f32.mrf.mxu1  ;;  %9707 = vmatpush3.msra.mxu0 %v12015_v19 }
0x1f44   :  { %9680 = vmatmul.mubr.msk.f32.gmra.mxu0 %vm214_vm1, %v9663_v10  ;;  %9708 = vmatprep.subr.mxu0 %v12028_v18 }
0x1f45   :  { %v9667_v45 = vpop.f32.mrf.mxu1  ;;  %9682 = vmatprep.mubr.msk.f32.mxu0 %vm214_vm1, %v4887_v5  ;;  %9709 = vmatpush3.msra.mxu0 %v12028_v18 }
0x1f46   :  { %9710 = vmatprep.subr.mxu0 %v12224_v54 }
0x1f47   :  { %v4890_v24 = vpop.f32.mrf.mxu1  ;;  %9711 = vmatpush3.msra.mxu0 %v12224_v54 }
0x1f48   :  { %9683 = vmatmul.mubr.msk.f32.gmra.mxu0 %vm214_vm1, %v4890_v24  ;;  %9740 = vmatprep.subr.mxu0 %v12005_v50 }
0x1f49   :  { %9685 = vmatprep.mubr.msk.f32.mxu0 %vm214_vm1, %v9666_v62  ;;  %v4813_v62 = vadd.f32 %v4805_v3, %v12037_v49 }
0x1f4c   :  { %9686 = vmatmul.mubr.msk.f32.gmra.mxu0 %vm214_vm1, %v9667_v45 }
0x2000   :  { %v9678_v35 = vpop.f32.mrf.mxu0 }
0x2001   :  { %v12238_v15 = vadd.f32 %v12126_v31, %v9678_v35  ;;  %v4807_v35 = vmul.f32 %v12233_v6, %v4798_v63 }
0x2002   :  { %v4992_v34 = vpop.f32.mrf.mxu0 }
0x2003   :  { %v5032_v7 = vmax.f32 %v12238_v15, 0.0  ;;  %v4993_v44 = vadd.f32 %v12126_v31, %v4992_v34 }
0x2004   :  { %v9681_v36 = vpop.f32.mrf.mxu0 }
0x2005   :  { %v5041_v20 = vmul.f32 %v12240_v30, %v5032_v7  ;;  %v5031_v61 = vmax.f32 %v4993_v44, 0.0  ;;  %v5008_v8 = vadd.f32 %v12126_v31, %v9681_v36  ;;  %v4812_v44 = vadd.f32 %v4804_v12, %v12032_v23 }
0x2006   :  { %v5002_v21 = vpop.f32.mrf.mxu0  ;;  %v4806_v36 = vmul.f32 %v12233_v6, %v4797_v11 }
0x2007   :  { %v12256_v60 = vadd.f32 %v5041_v20, %v4809_v32  ;;  %v5040_v16 = vmul.f32 %v12240_v30, %v5031_v61  ;;  %v5034_v40 = vmax.f32 %v5008_v8, 0.0  ;;  %v5003_v22 = vadd.f32 %v12126_v31, %v5002_v21 }
0x2008   :  { %v9684_v13 = vpop.f32.mrf.mxu0  ;;  %v4815_v8 = vadd.f32 %v4807_v35, %v12048_v39  ;;  %v4814_v11 = vadd.f32 %v4806_v36, %v12051_v26 }
0x2009   :  { %v12266_v47 = vadd.f32 %v5040_v16, %v4808_v38  ;;  %v5018_v14 = vadd.f32 %v12126_v31, %v9684_v13  ;;  %v5043_v27 = vmul.f32 %v12240_v30, %v5034_v40  ;;  %v5033_v10 = vmax.f32 %v5003_v22, 0.0 }
0x200a   :  { %v5012_v48 = vpop.f32.mrf.mxu0 }
0x200b   :  { %v5036_v33 = vmax.f32 %v5018_v14, 0.0  ;;  %v5013_v43 = vadd.f32 %v12126_v31, %v5012_v48  ;;  %v12277_v5 = vadd.f32 %v5043_v27, %v4811_v37  ;;  %v5042_v45 = vmul.f32 %v12240_v30, %v5033_v10 }
0x200c   :  { %v9687_v24 = vpop.f32.mrf.mxu0  ;;  %v5058_v14 = vmul.f32 %v5033_v10, %v12150_v1  ;;  %v5057_v10 = vmul.f32 %v5032_v7, %v12150_v1 }
0x200d   :  { %v5045_v57 = vmul.f32 %v12240_v30, %v5036_v33  ;;  %v5035_v46 = vmax.f32 %v5013_v43, 0.0  ;;  %v5028_v41 = vadd.f32 %v12126_v31, %v9687_v24  ;;  %v12285_v34 = vadd.f32 %v5042_v45, %v4810_v25 }
0x200e   :  { %v5022_v56 = vpop.f32.mrf.mxu0  ;;  %v5061_v2 = vmul.f32 %v5036_v33, %v12150_v1  ;;  %v5059_v43 = vmul.f32 %v5034_v40, %v12150_v1  ;;  %v5066_v45 = vadd.f32 %v5058_v14, %v11999_v9 }
0x200f   :  { %v12291_v32 = vadd.f32 %v5045_v57, %v4813_v62  ;;  %v5044_v52 = vmul.f32 %v12240_v30, %v5035_v46  ;;  %v5038_v20 = vmax.f32 %v5028_v41, 0.0  ;;  %v5023_v63 = vadd.f32 %v12126_v31, %v5022_v56  ;;  %v12326_v41 = vld [vmem:[%s13382_s2 + $0x8] sm:$0xff]  }
0x2010   :  { %v5060_v21 = vmul.f32 %v5035_v46, %v12150_v1  ;;  %v5069_v33 = vadd.f32 %v5061_v2, %v12037_v49  ;;  %v5056_v62 = vmul.f32 %v5031_v61, %v12150_v1  ;;  %v5067_v35 = vadd.f32 %v5059_v43, %v12009_v51 }
0x2011   :  { %v12296_v29 = vadd.f32 %v5044_v52, %v4812_v44  ;;  %v5047_v38 = vmul.f32 %v12240_v30, %v5038_v20  ;;  %v5063_v16 = vmul.f32 %v5038_v20, %v12150_v1  ;;  %v5037_v4 = vmax.f32 %v5023_v63, 0.0 }
0x2012   :  { %v5068_v37 = vadd.f32 %v5060_v21, %v12032_v23  ;;  %v5064_v57 = vadd.f32 %v5056_v62, %v11985_v0  ;;  %v5073_v40 = vpack.c.bf16 %v5067_v35, %v5066_v45  ;;  %v5065_v46 = vadd.f32 %v5057_v10, %v11989_v42 }
0x2013   :  { %v12303_v3 = vadd.f32 %v5047_v38, %v4815_v8  ;;  %v5046_v22 = vmul.f32 %v12240_v30, %v5037_v4  ;;  %v5062_v13 = vmul.f32 %v5037_v4, %v12150_v1  ;;  %v5071_v27 = vadd.f32 %v5063_v16, %v12048_v39  ;;  %v12333_v1 = vld [vmem:[%s13382_s2 + $0x10] sm:$0xff]  }
0x2014   :  { %v5074_v24 = vpack.c.bf16 %v5069_v33, %v5068_v37  ;;  %v5072_v61 = vpack.c.bf16 %v5065_v46, %v5064_v57 }
0x2015   :  { %v12310_v48 = vadd.f32 %v5046_v22, %v4814_v11  ;;  %v5070_v12 = vadd.f32 %v5062_v13, %v12051_v26 }
0x2017   :  { %v5075_v25 = vpack.c.bf16 %v5071_v27, %v5070_v12 }
0x2019   :  { %9688 = vmatprep.subr.bf16.mxu1 %v5075_v25 }
0x201a   :  { %9689 = vmatpush3.bf16.msra.mxu1 %v5075_v25 }
0x201b   :  { %9690 = vmatprep.subr.bf16.mxu1 %v5074_v24 }
0x201e   :  { %9691 = vmatpush3.bf16.msra.mxu1 %v5074_v24 }
0x201f   :  { %9692 = vmatprep.subr.bf16.mxu1 %v5073_v40 }
0x2022   :  { %9693 = vmatpush3.bf16.msra.mxu1 %v5073_v40 }
0x2023   :  { %9694 = vmatprep.subr.bf16.mxu1 %v5072_v61 }
0x2026   :  { %9695 = vmatpush3.bf16.msra.mxu1 %v5072_v61 }
0x2029   :  { %9697 = vmatmul.mubr.msk.bf16.vlgmr.msra.gmra.mxu1 %vm395_vm2, %v12326_v41 }
0x202a   :  { %9700 = vmatprep.mubr.msk.bf16.mxu1 %vm395_vm2, %v12333_v1 }
0x2031   :  { %9701 = vmatmul.mubr.msk.bf16.gmra.mxu1 %vm395_vm2, %v12200_v58 }
0x2032   :  { %9732 = vmatprep.mubr.msk.bf16.mxu1 %vm395_vm2, %v12207_v59 }
0x20e9   :  { %v9698_v15 = vpop.f32.mrf.mxu1 }
0x20eb   :  { %v5110_v7 = vpop.f32.mrf.mxu1 }
0x20ec   :  { %9712 = vmatprep.mubr.msk.f32.mxu0 %vm214_vm1, %v5110_v7 }
0x20ed   :  { %v9699_v56 = vpop.f32.mrf.mxu1 }
0x20ef   :  { %v5113_v44 = vpop.f32.mrf.mxu1 }
0x20f0   :  { %9713 = vmatmul.mubr.msk.f32.vlgmr.msra.gmra.mxu0 %vm214_vm1, %v5113_v44 }
0x20f1   :  { %v9702_v36 = vpop.f32.mrf.mxu1  ;;  %9715 = vmatprep.mubr.msk.f32.mxu0 %vm214_vm1, %v9698_v15  ;;  %9741 = vmatpush3.msra.mxu0 %v12005_v50 }
0x20f2   :  { %9742 = vmatprep.subr.mxu0 %v12015_v19 }
0x20f3   :  { %v5126_v52 = vpop.f32.mrf.mxu1  ;;  %9743 = vmatpush3.msra.mxu0 %v12015_v19 }
0x20f4   :  { %9716 = vmatmul.mubr.msk.f32.gmra.mxu0 %vm214_vm1, %v9699_v56  ;;  %9744 = vmatprep.subr.mxu0 %v12028_v18 }
0x20f5   :  { %v9703_v20 = vpop.f32.mrf.mxu1  ;;  %9718 = vmatprep.mubr.msk.f32.mxu0 %vm214_vm1, %v5126_v52  ;;  %9745 = vmatpush3.msra.mxu0 %v12028_v18 }
0x20f6   :  { %9746 = vmatprep.subr.mxu0 %v12224_v54 }
0x20f7   :  { %v5129_v63 = vpop.f32.mrf.mxu1  ;;  %9747 = vmatpush3.msra.mxu0 %v12224_v54 }
0x20f8   :  { %9719 = vmatmul.mubr.msk.f32.gmra.mxu0 %vm214_vm1, %v5129_v63 }
0x20f9   :  { %9721 = vmatprep.mubr.msk.f32.mxu0 %vm214_vm1, %v9702_v36 }
0x20fc   :  { %9722 = vmatmul.mubr.msk.f32.gmra.mxu0 %vm214_vm1, %v9703_v20  ;;  %v5294_v20 = vstv %s12121_s30  ;;  %s6754_s30 = smul.f32 0.5, %s13033_s29 }
0x21b0   :  { %v9714_v8 = vpop.f32.mrf.mxu0 }
0x21b1   :  { %v5237_v21 = vadd.f32 %v12126_v31, %v9714_v8 }
0x21b2   :  { %v5231_v38 = vpop.f32.mrf.mxu0 }
0x21b3   :  { %v5271_v16 = vmax.f32 %v5237_v21, 0.0  ;;  %v5232_v4 = vadd.f32 %v12126_v31, %v5231_v38 }
0x21b4   :  { %v9717_v11 = vpop.f32.mrf.mxu0 }
0x21b5   :  { %v5279_v2 = vmul.f32 %v5271_v16, %v12240_v30  ;;  %v5270_v22 = vmax.f32 %v5232_v4, 0.0  ;;  %v5247_v13 = vadd.f32 %v12126_v31, %v9717_v11 }
0x21b6   :  { %v5241_v14 = vpop.f32.mrf.mxu0 }
0x21b7   :  { %v12361_v37 = vadd.f32 %v5279_v2, %v12256_v60  ;;  %v5278_v27 = vmul.f32 %v5270_v22, %v12240_v30  ;;  %v5273_v12 = vmax.f32 %v5247_v13, 0.0  ;;  %v5242_v43 = vadd.f32 %v12126_v31, %v5241_v14 }
0x21b8   :  { %v9720_v33 = vpop.f32.mrf.mxu0 }
0x21b9   :  { %v12366_v25 = vadd.f32 %v5278_v27, %v12266_v47  ;;  %v5257_v62 = vadd.f32 %v12126_v31, %v9720_v33  ;;  %v5281_v45 = vmul.f32 %v5273_v12, %v12240_v30  ;;  %v5272_v24 = vmax.f32 %v5242_v43, 0.0 }
0x21ba   :  { %v5251_v10 = vpop.f32.mrf.mxu0  ;;  %v5298_v33 = vmul.f32 %v5294_v20, %v5273_v12 }
0x21bb   :  { %v5275_v35 = vmax.f32 %v5257_v62, 0.0  ;;  %v5252_v60 = vadd.f32 %v12126_v31, %v5251_v10  ;;  %v12372_v57 = vadd.f32 %v5281_v45, %v12277_v5  ;;  %v5280_v40 = vmul.f32 %v5272_v24, %v12240_v30 }
0x21bc   :  { %v9723_v46 = vpop.f32.mrf.mxu0  ;;  %v5297_v13 = vmul.f32 %v5294_v20, %v5272_v24  ;;  %v5295_v10 = vmul.f32 %v5294_v20, %v5270_v22  ;;  %v5296_v24 = vmul.f32 %v5294_v20, %v5271_v16 }
0x21bd   :  { %v5283_v61 = vmul.f32 %v5275_v35, %v12240_v30  ;;  %v5274_v47 = vmax.f32 %v5252_v60, 0.0  ;;  %v5267_v15 = vadd.f32 %v12126_v31, %v9723_v46  ;;  %v12378_v7 = vadd.f32 %v5280_v40, %v12285_v34 }
0x21be   :  { %v5261_v56 = vpop.f32.mrf.mxu0  ;;  %v5300_v34 = vmul.f32 %v5294_v20, %v5275_v35 }
0x21bf   :  { %v12381_v44 = vadd.f32 %v5283_v61, %v12291_v32  ;;  %v5282_v36 = vmul.f32 %v5274_v47, %v12240_v30  ;;  %v5277_v52 = vmax.f32 %v5267_v15, 0.0  ;;  %v5262_v5 = vadd.f32 %v12126_v31, %v5261_v56 }
0x21c0   :  { %v5299_v8 = vmul.f32 %v5294_v20, %v5274_v47  ;;  %v5308_v62 = vadd.f32 %v5300_v34, %v12037_v49 }
0x21c1   :  { %v12387_v63 = vadd.f32 %v5282_v36, %v12296_v29  ;;  %v5285_v21 = vmul.f32 %v5277_v52, %v12240_v30  ;;  %v5302_v38 = vmul.f32 %v5294_v20, %v5277_v52  ;;  %v5276_v4 = vmax.f32 %v5262_v5, 0.0 }
0x21c2   :  { %v5307_v14 = vadd.f32 %v5299_v8, %v12032_v23  ;;  %v5306_v23 = vadd.f32 %v5298_v33, %v12009_v51 }
0x21c3   :  { %v12391_v11 = vadd.f32 %v5285_v21, %v12303_v3  ;;  %v5284_v32 = vmul.f32 %v5276_v4, %v12240_v30  ;;  %v5301_v2 = vmul.f32 %v5294_v20, %v5276_v4  ;;  %v5310_v27 = vadd.f32 %v5302_v38, %v12048_v39 }
0x21c4   :  { %v5305_v3 = vadd.f32 %v5297_v13, %v11999_v9  ;;  %v5313_v30 = vpack.c.bf16 %v5308_v62, %v5307_v14  ;;  %v5303_v39 = vadd.f32 %v5295_v10, %v11985_v0 }
0x21c5   :  { %v12397_v29 = vadd.f32 %v5284_v32, %v12310_v48  ;;  %v5309_v43 = vadd.f32 %v5301_v2, %v12051_v26  ;;  %v5304_v26 = vadd.f32 %v5296_v24, %v11989_v42 }
0x21c6   :  { %v5312_v48 = vpack.c.bf16 %v5306_v23, %v5305_v3 }
0x21c7   :  { %v5314_v45 = vpack.c.bf16 %v5310_v27, %v5309_v43  ;;  %v5311_v12 = vpack.c.bf16 %v5304_v26, %v5303_v39 }
0x21c9   :  { %9724 = vmatprep.subr.bf16.mxu1 %v5314_v45 }
0x21ca   :  { %9725 = vmatpush3.bf16.msra.mxu1 %v5314_v45 }
0x21cb   :  { %9726 = vmatprep.subr.bf16.mxu1 %v5313_v30 }
0x21ce   :  { %9727 = vmatpush3.bf16.msra.mxu1 %v5313_v30 }
0x21cf   :  { %9728 = vmatprep.subr.bf16.mxu1 %v5312_v48 }
0x21d2   :  { %9729 = vmatpush3.bf16.msra.mxu1 %v5312_v48 }
0x21d3   :  { %9730 = vmatprep.subr.bf16.mxu1 %v5311_v12 }
0x21d6   :  { %9731 = vmatpush3.bf16.msra.mxu1 %v5311_v12 }
0x21d7   :  { %9760 = vmatprep.subr.mxu1 %v11936_v17 }
0x21d9   :  { %9733 = vmatmul.mubr.msk.bf16.vlgmr.msra.gmra.mxu1 %vm395_vm2, %v12326_v41 }
0x21da   :  { %9736 = vmatprep.mubr.msk.bf16.mxu1 %vm395_vm2, %v12333_v1  ;;  %9761 = vmatpush3.msra.mxu1 %v11936_v17 }
0x21db   :  { %9762 = vmatprep.subr.mxu1 %v11947_v55 }
0x21dc   :  { %9763 = vmatpush3.msra.mxu1 %v11947_v55 }
0x21dd   :  { %9764 = vmatprep.subr.mxu1 %v11954_v28 }
0x21de   :  { %9765 = vmatpush3.msra.mxu1 %v11954_v28 }
0x21df   :  { %9766 = vmatprep.subr.mxu1 %v11961_v53 }
0x21e0   :  { %9767 = vmatpush3.msra.mxu1 %v11961_v53 }
0x21e1   :  { %9737 = vmatmul.mubr.msk.bf16.gmra.mxu1 %vm395_vm2, %v12200_v58  ;;  %9796 = vmatprep.subr.mxu1 %v12005_v50 }
0x2299   :  { %v9734_v0 = vpop.f32.mrf.mxu1 }
0x229b   :  { %v5349_v42 = vpop.f32.mrf.mxu1 }
0x229c   :  { %9748 = vmatprep.mubr.msk.f32.mxu0 %vm214_vm1, %v5349_v42 }
0x229d   :  { %v9735_v17 = vpop.f32.mrf.mxu1 }
0x229f   :  { %v5352_v9 = vpop.f32.mrf.mxu1 }
0x22a0   :  { %9749 = vmatmul.mubr.msk.f32.vlgmr.msra.gmra.mxu0 %vm214_vm1, %v5352_v9 }
0x22a1   :  { %v9738_v55 = vpop.f32.mrf.mxu1  ;;  %9751 = vmatprep.mubr.msk.f32.mxu0 %vm214_vm1, %v9734_v0 }
0x22a3   :  { %v5365_v28 = vpop.f32.mrf.mxu1 }
0x22a4   :  { %9752 = vmatmul.mubr.msk.f32.gmra.mxu0 %vm214_vm1, %v9735_v17 }
0x22a5   :  { %v9739_v53 = vpop.f32.mrf.mxu1  ;;  %9754 = vmatprep.mubr.msk.f32.mxu0 %vm214_vm1, %v5365_v28 }
0x22a7   :  { %v5368_v51 = vpop.f32.mrf.mxu1 }
0x22a8   :  { %9755 = vmatmul.mubr.msk.f32.gmra.mxu0 %vm214_vm1, %v5368_v51 }
0x22a9   :  { %9757 = vmatprep.mubr.msk.f32.mxu0 %vm214_vm1, %v9738_v55 }
0x22ac   :  { %9758 = vmatmul.mubr.msk.f32.gmra.mxu0 %vm214_vm1, %v9739_v53 }
0x22ad   :  { %9788 = vmatprep.mubr.msk.bf16.mxu0 %vm395_vm2, %v12207_v59 }
0x2360   :  { %v9750_v49 = vpop.f32.mrf.mxu0 }
0x2361   :  { %v5476_v16 = vadd.f32 %v12126_v31, %v9750_v49 }
0x2362   :  { %v5470_v22 = vpop.f32.mrf.mxu0 }
0x2363   :  { %v5510_v35 = vmax.f32 %v5476_v16, 0.0  ;;  %v5471_v60 = vadd.f32 %v12126_v31, %v5470_v22 }
0x2364   :  { %v9753_v40 = vpop.f32.mrf.mxu0 }
0x2365   :  { %v5509_v46 = vmax.f32 %v5471_v60, 0.0  ;;  %v5486_v61 = vadd.f32 %v12126_v31, %v9753_v40  ;;  %v5518_v47 = vmul.f32 %v5510_v35, %v12233_v6 }
0x2366   :  { %v5480_v15 = vpop.f32.mrf.mxu0 }
0x2367   :  { %v5517_v56 = vmul.f32 %v5509_v46, %v12233_v6  ;;  %v5512_v36 = vmax.f32 %v5486_v61, 0.0  ;;  %v5481_v52 = vadd.f32 %v12126_v31, %v5480_v15  ;;  %v12441_v38 = vadd.f32 %v5518_v47, %v12361_v37 }
0x2368   :  { %v9756_v5 = vpop.f32.mrf.mxu0 }
0x2369   :  { %v12437_v20 = vadd.f32 %v5517_v56, %v12366_v25  ;;  %v5511_v8 = vmax.f32 %v5481_v52, 0.0  ;;  %v5496_v21 = vadd.f32 %v12126_v31, %v9756_v5  ;;  %v5520_v4 = vmul.f32 %v5512_v36, %v12233_v6 }
0x236a   :  { %v5490_v34 = vpop.f32.mrf.mxu0 }
0x236b   :  { %v5519_v32 = vmul.f32 %v5511_v8, %v12233_v6  ;;  %v5514_v2 = vmax.f32 %v5496_v21, 0.0  ;;  %v5491_v13 = vadd.f32 %v12126_v31, %v5490_v34  ;;  %9768 = vmatprep.mubr.msk.f32.mxu1 %vm214_vm1, %v12437_v20  ;;  %v12456_v43 = vadd.f32 %v5520_v4, %v12372_v57 }
0x236c   :  { %v9759_v14 = vpop.f32.mrf.mxu0  ;;  %9769 = vmatmul.mubr.msk.f32.vlgmr.msra.gmra.mxu1 %vm214_vm1, %v12441_v38 }
0x236d   :  { %v12451_v25 = vadd.f32 %v5519_v32, %v12378_v7  ;;  %v5513_v37 = vmax.f32 %v5491_v13, 0.0  ;;  %v5506_v27 = vadd.f32 %v12126_v31, %v9759_v14  ;;  %9797 = vmatpush3.msra.mxu1 %v12005_v50  ;;  %v5522_v33 = vmul.f32 %v5514_v2, %v12233_v6 }
0x236e   :  { %v5500_v62 = vpop.f32.mrf.mxu0  ;;  %9798 = vmatprep.subr.mxu1 %v12015_v19  ;;  %v12582_v2 = vstv %s5672_s17 }
0x236f   :  { %v5521_v45 = vmul.f32 %v5513_v37, %v12233_v6  ;;  %v5516_v10 = vmax.f32 %v5506_v27, 0.0  ;;  %v5501_v3 = vadd.f32 %v12126_v31, %v5500_v62  ;;  %9771 = vmatprep.mubr.msk.f32.mxu1 %vm214_vm1, %v12451_v25  ;;  %9799 = vmatpush3.msra.mxu1 %v12015_v19  ;;  %v12474_v24 = vadd.f32 %v5522_v33, %v12381_v44 }
0x2370   :  { %9772 = vmatmul.mubr.msk.f32.gmra.mxu1 %vm214_vm1, %v12456_v43  ;;  %9800 = vmatprep.subr.mxu1 %v12028_v18 }
0x2371   :  { %v12469_v57 = vadd.f32 %v5521_v45, %v12387_v63  ;;  %v5524_v7 = vmul.f32 %v5516_v10, %v12233_v6  ;;  %v5515_v30 = vmax.f32 %v5501_v3, 0.0  ;;  %9801 = vmatpush3.msra.mxu1 %v12028_v18 }
0x2372   :  { %9802 = vmatprep.subr.mxu1 %v12224_v54 }
0x2373   :  { %v5523_v23 = vmul.f32 %v5515_v30, %v12233_v6  ;;  %9774 = vmatprep.mubr.msk.f32.mxu1 %vm214_vm1, %v12469_v57  ;;  %9803 = vmatpush3.msra.mxu1 %v12224_v54  ;;  %v12485_v63 = vadd.f32 %v5524_v7, %v12391_v11  ;;  %v5677_v39 = vpack.c.bf16 %v12474_v24, %v12469_v57 }
0x2374   :  { %9775 = vmatmul.mubr.msk.f32.gmra.mxu1 %vm214_vm1, %v12474_v24  ;;  %9832 = vmatprep.subr.mxu1 %v12005_v50  ;;  %v5676_v11 = vpack.c.bf16 %v12456_v43, %v12451_v25 }
0x2375   :  { %v12488_v44 = vadd.f32 %v5523_v23, %v12397_v29  ;;  %v5675_v29 = vpack.c.bf16 %v12441_v38, %v12437_v20 }
0x2377   :  { %9777 = vmatprep.mubr.msk.f32.mxu1 %vm214_vm1, %v12488_v44  ;;  %v5678_v6 = vpack.c.bf16 %v12485_v63, %v12488_v44 }
0x2378   :  { %9778 = vmatmul.mubr.msk.f32.gmra.mxu1 %vm214_vm1, %v12485_v63 }
0x2379   :  { %9780 = vmatprep.subr.bf16.mxu0 %v5678_v6 }
0x237a   :  { %9781 = vmatpush3.bf16.msra.mxu0 %v5678_v6 }
0x237b   :  { %9782 = vmatprep.subr.bf16.mxu0 %v5677_v39 }
0x237e   :  { %9783 = vmatpush3.bf16.msra.mxu0 %v5677_v39 }
0x237f   :  { %9784 = vmatprep.subr.bf16.mxu0 %v5676_v11 }
0x2382   :  { %9785 = vmatpush3.bf16.msra.mxu0 %v5676_v11 }
0x2383   :  { %9786 = vmatprep.subr.bf16.mxu0 %v5675_v29 }
0x2386   :  { %9787 = vmatpush3.bf16.msra.mxu0 %v5675_v29 }
0x2389   :  { %9789 = vmatmul.mubr.msk.bf16.vlgmr.msra.gmra.mxu0 %vm395_vm2, %v12326_v41 }
0x238a   :  { %9792 = vmatprep.mubr.msk.bf16.mxu0 %vm395_vm2, %v12333_v1 }
0x2391   :  { %9793 = vmatmul.mubr.msk.bf16.gmra.mxu0 %vm395_vm2, %v12200_v58 }
0x2392   :  { %9824 = vmatprep.mubr.msk.bf16.mxu0 %vm395_vm2, %v12207_v59 }
0x242c   :  { %v9770_v48 = vpop.f32.mrf.mxu1 }
0x242d   :  { %8156 = vst.msk [vmem:[%s13390_s10 + $0xc8] sm:$0xff] %vm65_vm0, %v9770_v48 }
0x242e   :  { %v5623_v26 = vpop.f32.mrf.mxu1 }
0x242f   :  { %8155 = vst.msk [vmem:[%s13390_s10 + $0xc0] sm:$0xff] %vm65_vm0, %v5623_v26 }
0x2430   :  { %v9773_v12 = vpop.f32.mrf.mxu1 }
0x2431   :  { %8158 = vst.msk [vmem:[%s13390_s10 + $0xd8] sm:$0xff] %vm65_vm0, %v9773_v12 }
0x2432   :  { %v5633_v0 = vpop.f32.mrf.mxu1 }
0x2433   :  { %8157 = vst.msk [vmem:[%s13390_s10 + $0xd0] sm:$0xff] %vm65_vm0, %v5633_v0 }
0x2434   :  { %v9776_v42 = vpop.f32.mrf.mxu1 }
0x2435   :  { %8160 = vst.msk [vmem:[%s13390_s10 + $0xe8] sm:$0xff] %vm65_vm0, %v9776_v42 }
0x2436   :  { %v5643_v17 = vpop.f32.mrf.mxu1 }
0x2437   :  { %8159 = vst.msk [vmem:[%s13390_s10 + $0xe0] sm:$0xff] %vm65_vm0, %v5643_v17 }
0x2438   :  { %v9779_v9 = vpop.f32.mrf.mxu1 }
0x2439   :  { %8162 = vst.msk [vmem:[%s13390_s10 + $0xf8] sm:$0xff] %vm65_vm0, %v9779_v9 }
0x243a   :  { %v5653_v55 = vpop.f32.mrf.mxu1 }
0x243b   :  { %8161 = vst.msk [vmem:[%s13390_s10 + $0xf0] sm:$0xff] %vm65_vm0, %v5653_v55 }
0x2449   :  { %v9790_v28 = vpop.f32.mrf.mxu0 }
0x244b   :  { %v5713_v53 = vpop.f32.mrf.mxu0 }
0x244c   :  { %9804 = vmatprep.mubr.msk.f32.mxu1 %vm214_vm1, %v5713_v53 }
0x244d   :  { %v9791_v51 = vpop.f32.mrf.mxu0 }
0x244f   :  { %v5716_v49 = vpop.f32.mrf.mxu0 }
0x2450   :  { %9805 = vmatmul.mubr.msk.f32.vlgmr.msra.gmra.mxu1 %vm214_vm1, %v5716_v49 }
0x2451   :  { %v9794_v16 = vpop.f32.mrf.mxu0  ;;  %9807 = vmatprep.mubr.msk.f32.mxu1 %vm214_vm1, %v9790_v28  ;;  %9833 = vmatpush3.msra.mxu1 %v12005_v50 }
0x2452   :  { %9834 = vmatprep.subr.mxu1 %v12015_v19 }
0x2453   :  { %v5729_v22 = vpop.f32.mrf.mxu0  ;;  %9835 = vmatpush3.msra.mxu1 %v12015_v19 }
0x2454   :  { %9808 = vmatmul.mubr.msk.f32.gmra.mxu1 %vm214_vm1, %v9791_v51  ;;  %9836 = vmatprep.subr.mxu1 %v12028_v18 }
0x2455   :  { %v9795_v35 = vpop.f32.mrf.mxu0  ;;  %9810 = vmatprep.mubr.msk.f32.mxu1 %vm214_vm1, %v5729_v22  ;;  %9837 = vmatpush3.msra.mxu1 %v12028_v18 }
0x2456   :  { %9838 = vmatprep.subr.mxu1 %v12224_v54 }
0x2457   :  { %v5732_v60 = vpop.f32.mrf.mxu0  ;;  %9839 = vmatpush3.msra.mxu1 %v12224_v54 }
0x2458   :  { %9811 = vmatmul.mubr.msk.f32.gmra.mxu1 %vm214_vm1, %v5732_v60  ;;  %9868 = vmatprep.subr.mxu1 %v12005_v50 }
0x2459   :  { %9813 = vmatprep.mubr.msk.f32.mxu1 %vm214_vm1, %v9794_v16 }
0x245c   :  { %9814 = vmatmul.mubr.msk.f32.gmra.mxu1 %vm214_vm1, %v9795_v35 }
0x2510   :  { %v9806_v19 = vpop.f32.mrf.mxu1 }
0x2511   :  { %v12596_v62 = vadd.f32 %v12126_v31, %v9806_v19  ;;  %v12639_v19 = vld [vmem:[%s13387_s7 + $0x18] sm:$0xff] }
0x2512   :  { %v5834_v40 = vpop.f32.mrf.mxu1 }
0x2513   :  { %v12585_v13 = vadd.f32 %v12126_v31, %v5834_v40  ;;  %v5874_v11 = vmax.f32 %v12596_v62, 0.0  ;;  %v12653_v40 = vld [vmem:[%s13387_s7 + $0x8] sm:$0xff] }
0x2514   :  { %v9809_v46 = vpop.f32.mrf.mxu1 }
0x2515   :  { %v12575_v21 = vadd.f32 %v12126_v31, %v9809_v46  ;;  %v5873_v7 = vmax.f32 %v12585_v13, 0.0  ;;  %v5900_v17 = vmul.f32 %v12582_v2, %v5874_v11 }
0x2516   :  { %v5844_v18 = vpop.f32.mrf.mxu1 }
0x2517   :  { %v12571_v52 = vadd.f32 %v12126_v31, %v5844_v18  ;;  %v5876_v45 = vmax.f32 %v12575_v21, 0.0  ;;  %v5899_v12 = vmul.f32 %v12582_v2, %v5873_v7  ;;  %v5908_v53 = vadd.f32 %v5900_v17, %v12441_v38 }
0x2518   :  { %v9812_v61 = vpop.f32.mrf.mxu1 }
0x2519   :  { %v12564_v56 = vadd.f32 %v12126_v31, %v9812_v61  ;;  %v5875_v14 = vmax.f32 %v12571_v52, 0.0  ;;  %v5902_v29 = vmul.f32 %v12582_v2, %v5876_v45  ;;  %v5907_v55 = vadd.f32 %v5899_v12, %v12437_v20 }
0x251a   :  { %v5854_v47 = vpop.f32.mrf.mxu1  ;;  %v12665_v61 = vstv %s5673_s4 }
0x251b   :  { %v12561_v15 = vadd.f32 %v12126_v31, %v5854_v47  ;;  %v5878_v4 = vmax.f32 %v12564_v56, 0.0  ;;  %v5901_v30 = vmul.f32 %v12582_v2, %v5875_v14  ;;  %v5910_v9 = vadd.f32 %v5902_v29, %v12456_v43 }
0x251c   :  { %v9815_v50 = vpop.f32.mrf.mxu1  ;;  %v5915_v51 = vpack.c.bf16 %v5908_v53, %v5907_v55  ;;  %v5885_v13 = vmul.f32 %v12665_v61, %v5876_v45 }
0x251d   :  { %v12568_v36 = vadd.f32 %v12126_v31, %v9815_v50  ;;  %v5877_v5 = vmax.f32 %v12561_v15, 0.0  ;;  %v5904_v10 = vmul.f32 %v12582_v2, %v5878_v4  ;;  %v5909_v0 = vadd.f32 %v5901_v30, %v12451_v25 }
0x251e   :  { %v5864_v8 = vpop.f32.mrf.mxu1  ;;  %v5883_v50 = vmul.f32 %v12665_v61, %v5874_v11  ;;  %v5887_v12 = vmul.f32 %v12665_v61, %v5878_v4  ;;  %v12712_v4 = vld [vmem:[%s13388_s8] ss:$0 sm:$0xff] }
0x251f   :  { %v5880_v34 = vmax.f32 %v12568_v36, 0.0  ;;  %v12580_v32 = vadd.f32 %v12126_v31, %v5864_v8  ;;  %v5903_v37 = vmul.f32 %v12582_v2, %v5877_v5  ;;  %v5912_v48 = vadd.f32 %v5904_v10, %v12474_v24 }
0x2520   :  { %v5916_v28 = vpack.c.bf16 %v5910_v9, %v5909_v0  ;;  %v5891_v30 = vadd.f32 %v5883_v50, %v12441_v38  ;;  %v5893_v9 = vadd.f32 %v5885_v13, %v12456_v43  ;;  %v5886_v56 = vmul.f32 %v12665_v61, %v5877_v5 }
0x2521   :  { %v5906_v27 = vmul.f32 %v12582_v2, %v5880_v34  ;;  %v5879_v33 = vmax.f32 %v12580_v32, 0.0  ;;  %v5911_v23 = vadd.f32 %v5903_v37, %v12469_v57  ;;  %v12672_v37 = vstv %s5674_s5 }
0x2522   :  { %v5889_v15 = vmul.f32 %v12665_v61, %v5880_v34 }
0x2523   :  { %v5905_v3 = vmul.f32 %v12582_v2, %v5879_v33  ;;  %v5914_v6 = vadd.f32 %v5906_v27, %v12485_v63  ;;  %v5917_v42 = vpack.c.bf16 %v5912_v48, %v5911_v23  ;;  %v5882_v27 = vmul.f32 %v12665_v61, %v5873_v7 }
0x2525   :  { %v5913_v39 = vadd.f32 %v5905_v3, %v12488_v44  ;;  %v5890_v11 = vadd.f32 %v5882_v27, %v12437_v20  ;;  %v5897_v27 = vadd.f32 %v5889_v15, %v12485_v63 }
0x2527   :  { %v5918_v26 = vpack.c.bf16 %v5914_v6, %v5913_v39 }
0x2529   :  { %9816 = vmatprep.subr.bf16.mxu0 %v5918_v26 }
0x252a   :  { %9817 = vmatpush3.bf16.msra.mxu0 %v5918_v26  ;;  %v5884_v26 = vmul.f32 %v12665_v61, %v5875_v14 }
0x252b   :  { %9818 = vmatprep.subr.bf16.mxu0 %v5917_v42 }
0x252e   :  { %9819 = vmatpush3.bf16.msra.mxu0 %v5917_v42 }
0x252f   :  { %9820 = vmatprep.subr.bf16.mxu0 %v5916_v28 }
0x2532   :  { %9821 = vmatpush3.bf16.msra.mxu0 %v5916_v28 }
0x2533   :  { %9822 = vmatprep.subr.bf16.mxu0 %v5915_v51 }
0x2536   :  { %9823 = vmatpush3.bf16.msra.mxu0 %v5915_v51  ;;  %v5895_v51 = vadd.f32 %v5887_v12, %v12474_v24 }
0x2539   :  { %9825 = vmatmul.mubr.msk.bf16.vlgmr.msra.gmra.mxu0 %vm395_vm2, %v12326_v41 }
0x253a   :  { %9828 = vmatprep.mubr.msk.bf16.mxu0 %vm395_vm2, %v12333_v1 }
0x2541   :  { %9829 = vmatmul.mubr.msk.bf16.gmra.mxu0 %vm395_vm2, %v12200_v58  ;;  %v12645_v58 = vld [vmem:[%s13387_s7 + $0x10] sm:$0xff] }
0x2542   :  { %9860 = vmatprep.mubr.msk.bf16.mxu0 %vm395_vm2, %v12207_v59 }
0x25f9   :  { %v9826_v49 = vpop.f32.mrf.mxu0 }
0x25fb   :  { %v5953_v16 = vpop.f32.mrf.mxu0 }
0x25fc   :  { %9840 = vmatprep.mubr.msk.f32.mxu1 %vm214_vm1, %v5953_v16 }
0x25fd   :  { %v9827_v22 = vpop.f32.mrf.mxu0 }
0x25ff   :  { %v5956_v35 = vpop.f32.mrf.mxu0 }
0x2600   :  { %9841 = vmatmul.mubr.msk.f32.vlgmr.msra.gmra.mxu1 %vm214_vm1, %v5956_v35 }
0x2601   :  { %v9830_v60 = vpop.f32.mrf.mxu0  ;;  %9843 = vmatprep.mubr.msk.f32.mxu1 %vm214_vm1, %v9826_v49  ;;  %9869 = vmatpush3.msra.mxu1 %v12639_v19 }
0x2602   :  { %9870 = vmatprep.subr.mxu1 %v12645_v58 }
0x2603   :  { %v5969_v59 = vpop.f32.mrf.mxu0  ;;  %9871 = vmatpush3.msra.mxu1 %v12645_v58 }
0x2604   :  { %9844 = vmatmul.mubr.msk.f32.gmra.mxu1 %vm214_vm1, %v9827_v22  ;;  %9872 = vmatprep.subr.mxu1 %v12653_v40 }
0x2605   :  { %v9831_v46 = vpop.f32.mrf.mxu0  ;;  %9846 = vmatprep.mubr.msk.f32.mxu1 %vm214_vm1, %v5969_v59  ;;  %9873 = vmatpush3.msra.mxu1 %v12653_v40 }
0x2606   :  { %9874 = vmatprep.subr.mxu1 %v12224_v54 }
0x2607   :  { %v5972_v18 = vpop.f32.mrf.mxu0  ;;  %9875 = vmatpush3.msra.mxu1 %v12224_v54 }
0x2608   :  { %9847 = vmatmul.mubr.msk.f32.gmra.mxu1 %vm214_vm1, %v5972_v18  ;;  %9904 = vmatprep.subr.mxu1 %v12639_v19  ;;  %v5894_v18 = vadd.f32 %v5886_v56, %v12469_v57 }
0x2609   :  { %9849 = vmatprep.mubr.msk.f32.mxu1 %vm214_vm1, %v9830_v60 }
0x260c   :  { %9850 = vmatmul.mubr.msk.f32.gmra.mxu1 %vm214_vm1, %v9831_v46 }
0x26c0   :  { %v9842_v47 = vpop.f32.mrf.mxu1 }
0x26c1   :  { %v12670_v8 = vadd.f32 %v12126_v31, %v9842_v47  ;;  %v5888_v47 = vmul.f32 %v12665_v61, %v5879_v33 }
0x26c2   :  { %v6074_v54 = vpop.f32.mrf.mxu1 }
0x26c3   :  { %v6114_v62 = vmax.f32 %v12670_v8, 0.0  ;;  %v12679_v10 = vadd.f32 %v12126_v31, %v6074_v54  ;;  %v5896_v33 = vadd.f32 %v5888_v47, %v12488_v44  ;;  %v12777_v8 = vld [vmem:[%s13382_s2] sm:$0xff]  }
0x26c4   :  { %v9845_v3 = vpop.f32.mrf.mxu1 }
0x26c5   :  { %v6123_v23 = vmul.f32 %v12672_v37, %v6114_v62  ;;  %v6113_v6 = vmax.f32 %v12679_v10, 0.0  ;;  %v6090_v39 = vadd.f32 %v12126_v31, %v9845_v3 }
0x26c6   :  { %v6084_v7 = vpop.f32.mrf.mxu1 }
0x26c7   :  { %v12691_v29 = vadd.f32 %v6123_v23, %v5891_v30  ;;  %v6122_v48 = vmul.f32 %v12672_v37, %v6113_v6  ;;  %v6116_v0 = vmax.f32 %v6090_v39, 0.0  ;;  %v6085_v21 = vadd.f32 %v12126_v31, %v6084_v7 }
0x26c8   :  { %v9848_v42 = vpop.f32.mrf.mxu1 }
0x26c9   :  { %v12701_v45 = vadd.f32 %v6122_v48, %v5890_v11  ;;  %v6100_v17 = vadd.f32 %v12126_v31, %v9848_v42  ;;  %v6125_v55 = vmul.f32 %v12672_v37, %v6116_v0  ;;  %v6115_v28 = vmax.f32 %v6085_v21, 0.0 }
0x26ca   :  { %v6094_v52 = vpop.f32.mrf.mxu1  ;;  %v5892_v31 = vadd.f32 %v5884_v26, %v12451_v25 }
0x26cb   :  { %v6118_v14 = vmax.f32 %v6100_v17, 0.0  ;;  %v6095_v53 = vadd.f32 %v12712_v4, %v6094_v52  ;;  %v12717_v49 = vadd.f32 %v6125_v55, %v5893_v9  ;;  %v6124_v16 = vmul.f32 %v12672_v37, %v6115_v28 }
0x26cc   :  { %v9851_v22 = vpop.f32.mrf.mxu1  ;;  %v6140_v48 = vmul.f32 %v6115_v28, %v12582_v2  ;;  %v6141_v17 = vmul.f32 %v6116_v0, %v12582_v2  ;;  %v6138_v52 = vmul.f32 %v6113_v6, %v12582_v2  ;;  %v6139_v28 = vmul.f32 %v6114_v62, %v12582_v2 }
0x26cd   :  { %v6127_v5 = vmul.f32 %v12672_v37, %v6118_v14  ;;  %v6117_v35 = vmax.f32 %v6095_v53, 0.0  ;;  %v6110_v60 = vadd.f32 %v12712_v4, %v9851_v22  ;;  %v12725_v59 = vadd.f32 %v6124_v16, %v5892_v31 }
0x26ce   :  { %v6104_v46 = vpop.f32.mrf.mxu1  ;;  %v6143_v39 = vmul.f32 %v6118_v14, %v12582_v2  ;;  %v6148_v56 = vadd.f32 %v6140_v48, %v12451_v25  ;;  %v6149_v53 = vadd.f32 %v6141_v17, %v12456_v43  ;;  %v6146_v31 = vadd.f32 %v6138_v52, %v12437_v20 }
0x26cf   :  { %v12731_v50 = vadd.f32 %v6127_v5, %v5895_v51  ;;  %v6126_v36 = vmul.f32 %v12672_v37, %v6117_v35  ;;  %v6120_v54 = vmax.f32 %v6110_v60, 0.0  ;;  %v6105_v34 = vadd.f32 %v12712_v4, %v6104_v46  ;;  %v12794_v46 = vld [vmem:[%s13387_s7] sm:$0xff] }
0x26d0   :  { %v6142_v3 = vmul.f32 %v6117_v35, %v12582_v2  ;;  %v6151_v9 = vadd.f32 %v6143_v39, %v12474_v24  ;;  %v6155_v0 = vpack.c.bf16 %v6149_v53, %v6148_v56  ;;  %v6147_v51 = vadd.f32 %v6139_v28, %v12441_v38 }
0x26d1   :  { %v12736_v10 = vadd.f32 %v6126_v36, %v5894_v18  ;;  %v6129_v30 = vmul.f32 %v12672_v37, %v6120_v54  ;;  %v6145_v23 = vmul.f32 %v6120_v54, %v12582_v2  ;;  %v6119_v32 = vmax.f32 %v6105_v34, 0.0 }
0x26d2   :  { %v6150_v26 = vadd.f32 %v6142_v3, %v12469_v57  ;;  %v6154_v6 = vpack.c.bf16 %v6147_v51, %v6146_v31 }
0x26d3   :  { %v12743_v13 = vadd.f32 %v6129_v30, %v5897_v27  ;;  %v6128_v7 = vmul.f32 %v12672_v37, %v6119_v32  ;;  %v6144_v11 = vmul.f32 %v6119_v32, %v12582_v2  ;;  %v6153_v12 = vadd.f32 %v6145_v23, %v12485_v63  ;;  %v12770_v2 = vld [vmem:[%s13382_s2 + $0x18] sm:$0xff]  }
0x26d4   :  { %v6156_v14 = vpack.c.bf16 %v6151_v9, %v6150_v26 }
0x26d5   :  { %v12750_v21 = vadd.f32 %v6128_v7, %v5896_v33  ;;  %v6152_v42 = vadd.f32 %v6144_v11, %v12488_v44 }
0x26d7   :  { %v6157_v55 = vpack.c.bf16 %v6153_v12, %v6152_v42 }
0x26d9   :  { %9852 = vmatprep.subr.bf16.mxu0 %v6157_v55 }
0x26da   :  { %9853 = vmatpush3.bf16.msra.mxu0 %v6157_v55 }
0x26db   :  { %9854 = vmatprep.subr.bf16.mxu0 %v6156_v14 }
0x26de   :  { %9855 = vmatpush3.bf16.msra.mxu0 %v6156_v14 }
0x26df   :  { %9856 = vmatprep.subr.bf16.mxu0 %v6155_v0 }
0x26e2   :  { %9857 = vmatpush3.bf16.msra.mxu0 %v6155_v0 }
0x26e3   :  { %9858 = vmatprep.subr.bf16.mxu0 %v6154_v6 }
0x26e6   :  { %9859 = vmatpush3.bf16.msra.mxu0 %v6154_v6 }
0x26e9   :  { %9861 = vmatmul.mubr.msk.bf16.vlgmr.msra.gmra.mxu0 %vm395_vm2, %v12326_v41 }
0x26ea   :  { %9864 = vmatprep.mubr.msk.bf16.mxu0 %vm395_vm2, %v12333_v1 }
0x26f1   :  { %9865 = vmatmul.mubr.msk.bf16.gmra.mxu0 %vm395_vm2, %v12770_v2 }
0x26f2   :  { %9896 = vmatprep.mubr.msk.bf16.mxu0 %vm395_vm2, %v12777_v8 }
0x27a9   :  { %v9862_v62 = vpop.f32.mrf.mxu0 }
0x27ab   :  { %v6192_v16 = vpop.f32.mrf.mxu0 }
0x27ac   :  { %9876 = vmatprep.mubr.msk.f32.mxu1 %vm214_vm1, %v6192_v16 }
0x27ad   :  { %v9863_v22 = vpop.f32.mrf.mxu0 }
0x27af   :  { %v6195_v15 = vpop.f32.mrf.mxu0 }
0x27b0   :  { %9877 = vmatmul.mubr.msk.f32.vlgmr.msra.gmra.mxu1 %vm214_vm1, %v6195_v15 }
0x27b1   :  { %v9866_v5 = vpop.f32.mrf.mxu0  ;;  %9879 = vmatprep.mubr.msk.f32.mxu1 %vm214_vm1, %v9862_v62  ;;  %9905 = vmatpush3.msra.mxu1 %v12639_v19 }
0x27b2   :  { %9906 = vmatprep.subr.mxu1 %v12645_v58 }
0x27b3   :  { %v6208_v35 = vpop.f32.mrf.mxu0  ;;  %9907 = vmatpush3.msra.mxu1 %v12645_v58 }
0x27b4   :  { %9880 = vmatmul.mubr.msk.f32.gmra.mxu1 %vm214_vm1, %v9863_v22  ;;  %9908 = vmatprep.subr.mxu1 %v12653_v40  ;;  %v6376_v22 = vstv %s12558_s16 }
0x27b5   :  { %v9867_v60 = vpop.f32.mrf.mxu0  ;;  %9882 = vmatprep.mubr.msk.f32.mxu1 %vm214_vm1, %v6208_v35  ;;  %9909 = vmatpush3.msra.mxu1 %v12653_v40 }
0x27b6   :  { %9910 = vmatprep.subr.mxu1 %v12794_v46 }
0x27b7   :  { %v6211_v18 = vpop.f32.mrf.mxu0  ;;  %9911 = vmatpush3.msra.mxu1 %v12794_v46 }
0x27b8   :  { %9883 = vmatmul.mubr.msk.f32.gmra.mxu1 %vm214_vm1, %v6211_v18 }
0x27b9   :  { %9885 = vmatprep.mubr.msk.f32.mxu1 %vm214_vm1, %v9866_v5 }
0x27bc   :  { %9886 = vmatmul.mubr.msk.f32.gmra.mxu1 %vm214_vm1, %v9867_v60 }
0x2870   :  { %v9878_v47 = vpop.f32.mrf.mxu1 }
0x2871   :  { %v6319_v36 = vadd.f32 %v12712_v4, %v9878_v47 }
0x2872   :  { %v6313_v54 = vpop.f32.mrf.mxu1 }
0x2873   :  { %v6353_v34 = vmax.f32 %v6319_v36, 0.0  ;;  %v6314_v27 = vadd.f32 %v12712_v4, %v6313_v54 }
0x2874   :  { %v9881_v3 = vpop.f32.mrf.mxu1 }
0x2875   :  { %v6361_v30 = vmul.f32 %v6353_v34, %v12672_v37  ;;  %v6352_v23 = vmax.f32 %v6314_v27, 0.0  ;;  %v6329_v32 = vadd.f32 %v12712_v4, %v9881_v3 }
0x2876   :  { %v6323_v33 = vpop.f32.mrf.mxu1 }
0x2877   :  { %v12806_v39 = vadd.f32 %v6361_v30, %v12691_v29  ;;  %v6360_v7 = vmul.f32 %v6352_v23, %v12672_v37  ;;  %v6355_v11 = vmax.f32 %v6329_v32, 0.0  ;;  %v6324_v48 = vadd.f32 %v12712_v4, %v6323_v33 }
0x2878   :  { %v9884_v26 = vpop.f32.mrf.mxu1 }
0x2879   :  { %v12811_v12 = vadd.f32 %v6360_v7, %v12701_v45  ;;  %v6339_v42 = vadd.f32 %v12712_v4, %v9884_v26  ;;  %v6363_v17 = vmul.f32 %v6355_v11, %v12672_v37  ;;  %v6354_v9 = vmax.f32 %v6324_v48, 0.0 }
0x287a   :  { %v6333_v55 = vpop.f32.mrf.mxu1  ;;  %v6380_v32 = vmul.f32 %v6376_v22, %v6355_v11  ;;  %v6377_v48 = vmul.f32 %v6376_v22, %v6352_v23  ;;  %v6378_v26 = vmul.f32 %v6376_v22, %v6353_v34 }
0x287b   :  { %v6357_v52 = vmax.f32 %v6339_v42, 0.0  ;;  %v6334_v29 = vadd.f32 %v12712_v4, %v6333_v55  ;;  %v12817_v56 = vadd.f32 %v6363_v17, %v12717_v49  ;;  %v6362_v14 = vmul.f32 %v6354_v9, %v12672_v37 }
0x287c   :  { %v9887_v28 = vpop.f32.mrf.mxu1  ;;  %v6379_v54 = vmul.f32 %v6376_v22, %v6354_v9 }
0x287d   :  { %v6365_v53 = vmul.f32 %v6357_v52, %v12672_v37  ;;  %v6356_v45 = vmax.f32 %v6334_v29, 0.0  ;;  %v6349_v31 = vadd.f32 %v12712_v4, %v9887_v28  ;;  %v12823_v0 = vadd.f32 %v6362_v14, %v12725_v59 }
0x287e   :  { %v6343_v51 = vpop.f32.mrf.mxu1  ;;  %v6382_v59 = vmul.f32 %v6376_v22, %v6357_v52 }
0x287f   :  { %v12826_v6 = vadd.f32 %v6365_v53, %v12731_v50  ;;  %v6364_v62 = vmul.f32 %v6356_v45, %v12672_v37  ;;  %v6359_v16 = vmax.f32 %v6349_v31, 0.0  ;;  %v6344_v49 = vadd.f32 %v12712_v4, %v6343_v51 }
0x2880   :  { %v6381_v5 = vmul.f32 %v6376_v22, %v6356_v45  ;;  %v6390_v33 = vadd.f32 %v6382_v59, %v12474_v24 }
0x2881   :  { %v12832_v15 = vadd.f32 %v6364_v62, %v12736_v10  ;;  %v6367_v35 = vmul.f32 %v6359_v16, %v12672_v37  ;;  %v6384_v60 = vmul.f32 %v6376_v22, %v6359_v16  ;;  %v6358_v18 = vmax.f32 %v6344_v49, 0.0 }
0x2882   :  { %v6389_v27 = vadd.f32 %v6381_v5, %v12469_v57  ;;  %v6388_v57 = vadd.f32 %v6380_v32, %v12456_v43 }
0x2883   :  { %v12836_v47 = vadd.f32 %v6367_v35, %v12743_v13  ;;  %v6366_v50 = vmul.f32 %v6358_v18, %v12672_v37  ;;  %v6383_v36 = vmul.f32 %v6376_v22, %v6358_v18  ;;  %v6392_v3 = vadd.f32 %v6384_v60, %v12485_v63 }
0x2884   :  { %v6387_v13 = vadd.f32 %v6379_v54, %v12451_v25  ;;  %v6395_v37 = vpack.c.bf16 %v6390_v33, %v6389_v27  ;;  %v6385_v63 = vadd.f32 %v6377_v48, %v12437_v20  ;;  %v12853_v25 = vld [vmem:[%s13389_s9 + $0x18] sm:$0xff]  ;;  %v12864_v20 = vld [vmem:[%s13389_s9 + $0x10] sm:$0xff] }
0x2885   :  { %v12842_v10 = vadd.f32 %v6366_v50, %v12750_v21  ;;  %v6391_v30 = vadd.f32 %v6383_v36, %v12488_v44  ;;  %v6386_v44 = vadd.f32 %v6378_v26, %v12441_v38  ;;  %v12871_v38 = vld [vmem:[%s13389_s9 + $0x8] sm:$0xff] }
0x2886   :  { %v6394_v21 = vpack.c.bf16 %v6388_v57, %v6387_v13 }
0x2887   :  { %v6396_v7 = vpack.c.bf16 %v6392_v3, %v6391_v30  ;;  %v6393_v11 = vpack.c.bf16 %v6386_v44, %v6385_v63 }
0x2889   :  { %9888 = vmatprep.subr.bf16.mxu0 %v6396_v7 }
0x288a   :  { %9889 = vmatpush3.bf16.msra.mxu0 %v6396_v7 }
0x288b   :  { %9890 = vmatprep.subr.bf16.mxu0 %v6395_v37 }
0x288e   :  { %9891 = vmatpush3.bf16.msra.mxu0 %v6395_v37 }
0x288f   :  { %9892 = vmatprep.subr.bf16.mxu0 %v6394_v21 }
0x2892   :  { %9893 = vmatpush3.bf16.msra.mxu0 %v6394_v21 }
0x2893   :  { %9894 = vmatprep.subr.bf16.mxu0 %v6393_v11 }
0x2896   :  { %9895 = vmatpush3.bf16.msra.mxu0 %v6393_v11  ;;  %v12970_v11 = vld [vmem:[%s13382_s2 + $0x8] sm:$0xff]  }
0x2897   :  { %9924 = vmatprep.subr.mxu0 %v12853_v25 }
0x2899   :  { %9897 = vmatmul.mubr.msk.bf16.vlgmr.msra.gmra.mxu0 %vm395_vm2, %v12326_v41  ;;  %v12878_v41 = vld [vmem:[%s13389_s9] sm:$0xff] }
0x289a   :  { %9900 = vmatprep.mubr.msk.bf16.mxu0 %vm395_vm2, %v12333_v1  ;;  %9925 = vmatpush3.msra.mxu0 %v12853_v25 }
0x289b   :  { %9926 = vmatprep.subr.mxu0 %v12864_v20 }
0x289c   :  { %9927 = vmatpush3.msra.mxu0 %v12864_v20 }
0x289d   :  { %9928 = vmatprep.subr.mxu0 %v12871_v38 }
0x289e   :  { %9929 = vmatpush3.msra.mxu0 %v12871_v38 }
0x289f   :  { %9930 = vmatprep.subr.mxu0 %v12878_v41 }
0x28a0   :  { %9931 = vmatpush3.msra.mxu0 %v12878_v41 }
0x28a1   :  { %9901 = vmatmul.mubr.msk.bf16.gmra.mxu0 %vm395_vm2, %v12770_v2  ;;  %9960 = vmatprep.subr.mxu0 %v12639_v19 }
0x2959   :  { %v9898_v1 = vpop.f32.mrf.mxu0 }
0x295b   :  { %v6431_v43 = vpop.f32.mrf.mxu0 }
0x295c   :  { %9912 = vmatprep.mubr.msk.f32.mxu1 %vm214_vm1, %v6431_v43 }
0x295d   :  { %v9899_v24 = vpop.f32.mrf.mxu0 }
0x295f   :  { %v6434_v34 = vpop.f32.mrf.mxu0 }
0x2960   :  { %9913 = vmatmul.mubr.msk.f32.vlgmr.msra.gmra.mxu1 %vm214_vm1, %v6434_v34 }
0x2961   :  { %v9902_v23 = vpop.f32.mrf.mxu0  ;;  %9915 = vmatprep.mubr.msk.f32.mxu1 %vm214_vm1, %v9898_v1  ;;  %v12977_v1 = vld [vmem:[%s13382_s2 + $0x10] sm:$0xff]  }
0x2963   :  { %v6447_v42 = vpop.f32.mrf.mxu0 }
0x2964   :  { %9916 = vmatmul.mubr.msk.f32.gmra.mxu1 %vm214_vm1, %v9899_v24 }
0x2965   :  { %v9903_v17 = vpop.f32.mrf.mxu0  ;;  %9918 = vmatprep.mubr.msk.f32.mxu1 %vm214_vm1, %v6447_v42 }
0x2967   :  { %v6450_v9 = vpop.f32.mrf.mxu0 }
0x2968   :  { %9919 = vmatmul.mubr.msk.f32.gmra.mxu1 %vm214_vm1, %v6450_v9 }
0x2969   :  { %9921 = vmatprep.mubr.msk.f32.mxu1 %vm214_vm1, %v9902_v23 }
0x296c   :  { %9922 = vmatmul.mubr.msk.f32.gmra.mxu1 %vm214_vm1, %v9903_v17 }
0x296d   :  { %9952 = vmatprep.mubr.msk.bf16.mxu1 %vm395_vm2, %v12777_v8 }
0x2a20   :  { %v9914_v55 = vpop.f32.mrf.mxu1 }
0x2a21   :  { %v6558_v52 = vadd.f32 %v12712_v4, %v9914_v55 }
0x2a22   :  { %v6552_v29 = vpop.f32.mrf.mxu1 }
0x2a23   :  { %v6592_v14 = vmax.f32 %v6558_v52, 0.0  ;;  %v6553_v28 = vadd.f32 %v12712_v4, %v6552_v29 }
0x2a24   :  { %v9917_v53 = vpop.f32.mrf.mxu1 }
0x2a25   :  { %v6591_v45 = vmax.f32 %v6553_v28, 0.0  ;;  %v6568_v31 = vadd.f32 %v12712_v4, %v9917_v53  ;;  %v6600_v51 = vmul.f32 %v6592_v14, %v12665_v61 }
0x2a26   :  { %v6562_v62 = vpop.f32.mrf.mxu1 }
0x2a27   :  { %v6599_v16 = vmul.f32 %v6591_v45, %v12665_v61  ;;  %v6594_v49 = vmax.f32 %v6568_v31, 0.0  ;;  %v6563_v22 = vadd.f32 %v12712_v4, %v6562_v62  ;;  %v12906_v59 = vadd.f32 %v6600_v51, %v12806_v39 }
0x2a28   :  { %v9920_v5 = vpop.f32.mrf.mxu1 }
0x2a29   :  { %v12902_v35 = vadd.f32 %v6599_v16, %v12811_v12  ;;  %v6593_v60 = vmax.f32 %v6563_v22, 0.0  ;;  %v6578_v18 = vadd.f32 %v12712_v4, %v9920_v5  ;;  %v6602_v50 = vmul.f32 %v6594_v49, %v12665_v61 }
0x2a2a   :  { %v6572_v36 = vpop.f32.mrf.mxu1 }
0x2a2b   :  { %v6601_v54 = vmul.f32 %v6593_v60, %v12665_v61  ;;  %v6596_v27 = vmax.f32 %v6578_v18, 0.0  ;;  %v6573_v3 = vadd.f32 %v12712_v4, %v6572_v36  ;;  %9932 = vmatprep.mubr.msk.f32.mxu0 %vm214_vm1, %v12902_v35  ;;  %v12921_v33 = vadd.f32 %v6602_v50, %v12817_v56 }
0x2a2c   :  { %v9923_v30 = vpop.f32.mrf.mxu1  ;;  %9933 = vmatmul.mubr.msk.f32.vlgmr.msra.gmra.mxu0 %vm214_vm1, %v12906_v59 }
0x2a2d   :  { %v12916_v12 = vadd.f32 %v6601_v54, %v12823_v0  ;;  %v6595_v39 = vmax.f32 %v6573_v3, 0.0  ;;  %v6588_v32 = vadd.f32 %v12712_v4, %v9923_v30  ;;  %9961 = vmatpush3.msra.mxu0 %v12639_v19  ;;  %v6604_v7 = vmul.f32 %v6596_v27, %v12665_v61 }
0x2a2e   :  { %v6582_v48 = vpop.f32.mrf.mxu1  ;;  %9962 = vmatprep.subr.mxu0 %v12645_v58 }
0x2a2f   :  { %v6603_v13 = vmul.f32 %v6595_v39, %v12665_v61  ;;  %v6598_v37 = vmax.f32 %v6588_v32, 0.0  ;;  %v6583_v26 = vadd.f32 %v12712_v4, %v6582_v48  ;;  %9935 = vmatprep.mubr.msk.f32.mxu0 %vm214_vm1, %v12916_v12  ;;  %9963 = vmatpush3.msra.mxu0 %v12645_v58  ;;  %v12939_v63 = vadd.f32 %v6604_v7, %v12826_v6 }
0x2a30   :  { %9936 = vmatmul.mubr.msk.f32.gmra.mxu0 %vm214_vm1, %v12921_v33  ;;  %9964 = vmatprep.subr.mxu0 %v12653_v40 }
0x2a31   :  { %v12934_v56 = vadd.f32 %v6603_v13, %v12832_v15  ;;  %v6606_v0 = vmul.f32 %v6598_v37, %v12665_v61  ;;  %v6597_v57 = vmax.f32 %v6583_v26, 0.0  ;;  %9965 = vmatpush3.msra.mxu0 %v12653_v40  ;;  %v13057_v13 = vstv %s6754_s30 }
0x2a32   :  { %9966 = vmatprep.subr.mxu0 %v12794_v46 }
0x2a33   :  { %v6605_v21 = vmul.f32 %v6597_v57, %v12665_v61  ;;  %9938 = vmatprep.mubr.msk.f32.mxu0 %vm214_vm1, %v12934_v56  ;;  %9967 = vmatpush3.msra.mxu0 %v12794_v46  ;;  %v12950_v15 = vadd.f32 %v6606_v0, %v12836_v47  ;;  %v6759_v44 = vpack.c.bf16 %v12939_v63, %v12934_v56 }
0x2a34   :  { %9939 = vmatmul.mubr.msk.f32.gmra.mxu0 %vm214_vm1, %v12939_v63  ;;  %9996 = vmatprep.subr.mxu0 %v12639_v19  ;;  %v6758_v47 = vpack.c.bf16 %v12921_v33, %v12916_v12 }
0x2a35   :  { %v12953_v6 = vadd.f32 %v6605_v21, %v12842_v10  ;;  %v6757_v10 = vpack.c.bf16 %v12906_v59, %v12902_v35 }
0x2a37   :  { %9941 = vmatprep.mubr.msk.f32.mxu0 %vm214_vm1, %v12953_v6  ;;  %v6760_v61 = vpack.c.bf16 %v12950_v15, %v12953_v6 }
0x2a38   :  { %9942 = vmatmul.mubr.msk.f32.gmra.mxu0 %vm214_vm1, %v12950_v15 }
0x2a39   :  { %9944 = vmatprep.subr.bf16.mxu1 %v6760_v61 }
0x2a3a   :  { %9945 = vmatpush3.bf16.msra.mxu1 %v6760_v61 }
0x2a3b   :  { %9946 = vmatprep.subr.bf16.mxu1 %v6759_v44 }
0x2a3e   :  { %9947 = vmatpush3.bf16.msra.mxu1 %v6759_v44 }
0x2a3f   :  { %9948 = vmatprep.subr.bf16.mxu1 %v6758_v47 }
0x2a42   :  { %9949 = vmatpush3.bf16.msra.mxu1 %v6758_v47 }
0x2a43   :  { %9950 = vmatprep.subr.bf16.mxu1 %v6757_v10 }
0x2a46   :  { %9951 = vmatpush3.bf16.msra.mxu1 %v6757_v10 }
0x2a49   :  { %9953 = vmatmul.mubr.msk.bf16.vlgmr.msra.gmra.mxu1 %vm395_vm2, %v12970_v11 }
0x2a4a   :  { %9956 = vmatprep.mubr.msk.bf16.mxu1 %vm395_vm2, %v12977_v1 }
0x2a51   :  { %9957 = vmatmul.mubr.msk.bf16.gmra.mxu1 %vm395_vm2, %v12770_v2 }
0x2a52   :  { %9988 = vmatprep.mubr.msk.bf16.mxu1 %vm395_vm2, %v12777_v8 }
0x2aec   :  { %v9934_v43 = vpop.f32.mrf.mxu0 }
0x2aed   :  { %8221 = vst.msk [vmem:[%s13390_s10 + $0x108] sm:$0xff] %vm65_vm0, %v9934_v43 }
0x2aee   :  { %v6705_v24 = vpop.f32.mrf.mxu0 }
0x2aef   :  { %8220 = vst.msk [vmem:[%s13390_s10 + $0x100] sm:$0xff] %vm65_vm0, %v6705_v24 }
0x2af0   :  { %v9937_v34 = vpop.f32.mrf.mxu0 }
0x2af1   :  { %8223 = vst.msk [vmem:[%s13390_s10 + $0x118] sm:$0xff] %vm65_vm0, %v9937_v34 }
0x2af2   :  { %v6715_v23 = vpop.f32.mrf.mxu0 }
0x2af3   :  { %8222 = vst.msk [vmem:[%s13390_s10 + $0x110] sm:$0xff] %vm65_vm0, %v6715_v23 }
0x2af4   :  { %v9940_v42 = vpop.f32.mrf.mxu0 }
0x2af5   :  { %8225 = vst.msk [vmem:[%s13390_s10 + $0x128] sm:$0xff] %vm65_vm0, %v9940_v42 }
0x2af6   :  { %v6725_v17 = vpop.f32.mrf.mxu0 }
0x2af7   :  { %8224 = vst.msk [vmem:[%s13390_s10 + $0x120] sm:$0xff] %vm65_vm0, %v6725_v17 }
0x2af8   :  { %v9943_v9 = vpop.f32.mrf.mxu0 }
0x2af9   :  { %8227 = vst.msk [vmem:[%s13390_s10 + $0x138] sm:$0xff] %vm65_vm0, %v9943_v9 }
0x2afa   :  { %v6735_v55 = vpop.f32.mrf.mxu0 }
0x2afb   :  { %8226 = vst.msk [vmem:[%s13390_s10 + $0x130] sm:$0xff] %vm65_vm0, %v6735_v55 }
0x2b09   :  { %v9954_v52 = vpop.f32.mrf.mxu1 }
0x2b0b   :  { %v6795_v29 = vpop.f32.mrf.mxu1 }
0x2b0c   :  { %9968 = vmatprep.mubr.msk.f32.mxu0 %vm214_vm1, %v6795_v29 }
0x2b0d   :  { %v9955_v14 = vpop.f32.mrf.mxu1 }
0x2b0f   :  { %v6798_v28 = vpop.f32.mrf.mxu1 }
0x2b10   :  { %9969 = vmatmul.mubr.msk.f32.vlgmr.msra.gmra.mxu0 %vm214_vm1, %v6798_v28 }
0x2b11   :  { %v9958_v53 = vpop.f32.mrf.mxu1  ;;  %9971 = vmatprep.mubr.msk.f32.mxu0 %vm214_vm1, %v9954_v52  ;;  %9997 = vmatpush3.msra.mxu0 %v12639_v19 }
0x2b12   :  { %9998 = vmatprep.subr.mxu0 %v12645_v58 }
0x2b13   :  { %v6811_v45 = vpop.f32.mrf.mxu1  ;;  %9999 = vmatpush3.msra.mxu0 %v12645_v58 }
0x2b14   :  { %9972 = vmatmul.mubr.msk.f32.gmra.mxu0 %vm214_vm1, %v9955_v14  ;;  %10000 = vmatprep.subr.mxu0 %v12653_v40 }
0x2b15   :  { %v9959_v31 = vpop.f32.mrf.mxu1  ;;  %9974 = vmatprep.mubr.msk.f32.mxu0 %vm214_vm1, %v6811_v45  ;;  %10001 = vmatpush3.msra.mxu0 %v12653_v40 }
0x2b16   :  { %10002 = vmatprep.subr.mxu0 %v12794_v46 }
0x2b17   :  { %v6814_v51 = vpop.f32.mrf.mxu1  ;;  %10003 = vmatpush3.msra.mxu0 %v12794_v46 }
0x2b18   :  { %9975 = vmatmul.mubr.msk.f32.gmra.mxu0 %vm214_vm1, %v6814_v51  ;;  %10032 = vmatprep.subr.mxu0 %v12639_v19 }
0x2b19   :  { %9977 = vmatprep.mubr.msk.f32.mxu0 %vm214_vm1, %v9958_v53 }
0x2b1c   :  { %9978 = vmatmul.mubr.msk.f32.gmra.mxu0 %vm214_vm1, %v9959_v31 }
0x2bd0   :  { %v9970_v62 = vpop.f32.mrf.mxu0 }
0x2bd1   :  { %v13071_v61 = vadd.f32 %v12712_v4, %v9970_v62 }
0x2bd2   :  { %v6916_v16 = vpop.f32.mrf.mxu0 }
0x2bd3   :  { %v13060_v37 = vadd.f32 %v12712_v4, %v6916_v16  ;;  %v6956_v17 = vmax.f32 %v13071_v61, 0.0 }
0x2bd4   :  { %v9973_v49 = vpop.f32.mrf.mxu0 }
0x2bd5   :  { %v13050_v39 = vadd.f32 %v12712_v4, %v9973_v49  ;;  %v6955_v43 = vmax.f32 %v13060_v37, 0.0  ;;  %v6982_v53 = vmul.f32 %v13057_v13, %v6956_v17 }
0x2bd6   :  { %v6926_v22 = vpop.f32.mrf.mxu0 }
0x2bd7   :  { %v13046_v27 = vadd.f32 %v12712_v4, %v6926_v22  ;;  %v6958_v44 = vmax.f32 %v13050_v39, 0.0  ;;  %v6981_v29 = vmul.f32 %v13057_v13, %v6955_v43  ;;  %v6990_v62 = vadd.f32 %v6982_v53, %v12906_v59 }
0x2bd8   :  { %v9976_v5 = vpop.f32.mrf.mxu0 }
0x2bd9   :  { %v13039_v50 = vadd.f32 %v12712_v4, %v9976_v5  ;;  %v6957_v26 = vmax.f32 %v13046_v27, 0.0  ;;  %v6984_v9 = vmul.f32 %v13057_v13, %v6958_v44  ;;  %v6989_v31 = vadd.f32 %v6981_v29, %v12902_v35 }
0x2bda   :  { %v6936_v60 = vpop.f32.mrf.mxu0 }
0x2bdb   :  { %v13036_v18 = vadd.f32 %v12712_v4, %v6936_v60  ;;  %v6960_v32 = vmax.f32 %v13039_v50, 0.0  ;;  %v6983_v24 = vmul.f32 %v13057_v13, %v6957_v26  ;;  %v6992_v45 = vadd.f32 %v6984_v9, %v12921_v33 }
0x2bdc   :  { %v9979_v36 = vpop.f32.mrf.mxu0  ;;  %v6997_v16 = vpack.c.bf16 %v6990_v62, %v6989_v31 }
0x2bdd   :  { %v13043_v54 = vadd.f32 %v12712_v4, %v9979_v36  ;;  %v6959_v3 = vmax.f32 %v13036_v18, 0.0  ;;  %v6986_v47 = vmul.f32 %v13057_v13, %v6960_v32  ;;  %v6991_v14 = vadd.f32 %v6983_v24, %v12916_v12 }
0x2bde   :  { %v6946_v30 = vpop.f32.mrf.mxu0 }
0x2bdf   :  { %v6962_v7 = vmax.f32 %v13043_v54, 0.0  ;;  %v13055_v48 = vadd.f32 %v12712_v4, %v6946_v30  ;;  %v6985_v0 = vmul.f32 %v13057_v13, %v6959_v3  ;;  %v6994_v55 = vadd.f32 %v6986_v47, %v12939_v63 }
0x2be0   :  { %v6998_v51 = vpack.c.bf16 %v6992_v45, %v6991_v14  ;;  %v13130_v47 = vstv %s6756_s12 }
0x2be1   :  { %v6988_v57 = vmul.f32 %v13057_v13, %v6962_v7  ;;  %v6961_v21 = vmax.f32 %v13055_v48, 0.0  ;;  %v6993_v34 = vadd.f32 %v6985_v0, %v12934_v56 }
0x2be3   :  { %v6987_v10 = vmul.f32 %v13057_v13, %v6961_v21  ;;  %v6996_v23 = vadd.f32 %v6988_v57, %v12950_v15  ;;  %v6999_v28 = vpack.c.bf16 %v6994_v55, %v6993_v34 }
0x2be5   :  { %v6995_v42 = vadd.f32 %v6987_v10, %v12953_v6 }
0x2be7   :  { %v7000_v52 = vpack.c.bf16 %v6996_v23, %v6995_v42 }
0x2be9   :  { %9980 = vmatprep.subr.bf16.mxu1 %v7000_v52 }
0x2bea   :  { %9981 = vmatpush3.bf16.msra.mxu1 %v7000_v52 }
0x2beb   :  { %9982 = vmatprep.subr.bf16.mxu1 %v6999_v28 }
0x2bee   :  { %9983 = vmatpush3.bf16.msra.mxu1 %v6999_v28 }
0x2bef   :  { %9984 = vmatprep.subr.bf16.mxu1 %v6998_v51 }
0x2bf2   :  { %9985 = vmatpush3.bf16.msra.mxu1 %v6998_v51 }
0x2bf3   :  { %9986 = vmatprep.subr.bf16.mxu1 %v6997_v16 }
0x2bf6   :  { %9987 = vmatpush3.bf16.msra.mxu1 %v6997_v16 }
0x2bf9   :  { %9989 = vmatmul.mubr.msk.bf16.vlgmr.msra.gmra.mxu1 %vm395_vm2, %v12970_v11 }
0x2bfa   :  { %9992 = vmatprep.mubr.msk.bf16.mxu1 %vm395_vm2, %v12977_v1 }
0x2c01   :  { %9993 = vmatmul.mubr.msk.bf16.gmra.mxu1 %vm395_vm2, %v12770_v2 }
0x2c02   :  { %10024 = vmatprep.mubr.msk.bf16.mxu1 %vm395_vm2, %v12777_v8 }
0x2cb9   :  { %v9990_v49 = vpop.f32.mrf.mxu1 }
0x2cbb   :  { %v7035_v22 = vpop.f32.mrf.mxu1 }
0x2cbc   :  { %10004 = vmatprep.mubr.msk.f32.mxu0 %vm214_vm1, %v7035_v22 }
0x2cbd   :  { %v9991_v5 = vpop.f32.mrf.mxu1 }
0x2cbf   :  { %v7038_v60 = vpop.f32.mrf.mxu1 }
0x2cc0   :  { %10005 = vmatmul.mubr.msk.f32.vlgmr.msra.gmra.mxu0 %vm214_vm1, %v7038_v60 }
0x2cc1   :  { %v9994_v36 = vpop.f32.mrf.mxu1  ;;  %10007 = vmatprep.mubr.msk.f32.mxu0 %vm214_vm1, %v9990_v49  ;;  %10033 = vmatpush3.msra.mxu0 %v12639_v19 }
0x2cc2   :  { %10034 = vmatprep.subr.mxu0 %v12645_v58 }
0x2cc3   :  { %v7051_v30 = vpop.f32.mrf.mxu1  ;;  %10035 = vmatpush3.msra.mxu0 %v12645_v58  ;;  %v13123_v58 = vstv %s6755_s11 }
0x2cc4   :  { %10008 = vmatmul.mubr.msk.f32.gmra.mxu0 %vm214_vm1, %v9991_v5  ;;  %10036 = vmatprep.subr.mxu0 %v12653_v40  ;;  %v6964_v24 = vmul.f32 %v13123_v58, %v6955_v43  ;;  %v6967_v52 = vmul.f32 %v13123_v58, %v6958_v44  ;;  %v6966_v53 = vmul.f32 %v13123_v58, %v6957_v26 }
0x2cc5   :  { %v9995_v37 = vpop.f32.mrf.mxu1  ;;  %10010 = vmatprep.mubr.msk.f32.mxu0 %vm214_vm1, %v7051_v30  ;;  %10037 = vmatpush3.msra.mxu0 %v12653_v40  ;;  %v6965_v40 = vmul.f32 %v13123_v58, %v6956_v17  ;;  %v6969_v45 = vmul.f32 %v13123_v58, %v6960_v32  ;;  %v6968_v50 = vmul.f32 %v13123_v58, %v6959_v3 }
0x2cc6   :  { %10038 = vmatprep.subr.mxu0 %v12794_v46  ;;  %v6972_v43 = vadd.f32 %v6964_v24, %v12902_v35  ;;  %v6975_v16 = vadd.f32 %v6967_v52, %v12921_v33  ;;  %v6974_v5 = vadd.f32 %v6966_v53, %v12916_v12 }
0x2cc7   :  { %v7054_v0 = vpop.f32.mrf.mxu1  ;;  %10039 = vmatpush3.msra.mxu0 %v12794_v46  ;;  %v6973_v42 = vadd.f32 %v6965_v40, %v12906_v59  ;;  %v6977_v60 = vadd.f32 %v6969_v45, %v12939_v63  ;;  %v6976_v24 = vadd.f32 %v6968_v50, %v12934_v56 }
0x2cc8   :  { %10011 = vmatmul.mubr.msk.f32.gmra.mxu0 %vm214_vm1, %v7054_v0  ;;  %10068 = vmatprep.subr.mxu0 %v12639_v19  ;;  %v6971_v0 = vmul.f32 %v13123_v58, %v6962_v7 }
0x2cc9   :  { %10013 = vmatprep.mubr.msk.f32.mxu0 %vm214_vm1, %v9994_v36 }
0x2ccc   :  { %10014 = vmatmul.mubr.msk.f32.gmra.mxu0 %vm214_vm1, %v9995_v37 }
0x2d80   :  { %v10006_v57 = vpop.f32.mrf.mxu0 }
0x2d81   :  { %v13128_v61 = vadd.f32 %v12712_v4, %v10006_v57 }
0x2d82   :  { %v7156_v10 = vpop.f32.mrf.mxu0 }
0x2d83   :  { %v7196_v19 = vmax.f32 %v13128_v61, 0.0  ;;  %v7157_v34 = vadd.f32 %v12712_v4, %v7156_v10 }
0x2d84   :  { %v10009_v23 = vpop.f32.mrf.mxu0 }
0x2d85   :  { %v7205_v9 = vmul.f32 %v13130_v47, %v7196_v19  ;;  %v7195_v17 = vmax.f32 %v7157_v34, 0.0  ;;  %v7172_v55 = vadd.f32 %v12712_v4, %v10009_v23  ;;  %v6970_v34 = vmul.f32 %v13123_v58, %v6961_v21 }
0x2d86   :  { %v7166_v29 = vpop.f32.mrf.mxu0 }
0x2d87   :  { %v13144_v14 = vadd.f32 %v7205_v9, %v6973_v42  ;;  %v7204_v28 = vmul.f32 %v13130_v47, %v7195_v17  ;;  %v7198_v31 = vmax.f32 %v7172_v55, 0.0  ;;  %v7167_v39 = vadd.f32 %v12712_v4, %v7166_v29 }
0x2d88   :  { %v10012_v51 = vpop.f32.mrf.mxu0  ;;  %v6979_v9 = vadd.f32 %v6971_v0, %v12950_v15  ;;  %v6978_v21 = vadd.f32 %v6970_v34, %v12953_v6 }
0x2d89   :  { %v13154_v44 = vadd.f32 %v7204_v28, %v6972_v43  ;;  %v7182_v62 = vadd.f32 %v12712_v4, %v10012_v51  ;;  %v7207_v49 = vmul.f32 %v13130_v47, %v7198_v31  ;;  %v7197_v22 = vmax.f32 %v7167_v39, 0.0 }
0x2d8a   :  { %v7176_v27 = vpop.f32.mrf.mxu0  ;;  %v7223_v50 = vmul.f32 %v7198_v31, %v13057_v13 }
0x2d8b   :  { %v7200_v26 = vmax.f32 %v7182_v62, 0.0  ;;  %v7177_v32 = vadd.f32 %v12712_v4, %v7176_v27  ;;  %v13165_v36 = vadd.f32 %v7207_v49, %v6975_v16  ;;  %v7206_v30 = vmul.f32 %v13130_v47, %v7197_v22 }
0x2d8c   :  { %v10015_v37 = vpop.f32.mrf.mxu0  ;;  %v7222_v51 = vmul.f32 %v7197_v22, %v13057_v13  ;;  %v7221_v22 = vmul.f32 %v7196_v19, %v13057_v13 }
0x2d8d   :  { %v7209_v18 = vmul.f32 %v13130_v47, %v7200_v26  ;;  %v7199_v57 = vmax.f32 %v7177_v32, 0.0  ;;  %v7192_v3 = vadd.f32 %v12712_v4, %v10015_v37  ;;  %v13173_v40 = vadd.f32 %v7206_v30, %v6974_v5 }
0x2d8e   :  { %v7186_v10 = vpop.f32.mrf.mxu0  ;;  %v7225_v28 = vmul.f32 %v7200_v26, %v13057_v13  ;;  %v7220_v5 = vmul.f32 %v7195_v17, %v13057_v13  ;;  %v7231_v37 = vadd.f32 %v7223_v50, %v12921_v33 }
0x2d8f   :  { %v13179_v23 = vadd.f32 %v7209_v18, %v6977_v60  ;;  %v7208_v54 = vmul.f32 %v13130_v47, %v7199_v57  ;;  %v7202_v42 = vmax.f32 %v7192_v3, 0.0  ;;  %v7187_v7 = vadd.f32 %v12712_v4, %v7186_v10  ;;  %v10173_v10 = vld [vmem:[%s13387_s7 + $0x18] sm:$0xff] }
0x2d90   :  { %v7224_v52 = vmul.f32 %v7199_v57, %v13057_v13  ;;  %v7233_v26 = vadd.f32 %v7225_v28, %v12939_v63  ;;  %v7230_v60 = vadd.f32 %v7222_v51, %v12916_v12  ;;  %v7228_v0 = vadd.f32 %v7220_v5, %v12902_v35 }
0x2d91   :  { %v13184_v55 = vadd.f32 %v7208_v54, %v6976_v24  ;;  %v7211_v29 = vmul.f32 %v13130_v47, %v7202_v42  ;;  %v7227_v43 = vmul.f32 %v7202_v42, %v13057_v13  ;;  %v7201_v48 = vmax.f32 %v7187_v7, 0.0  ;;  %v10175_v24 = vld [vmem:[%s13387_s7 + $0x8] sm:$0xff] }
0x2d92   :  { %v7232_v62 = vadd.f32 %v7224_v52, %v12934_v56  ;;  %v7237_v31 = vpack.c.bf16 %v7231_v37, %v7230_v60  ;;  %v7229_v18 = vadd.f32 %v7221_v22, %v12906_v59 }
0x2d93   :  { %v13191_v53 = vadd.f32 %v7211_v29, %v6979_v9  ;;  %v7210_v45 = vmul.f32 %v13130_v47, %v7201_v48  ;;  %v7226_v39 = vmul.f32 %v7201_v48, %v13057_v13  ;;  %v7235_v16 = vadd.f32 %v7227_v43, %v12950_v15 }
0x2d94   :  { %v7238_v30 = vpack.c.bf16 %v7233_v26, %v7232_v62  ;;  %v7236_v17 = vpack.c.bf16 %v7229_v18, %v7228_v0 }
0x2d95   :  { %v13198_v49 = vadd.f32 %v7210_v45, %v6978_v21  ;;  %v7234_v27 = vadd.f32 %v7226_v39, %v12953_v6 }
0x2d97   :  { %v7239_v32 = vpack.c.bf16 %v7235_v16, %v7234_v27 }
0x2d99   :  { %10016 = vmatprep.subr.bf16.mxu1 %v7239_v32 }
0x2d9a   :  { %10017 = vmatpush3.bf16.msra.mxu1 %v7239_v32 }
0x2d9b   :  { %10018 = vmatprep.subr.bf16.mxu1 %v7238_v30 }
0x2d9e   :  { %10019 = vmatpush3.bf16.msra.mxu1 %v7238_v30 }
0x2d9f   :  { %10020 = vmatprep.subr.bf16.mxu1 %v7237_v31 }
0x2da2   :  { %10021 = vmatpush3.bf16.msra.mxu1 %v7237_v31  ;;  %v13261_v31 = vld [vmem:[%s13388_s8] ss:$0 sm:$0xff] }
0x2da3   :  { %10022 = vmatprep.subr.bf16.mxu1 %v7236_v17 }
0x2da6   :  { %10023 = vmatpush3.bf16.msra.mxu1 %v7236_v17 }
0x2da9   :  { %10025 = vmatmul.mubr.msk.bf16.vlgmr.msra.gmra.mxu1 %vm395_vm2, %v12970_v11 }
0x2daa   :  { %10028 = vmatprep.mubr.msk.bf16.mxu1 %vm395_vm2, %v12977_v1 }
0x2db1   :  { %10029 = vmatmul.mubr.msk.bf16.gmra.mxu1 %vm395_vm2, %v12770_v2  ;;  %v10174_v2 = vld [vmem:[%s13387_s7 + $0x10] sm:$0xff] }
0x2db2   :  { %10060 = vmatprep.mubr.msk.bf16.mxu1 %vm395_vm2, %v12777_v8 }
0x2e69   :  { %v10026_v13 = vpop.f32.mrf.mxu1 }
0x2e6b   :  { %v7274_v61 = vpop.f32.mrf.mxu1 }
0x2e6c   :  { %10040 = vmatprep.mubr.msk.f32.mxu0 %vm214_vm1, %v7274_v61 }
0x2e6d   :  { %v10027_v19 = vpop.f32.mrf.mxu1 }
0x2e6f   :  { %v7277_v57 = vpop.f32.mrf.mxu1 }
0x2e70   :  { %10041 = vmatmul.mubr.msk.f32.vlgmr.msra.gmra.mxu0 %vm214_vm1, %v7277_v57  ;;  %v7458_v57 = vstv %s13033_s29 }
0x2e71   :  { %v10030_v3 = vpop.f32.mrf.mxu1  ;;  %10043 = vmatprep.mubr.msk.f32.mxu0 %vm214_vm1, %v10026_v13  ;;  %10069 = vmatpush3.msra.mxu0 %v10173_v10 }
0x2e72   :  { %10070 = vmatprep.subr.mxu0 %v10174_v2 }
0x2e73   :  { %v7290_v8 = vpop.f32.mrf.mxu1  ;;  %10071 = vmatpush3.msra.mxu0 %v10174_v2 }
0x2e74   :  { %10044 = vmatmul.mubr.msk.f32.gmra.mxu0 %vm214_vm1, %v10027_v19  ;;  %10072 = vmatprep.subr.mxu0 %v10175_v24 }
0x2e75   :  { %v10031_v34 = vpop.f32.mrf.mxu1  ;;  %10046 = vmatprep.mubr.msk.f32.mxu0 %vm214_vm1, %v7290_v8  ;;  %10073 = vmatpush3.msra.mxu0 %v10175_v24 }
0x2e76   :  { %10074 = vmatprep.subr.mxu0 %v12794_v46 }
0x2e77   :  { %v7293_v54 = vpop.f32.mrf.mxu1  ;;  %10075 = vmatpush3.msra.mxu0 %v12794_v46 }
0x2e78   :  { %10047 = vmatmul.mubr.msk.f32.gmra.mxu0 %vm214_vm1, %v7293_v54 }
0x2e79   :  { %10049 = vmatprep.mubr.msk.f32.mxu0 %vm214_vm1, %v10030_v3 }
0x2e7c   :  { %10050 = vmatmul.mubr.msk.f32.gmra.mxu0 %vm214_vm1, %v10031_v34 }
0x2f30   :  { %v10042_v42 = vpop.f32.mrf.mxu0 }
0x2f31   :  { %v7401_v7 = vadd.f32 %v12712_v4, %v10042_v42 }
0x2f32   :  { %v7395_v9 = vpop.f32.mrf.mxu0 }
0x2f33   :  { %v7435_v52 = vmax.f32 %v7401_v7, 0.0  ;;  %v7396_v29 = vadd.f32 %v12712_v4, %v7395_v9 }
0x2f34   :  { %v10045_v43 = vpop.f32.mrf.mxu0 }
0x2f35   :  { %v7443_v48 = vmul.f32 %v7435_v52, %v13130_v47  ;;  %v7434_v21 = vmax.f32 %v7396_v29, 0.0  ;;  %v7411_v28 = vadd.f32 %v12712_v4, %v10045_v43 }
0x2f36   :  { %v7405_v46 = vpop.f32.mrf.mxu0 }
0x2f37   :  { %v13243_v45 = vadd.f32 %v7443_v48, %v13144_v14  ;;  %v7442_v39 = vmul.f32 %v7434_v21, %v13130_v47  ;;  %v7437_v51 = vmax.f32 %v7411_v28, 0.0  ;;  %v7406_v62 = vadd.f32 %v12712_v4, %v7405_v46 }
0x2f38   :  { %v10048_v16 = vpop.f32.mrf.mxu0  ;;  %v7459_v46 = vmul.f32 %v7458_v57, %v7434_v21 }
0x2f39   :  { %v13248_v27 = vadd.f32 %v7442_v39, %v13154_v44  ;;  %v7421_v50 = vadd.f32 %v12712_v4, %v10048_v16  ;;  %v7445_v26 = vmul.f32 %v7437_v51, %v13130_v47  ;;  %v7436_v32 = vmax.f32 %v7406_v62, 0.0 }
0x2f3a   :  { %v7415_v5 = vpop.f32.mrf.mxu0  ;;  %v7462_v43 = vmul.f32 %v7458_v57, %v7437_v51  ;;  %v7460_v39 = vmul.f32 %v7458_v57, %v7435_v52 }
0x2f3b   :  { %v7439_v60 = vmax.f32 %v7421_v50, 0.0  ;;  %v7416_v14 = vadd.f32 %v12712_v4, %v7415_v5  ;;  %v13254_v30 = vadd.f32 %v7445_v26, %v13165_v36  ;;  %v7444_v22 = vmul.f32 %v7436_v32, %v13130_v47 }
0x2f3c   :  { %v10051_v37 = vpop.f32.mrf.mxu0  ;;  %v7461_v42 = vmul.f32 %v7458_v57, %v7436_v32 }
0x2f3d   :  { %v7447_v0 = vmul.f32 %v7439_v60, %v13130_v47  ;;  %v7438_v44 = vmax.f32 %v7416_v14, 0.0  ;;  %v7431_v18 = vadd.f32 %v13261_v31, %v10051_v37  ;;  %v13265_v17 = vadd.f32 %v7444_v22, %v13173_v40 }
0x2f3e   :  { %v7425_v4 = vpop.f32.mrf.mxu0  ;;  %v7464_v40 = vmul.f32 %v7458_v57, %v7439_v60 }
0x2f3f   :  { %v13268_v36 = vadd.f32 %v7447_v0, %v13179_v23  ;;  %v7446_v13 = vmul.f32 %v7438_v44, %v13130_v47  ;;  %v7441_v61 = vmax.f32 %v7431_v18, 0.0  ;;  %v7426_v19 = vadd.f32 %v13261_v31, %v7425_v4 }
0x2f40   :  { %v7463_v10 = vmul.f32 %v7458_v57, %v7438_v44  ;;  %v7472_v48 = vadd.f32 %v7464_v40, %v12939_v63 }
0x2f41   :  { %v13274_v3 = vadd.f32 %v7446_v13, %v13184_v55  ;;  %v7449_v2 = vmul.f32 %v7441_v61, %v13130_v47  ;;  %v7466_v8 = vmul.f32 %v7458_v57, %v7441_v61  ;;  %v7440_v24 = vmax.f32 %v7426_v19, 0.0 }
0x2f42   :  { %v7471_v7 = vadd.f32 %v7463_v10, %v12934_v56  ;;  %v7470_v56 = vadd.f32 %v7462_v43, %v12921_v33 }
0x2f43   :  { %v13278_v34 = vadd.f32 %v7449_v2, %v13191_v53  ;;  %v7448_v23 = vmul.f32 %v7440_v24, %v13130_v47  ;;  %v7465_v54 = vmul.f32 %v7458_v57, %v7440_v24  ;;  %v7474_v9 = vadd.f32 %v7466_v8, %v12950_v15 }
0x2f44   :  { %v7469_v53 = vadd.f32 %v7461_v42, %v12916_v12  ;;  %v7477_v47 = vpack.c.bf16 %v7472_v48, %v7471_v7  ;;  %v7467_v15 = vadd.f32 %v7459_v46, %v12902_v35  ;;  %v10177_v35 = vld [vmem:[%s13382_s2 + $0x18] sm:$0xff]  }
0x2f45   :  { %v13284_v55 = vadd.f32 %v7448_v23, %v13198_v49  ;;  %v7473_v29 = vadd.f32 %v7465_v54, %v12953_v6  ;;  %v7468_v6 = vadd.f32 %v7460_v39, %v12906_v59 }
0x2f46   :  { %v7476_v49 = vpack.c.bf16 %v7470_v56, %v7469_v53 }
0x2f47   :  { %v7478_v28 = vpack.c.bf16 %v7474_v9, %v7473_v29  ;;  %v7475_v51 = vpack.c.bf16 %v7468_v6, %v7467_v15 }
0x2f49   :  { %10052 = vmatprep.subr.bf16.mxu1 %v7478_v28 }
0x2f4a   :  { %10053 = vmatpush3.bf16.msra.mxu1 %v7478_v28 }
0x2f4b   :  { %10054 = vmatprep.subr.bf16.mxu1 %v7477_v47 }
0x2f4e   :  { %10055 = vmatpush3.bf16.msra.mxu1 %v7477_v47 }
0x2f4f   :  { %10056 = vmatprep.subr.bf16.mxu1 %v7476_v49 }
0x2f52   :  { %10057 = vmatpush3.bf16.msra.mxu1 %v7476_v49 }
0x2f53   :  { %10058 = vmatprep.subr.bf16.mxu1 %v7475_v51 }
0x2f56   :  { %10059 = vmatpush3.bf16.msra.mxu1 %v7475_v51 }
0x2f57   :  { %10088 = vmatprep.subr.mxu1 %v12853_v25 }
0x2f59   :  { %10061 = vmatmul.mubr.msk.bf16.vlgmr.msra.gmra.mxu1 %vm395_vm2, %v12970_v11 }
0x2f5a   :  { %10064 = vmatprep.mubr.msk.bf16.mxu1 %vm395_vm2, %v12977_v1  ;;  %10089 = vmatpush3.msra.mxu1 %v12853_v25 }
0x2f5b   :  { %10090 = vmatprep.subr.mxu1 %v12864_v20 }
0x2f5c   :  { %10091 = vmatpush3.msra.mxu1 %v12864_v20 }
0x2f5d   :  { %10092 = vmatprep.subr.mxu1 %v12871_v38 }
0x2f5e   :  { %10093 = vmatpush3.msra.mxu1 %v12871_v38 }
0x2f5f   :  { %10094 = vmatprep.subr.mxu1 %v12878_v41 }
0x2f60   :  { %10095 = vmatpush3.msra.mxu1 %v12878_v41 }
0x2f61   :  { %10065 = vmatmul.mubr.msk.bf16.gmra.mxu1 %vm395_vm2, %v10177_v35 }
0x3019   :  { %v10062_v59 = vpop.f32.mrf.mxu1 }
0x301b   :  { %v7513_v25 = vpop.f32.mrf.mxu1 }
0x301c   :  { %10076 = vmatprep.mubr.msk.f32.mxu0 %vm214_vm1, %v7513_v25 }
0x301d   :  { %v10063_v12 = vpop.f32.mrf.mxu1 }
0x301f   :  { %v7516_v20 = vpop.f32.mrf.mxu1 }
0x3020   :  { %10077 = vmatmul.mubr.msk.f32.vlgmr.msra.gmra.mxu0 %vm214_vm1, %v7516_v20 }
0x3021   :  { %v10066_v33 = vpop.f32.mrf.mxu1  ;;  %10079 = vmatprep.mubr.msk.f32.mxu0 %vm214_vm1, %v10062_v59 }
0x3023   :  { %v7529_v38 = vpop.f32.mrf.mxu1 }
0x3024   :  { %10080 = vmatmul.mubr.msk.f32.gmra.mxu0 %vm214_vm1, %v10063_v12 }
0x3025   :  { %v10067_v41 = vpop.f32.mrf.mxu1  ;;  %10082 = vmatprep.mubr.msk.f32.mxu0 %vm214_vm1, %v7529_v38 }
0x3027   :  { %v7532_v63 = vpop.f32.mrf.mxu1 }
0x3028   :  { %10083 = vmatmul.mubr.msk.f32.gmra.mxu0 %vm214_vm1, %v7532_v63 }
0x3029   :  { %10085 = vmatprep.mubr.msk.f32.mxu0 %vm214_vm1, %v10066_v33 }
0x302c   :  { %10086 = vmatmul.mubr.msk.f32.gmra.mxu0 %vm214_vm1, %v10067_v41 }
0x30e0   :  { %v10078_v11 = vpop.f32.mrf.mxu0 }
0x30e1   :  { %v7640_v1 = vadd.f32 %v13261_v31, %v10078_v11 }
0x30e2   :  { %v7634_v52 = vpop.f32.mrf.mxu0 }
0x30e3   :  { %v7674_v21 = vmax.f32 %v7640_v1, 0.0  ;;  %v7635_v62 = vadd.f32 %v13261_v31, %v7634_v52 }
0x30e4   :  { %v10081_v16 = vpop.f32.mrf.mxu0 }
0x30e5   :  { %v7673_v50 = vmax.f32 %v7635_v62, 0.0  ;;  %v7650_v26 = vadd.f32 %v13261_v31, %v10081_v16  ;;  %v7682_v32 = vmul.f32 %v7674_v21, %v13123_v58 }
0x30e6   :  { %v7644_v5 = vpop.f32.mrf.mxu0 }
0x30e7   :  { %v7681_v60 = vmul.f32 %v7673_v50, %v13123_v58  ;;  %v7676_v14 = vmax.f32 %v7650_v26, 0.0  ;;  %v7645_v22 = vadd.f32 %v13261_v31, %v7644_v5  ;;  %v7690_v4 = vadd.f32 %v7682_v32, %v13243_v45 }
0x30e8   :  { %v10084_v37 = vpop.f32.mrf.mxu0 }
0x30e9   :  { %v7689_v0 = vadd.f32 %v7681_v60, %v13248_v27  ;;  %v7675_v44 = vmax.f32 %v7645_v22, 0.0  ;;  %v7660_v18 = vadd.f32 %v13261_v31, %v10084_v37  ;;  %v7684_v13 = vmul.f32 %v7676_v14, %v13123_v58 }
0x30ea   :  { %v7654_v61 = vpop.f32.mrf.mxu0 }
0x30eb   :  { %v7683_v19 = vmul.f32 %v7675_v44, %v13123_v58  ;;  %v7678_v57 = vmax.f32 %v7660_v18, 0.0  ;;  %v7655_v10 = vadd.f32 %v13261_v31, %v7654_v61  ;;  %10096 = vmatprep.mubr.msk.f32.mxu1 %vm214_vm1, %v7689_v0  ;;  %v7692_v45 = vadd.f32 %v7684_v13, %v13254_v30 }
0x30ec   :  { %v10087_v2 = vpop.f32.mrf.mxu0  ;;  %10097 = vmatmul.mubr.msk.f32.vlgmr.msra.gmra.mxu1 %vm214_vm1, %v7690_v4 }
0x30ed   :  { %v7691_v27 = vadd.f32 %v7683_v19, %v13265_v17  ;;  %v7677_v8 = vmax.f32 %v7655_v10, 0.0  ;;  %v7670_v24 = vadd.f32 %v13261_v31, %v10087_v2  ;;  %v7686_v40 = vmul.f32 %v7678_v57, %v13123_v58 }
0x30ee   :  { %v7664_v23 = vpop.f32.mrf.mxu0 }
0x30ef   :  { %v7685_v54 = vmul.f32 %v7677_v8, %v13123_v58  ;;  %v7680_v42 = vmax.f32 %v7670_v24, 0.0  ;;  %v7665_v7 = vadd.f32 %v13261_v31, %v7664_v23  ;;  %10099 = vmatprep.mubr.msk.f32.mxu1 %vm214_vm1, %v7691_v27  ;;  %v7694_v29 = vadd.f32 %v7686_v40, %v13268_v36 }
0x30f0   :  { %10100 = vmatmul.mubr.msk.f32.gmra.mxu1 %vm214_vm1, %v7692_v45 }
0x30f1   :  { %v7693_v9 = vadd.f32 %v7685_v54, %v13274_v3  ;;  %v7679_v17 = vmax.f32 %v7665_v7, 0.0  ;;  %v7688_v43 = vmul.f32 %v7680_v42, %v13123_v58 }
0x30f3   :  { %v7687_v30 = vmul.f32 %v7679_v17, %v13123_v58  ;;  %10102 = vmatprep.mubr.msk.f32.mxu1 %vm214_vm1, %v7693_v9  ;;  %v7696_v31 = vadd.f32 %v7688_v43, %v13278_v34 }
0x30f4   :  { %10103 = vmatmul.mubr.msk.f32.gmra.mxu1 %vm214_vm1, %v7694_v29 }
0x30f5   :  { %v7695_v48 = vadd.f32 %v7687_v30, %v13284_v55 }
0x30f7   :  { %10105 = vmatprep.mubr.msk.f32.mxu1 %vm214_vm1, %v7695_v48 }
0x30f8   :  { %10106 = vmatmul.mubr.msk.f32.gmra.mxu1 %vm214_vm1, %v7696_v31 }
0x31ac   :  { %v10098_v3 = vpop.f32.mrf.mxu1 }
0x31ad   :  { %8286 = vst.msk [vmem:[%s13390_s10 + $0x148] sm:$0xff] %vm65_vm0, %v10098_v3 }
0x31ae   :  { %v7787_v36 = vpop.f32.mrf.mxu1 }
0x31af   :  { %8285 = vst.msk [vmem:[%s13390_s10 + $0x140] sm:$0xff] %vm65_vm0, %v7787_v36 }
0x31b0   :  { %v10101_v58 = vpop.f32.mrf.mxu1 }
0x31b1   :  { %8288 = vst.msk [vmem:[%s13390_s10 + $0x158] sm:$0xff] %vm65_vm0, %v10101_v58 }
0x31b2   :  { %v7797_v34 = vpop.f32.mrf.mxu1 }
0x31b3   :  { %8287 = vst.msk [vmem:[%s13390_s10 + $0x150] sm:$0xff] %vm65_vm0, %v7797_v34 }
0x31b4   :  { %v10104_v55 = vpop.f32.mrf.mxu1 }
0x31b5   :  { %8290 = vst.msk [vmem:[%s13390_s10 + $0x168] sm:$0xff] %vm65_vm0, %v10104_v55 }
0x31b6   :  { %v7807_v28 = vpop.f32.mrf.mxu1 }
0x31b7   :  { %8289 = vst.msk [vmem:[%s13390_s10 + $0x160] sm:$0xff] %vm65_vm0, %v7807_v28 }
0x31b8   :  { %v10107_v46 = vpop.f32.mrf.mxu1 }
0x31b9   :  { %8292 = vst.msk [vmem:[%s13390_s10 + $0x178] sm:$0xff] %vm65_vm0, %v10107_v46 }
0x31ba   :  { %v7817_v53 = vpop.f32.mrf.mxu1 }
0x31bb   :  { %8291 = vst.msk [vmem:[%s13390_s10 + $0x170] sm:$0xff] %vm65_vm0, %v7817_v53 }
0x31bc   :  { %7839 = vsyncpa [#allocation3], 1 }

</bundles_post_ra>
